<compile_context>
chip_gen: v6e
topology: v6e:2x2x1
jax: 0.10.0
libtpu: 0.0.40
codegen_flags: <defaults>
</compile_context>

<pallas_src>
import functools
import math

import jax
import jax.numpy as jnp
from jax.experimental import pallas as pl
from jax.experimental.pallas import tpu as pltpu


_LN_EPS = 1e-5  # PyTorch nn.LayerNorm default


def _vmem_limit_bytes():
    """Scoped-VMEM budget: ~3/4 of physical capacity (v7x: 64 MiB; v5e/v6e: 128 MiB)."""
    try:
        cap = pltpu.get_tpu_info().vmem_capacity_bytes
    except Exception:
        cap = 64 * 1024 * 1024  # conservative (v7x-sized) fallback
    return int(min(cap * 3 // 4, 96 * 1024 * 1024))


def _layer_norm(x, gamma, beta):
    mean = jnp.mean(x, axis=-1, keepdims=True)
    cent = x - mean
    var = jnp.mean(cent * cent, axis=-1, keepdims=True)
    return cent * jax.lax.rsqrt(var + _LN_EPS) * gamma + beta


# ---------------------------------------------------------------------------
# Kernel 1: fused Q|K|V projection -> head-major bf16 (B, H, S, Dh)
# ---------------------------------------------------------------------------
def _qkv_proj_kernel(x_ref, wqkv_ref, bqkv_ref, q_ref, k_ref, v_ref,
                     *, num_heads, head_dim):
    hd = num_heads * head_dim
    x = x_ref[0].astype(jnp.bfloat16)                                      # (tr, D)
    qkv = jnp.dot(x, wqkv_ref[...], preferred_element_type=jnp.float32)
    qkv = (qkv + bqkv_ref[...]).astype(jnp.bfloat16)                       # (tr, 3*H*Dh)
    # Split once per token (per layer) into head-major slabs so the flash kernel can
    # run fully batched over heads with no per-kv-step slicing / transposes.
    for h in range(num_heads):
        q_ref[0, h] = qkv[:, h * head_dim:(h + 1) * head_dim]
        k_ref[0, h] = qkv[:, hd + h * head_dim: hd + (h + 1) * head_dim]
        v_ref[0, h] = qkv[:, 2 * hd + h * head_dim: 2 * hd + (h + 1) * head_dim]


def qkv_project(x, w_qkv, b_qkv, *, num_heads, head_dim, row_tile=512):
    B, S, D = x.shape
    tr = min(row_tile, S)
    assert S % tr == 0 and (tr % 16 == 0 or tr == S)
    grid = (B, S // tr)
    full = lambda a: pl.BlockSpec(a.shape, lambda b, r: (0,) * a.ndim)
    head_out = jax.ShapeDtypeStruct((B, num_heads, S, head_dim), jnp.bfloat16)
    out_spec = pl.BlockSpec((1, num_heads, tr, head_dim), lambda b, r: (b, 0, r, 0))
    kernel = functools.partial(_qkv_proj_kernel,
                               num_heads=num_heads, head_dim=head_dim)
    return pl.pallas_call(
        kernel,
        out_shape=(head_out, head_out, head_out),
        grid_spec=pltpu.PrefetchScalarGridSpec(
            num_scalar_prefetch=0,
            grid=grid,
            in_specs=[pl.BlockSpec((1, tr, D), lambda b, r: (b, r, 0)),
                      full(w_qkv), full(b_qkv)],
            out_specs=(out_spec, out_spec, out_spec),
        ),
        compiler_params=pltpu.CompilerParams(
            dimension_semantics=("parallel", "parallel"),
            vmem_limit_bytes=_vmem_limit_bytes(),
        ),
    )(x, w_qkv, b_qkv)


# ---------------------------------------------------------------------------
# Kernel 2: flash-style multi-head attention + W0 + residual + LayerNorm
# ---------------------------------------------------------------------------
def _mha_addnorm_kernel(x_ref, q_ref, k_ref, v_ref,
                        w0_ref, b0_ref, gamma_ref, beta_ref,
                        o_ref,
                        m_scr, l_scr, acc_scr,
                        *, num_heads):
    ki = pl.program_id(2)

    @pl.when(ki == 0)
    def _init():
        m_scr[...] = jnp.full_like(m_scr, -jnp.inf)
        l_scr[...] = jnp.zeros_like(l_scr)
        acc_scr[...] = jnp.zeros_like(acc_scr)

    # Head-major bf16 operands straight from the projection kernel; scale already
    # folded into Q.  All softmax bookkeeping is batched over heads.
    q = q_ref[0]                                                           # (H, tq, Dh)
    k = k_ref[0]                                                           # (H, tk, Dh)
    v = v_ref[0]                                                           # (H, tk, Dh)

    s = jnp.einsum("hqd,hkd->hqk", q, k,
                   preferred_element_type=jnp.float32)                     # (H, tq, tk)
    m_prev = m_scr[...]
    m_new = jnp.maximum(m_prev, jnp.max(s, axis=-1, keepdims=True))
    alpha = jnp.exp(m_prev - m_new)
    p = jnp.exp(s - m_new)
    l_scr[...] = alpha * l_scr[...] + jnp.sum(p, axis=-1, keepdims=True)
    acc_scr[...] = alpha * acc_scr[...] + jnp.einsum(
        "hqk,hkd->hqd", p.astype(jnp.bfloat16), v,
        preferred_element_type=jnp.float32)
    m_scr[...] = m_new

    @pl.when(ki == pl.num_programs(2) - 1)
    def _finalize():
        # Deferred softmax normalization; approx reciprocal -> EUP slot.
        ctx = acc_scr[...] * pl.reciprocal(l_scr[...], approx=True)        # (H, tq, Dh)
        # Stage heads into one contiguous (tq, H*Dh) slab -> single full-depth W0 matmul.
        ctx2 = jnp.concatenate([ctx[h] for h in range(num_heads)],
                               axis=-1).astype(jnp.bfloat16)               # (tq, H*Dh)
        attn = jnp.dot(ctx2, w0_ref[...],
                       preferred_element_type=jnp.float32) + b0_ref[...]   # (tq, D)
        resid = x_ref[0].astype(jnp.float32) + attn
        o_ref[0] = _layer_norm(resid, gamma_ref[...], beta_ref[...]).astype(o_ref.dtype)


def mha_addnorm(x, q_h, k_h, v_h, w0, b0, gamma, beta,
                *, num_heads, head_dim, q_tile=512, kv_tile=512):
    B, S, D = x.shape
    hd = num_heads * head_dim
    assert w0.shape == (hd, D)
    tq = min(q_tile, S)
    tk = min(kv_tile, S)
    assert S % tq == 0 and S % tk == 0, "sequence length must tile evenly"
    assert (tq % 16 == 0 or tq == S) and (tk % 16 == 0 or tk == S)
    grid = (B, S // tq, S // tk)

    full = lambda a: pl.BlockSpec(a.shape, lambda b, qi, ki: (0,) * a.ndim)
    kernel = functools.partial(_mha_addnorm_kernel, num_heads=num_heads)

    return pl.pallas_call(
        kernel,
        # bf16 handoff to the FFN kernel: halves HBM writeback + re-read of (B,S,D).
        out_shape=jax.ShapeDtypeStruct((B, S, D), jnp.bfloat16),
        grid_spec=pltpu.PrefetchScalarGridSpec(
            num_scalar_prefetch=0,
            grid=grid,
            in_specs=[
                pl.BlockSpec((1, tq, D), lambda b, qi, ki: (b, qi, 0)),       # residual x
                pl.BlockSpec((1, num_heads, tq, head_dim),
                             lambda b, qi, ki: (b, 0, qi, 0)),                # Q (scaled)
                pl.BlockSpec((1, num_heads, tk, head_dim),
                             lambda b, qi, ki: (b, 0, ki, 0)),                # K
                pl.BlockSpec((1, num_heads, tk, head_dim),
                             lambda b, qi, ki: (b, 0, ki, 0)),                # V
                full(w0), full(b0), full(gamma), full(beta),
            ],
            out_specs=pl.BlockSpec((1, tq, D), lambda b, qi, ki: (b, qi, 0)),
            scratch_shapes=[
                pltpu.VMEM((num_heads, tq, 1), jnp.float32),          # running max m
                pltpu.VMEM((num_heads, tq, 1), jnp.float32),          # running denom l
                pltpu.VMEM((num_heads, tq, head_dim), jnp.float32),   # unnormalized ctx
            ],
        ),
        compiler_params=pltpu.CompilerParams(
            dimension_semantics=("parallel", "parallel", "arbitrary"),
            vmem_limit_bytes=_vmem_limit_bytes(),
        ),
    )(x, q_h, k_h, v_h, w0, b0, gamma, beta)


# ---------------------------------------------------------------------------
# Kernel 3: feed-forward (F-tiled) + residual + LayerNorm over rows of (B*S, D)
# ---------------------------------------------------------------------------
def _ffn_addnorm_kernel(x_ref, w1_ref, b1_ref, w2_ref, b2_ref,
                        gamma_ref, beta_ref, o_ref, acc_ref):
    fi = pl.program_id(1)

    @pl.when(fi == 0)
    def _init():
        acc_ref[...] = jnp.zeros_like(acc_ref)

    xb = x_ref[...].astype(jnp.bfloat16)                                   # (tr, D)
    t = jnp.dot(xb, w1_ref[...], preferred_element_type=jnp.float32) + b1_ref[...]
    t = jnp.maximum(t, 0.0)                                                # ReLU per F-block
    acc_ref[...] += jnp.dot(t.astype(jnp.bfloat16), w2_ref[...],
                            preferred_element_type=jnp.float32)            # (tr, D)

    @pl.when(fi == pl.num_programs(1) - 1)
    def _finalize():
        resid = x_ref[...].astype(jnp.float32) + acc_ref[...] + b2_ref[...]
        o_ref[...] = _layer_norm(resid, gamma_ref[...], beta_ref[...]).astype(o_ref.dtype)


def ffn_addnorm(x2d, w1, b1, w2, b2, gamma, beta,
                *, out_dtype, row_tile=512, f_tile=512):
    N, D = x2d.shape
    F = w1.shape[1]
    tr = min(row_tile, N)
    tf = min(f_tile, F)
    assert N % tr == 0 and (tr % 16 == 0 or tr == N)
    assert F % tf == 0 and (tf % 128 == 0 or tf == F)

    full = lambda a: pl.BlockSpec(a.shape, lambda r, f: (0,) * a.ndim)

    return pl.pallas_call(
        _ffn_addnorm_kernel,
        out_shape=jax.ShapeDtypeStruct((N, D), out_dtype),
        grid_spec=pltpu.PrefetchScalarGridSpec(
            num_scalar_prefetch=0,
            grid=(N // tr, F // tf),
            in_specs=[
                pl.BlockSpec((tr, D), lambda r, f: (r, 0)),     # activations (resident over F)
                pl.BlockSpec((D, tf), lambda r, f: (0, f)),     # w1 column block
                pl.BlockSpec((1, tf), lambda r, f: (0, f)),     # b1 block
                pl.BlockSpec((tf, D), lambda r, f: (f, 0)),     # w2 row block
                full(b2), full(gamma), full(beta),
            ],
            out_specs=pl.BlockSpec((tr, D), lambda r, f: (r, 0)),
            scratch_shapes=[pltpu.VMEM((tr, D), jnp.float32)],  # second-matmul accumulator
        ),
        compiler_params=pltpu.CompilerParams(
            dimension_semantics=("parallel", "arbitrary"),
            vmem_limit_bytes=_vmem_limit_bytes(),
        ),
    )(x2d, w1, b1, w2, b2, gamma, beta)


# ---------------------------------------------------------------------------
# EncoderBlock / Encoder wrappers
# ---------------------------------------------------------------------------
def encoder_block(x, p, *, num_heads, head_dim, out_dtype,
                  q_tile=512, kv_tile=512, row_tile=512, f_tile=512, proj_tile=512):
    B, S, D = x.shape
    scale = 1.0 / math.sqrt(head_dim)
    # Fold the 1/sqrt(Dh) scale into the Q weights/bias and fuse Q|K|V into one matmul.
    w_qkv = jnp.concatenate([p["w_q"] * scale, p["w_k"], p["w_v"]],
                            axis=1).astype(jnp.bfloat16)
    b_qkv = jnp.concatenate([p["b_q"] * scale, p["b_k"], p["b_v"]],
                            axis=1).astype(jnp.float32)

    # Projection kernel: Q/K/V computed ONCE per layer (no recompute per q-tile).
    q_h, k_h, v_h = qkv_project(x, w_qkv, b_qkv, num_heads=num_heads,
                                head_dim=head_dim, row_tile=proj_tile)

    # Flash MHA + W0 + residual + LayerNorm (AddandNorm params, reused twice per block).
    h1 = mha_addnorm(x, q_h, k_h, v_h,
                     p["w0"].astype(jnp.bfloat16), p["b0"], p["gamma"], p["beta"],
                     num_heads=num_heads, head_dim=head_dim,
                     q_tile=q_tile, kv_tile=kv_tile)

    # FFN (F-tiled) + residual + LayerNorm.
    y2d = ffn_addnorm(h1.reshape(B * S, D),
                      p["w1"].astype(jnp.bfloat16), p["b1"],
                      p["w2"].astype(jnp.bfloat16), p["b2"],
                      p["gamma"], p["beta"],
                      out_dtype=out_dtype, row_tile=row_tile, f_tile=f_tile)
    return y2d.reshape(B, S, D)


def encoder_forward(x, params, *, num_heads, head_dim,
                    q_tile=512, kv_tile=512, row_tile=512, f_tile=512, proj_tile=512):
    n = len(params)
    out = x
    for i, p in enumerate(params):
        # Intermediate blocks hand off bf16 activations; the last block restores x.dtype.
        out_dtype = x.dtype if i == n - 1 else jnp.bfloat16
        out = encoder_block(out, p, num_heads=num_heads, head_dim=head_dim,
                            out_dtype=out_dtype, q_tile=q_tile, kv_tile=kv_tile,
                            row_tile=row_tile, f_tile=f_tile, proj_tile=proj_tile)
    return out


# ---------------------------------------------------------------------------
# Pure-JAX f32 reference (mirrors the PyTorch module semantics exactly)
# ---------------------------------------------------------------------------
def _encoder_reference(x, params, *, num_heads, head_dim):
    for p in params:
        heads = []
        for h in range(num_heads):
            sl = slice(h * head_dim, (h + 1) * head_dim)
            q = x @ p["w_q"][:, sl] + p["b_q"][:, sl]
            k = x @ p["w_k"][:, sl] + p["b_k"][:, sl]
            v = x @ p["w_v"][:, sl] + p["b_v"][:, sl]
            s = jnp.einsum("bqd,bkd->bqk", q, k) / math.sqrt(head_dim)
            w = jax.nn.softmax(s, axis=-1)
            heads.append(jnp.einsum("bqk,bkd->bqd", w, v))
        ctx = jnp.concatenate(heads, axis=-1)
        attn = ctx @ p["w0"] + p["b0"]
        h1 = _layer_norm(x + attn, p["gamma"], p["beta"])
        ff = jnp.maximum(h1 @ p["w1"] + p["b1"], 0.0) @ p["w2"] + p["b2"]
        x = _layer_norm(h1 + ff, p["gamma"], p["beta"])
    return x


if __name__ == "__main__":
    # Small shapes consistent with the module:
    # batch=2, seq=32, input_dim=32, 2 heads x head_dim 16, FF hidden 256, 2 encoder blocks.
    # q_tile = kv_tile = 16 -> the flash (online-softmax) loop runs 2 kv steps;
    # f_tile = 128 -> the FFN accumulator loop runs 2 F steps.
    B, S, D = 2, 32, 32
    H, Dh, F = 2, 16, 256
    NUM_BLOCKS = 2
    HD = H * Dh

    key = jax.random.PRNGKey(0)
    key, kx = jax.random.split(key)
    x = jax.random.normal(kx, (B, S, D), dtype=jnp.float32)

    def linear_init(k, fan_in, shape):
        bound = 1.0 / math.sqrt(fan_in)
        return jax.random.uniform(k, shape, jnp.float32, -bound, bound)

    params = []
    for _ in range(NUM_BLOCKS):
        key, *ks = jax.random.split(key, 13)
        params.append(dict(
            # per-head q/k/v Linear weights packed along the last dim: (D, H*Dh) each
            w_q=linear_init(ks[0], D, (D, HD)),
            b_q=linear_init(ks[1], D, (1, HD)),
            w_k=linear_init(ks[2], D, (D, HD)),
            b_k=linear_init(ks[3], D, (1, HD)),
            w_v=linear_init(ks[4], D, (D, HD)),
            b_v=linear_init(ks[5], D, (1, HD)),
            w0=linear_init(ks[6], HD, (HD, D)),
            b0=linear_init(ks[7], HD, (1, D)),
            # nn.LayerNorm default init; one AddandNorm module reused twice per block
            gamma=jnp.ones((1, D), jnp.float32),
            beta=jnp.zeros((1, D), jnp.float32),
            w1=linear_init(ks[8], D, (D, F)),
            b1=linear_init(ks[9], D, (1, F)),
            w2=linear_init(ks[10], F, (F, D)),
            b2=linear_init(ks[11], F, (1, D)),
        ))

    run = jax.jit(functools.partial(
        encoder_forward, num_heads=H, head_dim=Dh,
        q_tile=16, kv_tile=16, row_tile=16, f_tile=128, proj_tile=16))
    out = jax.block_until_ready(run(x, params))

    ref = _encoder_reference(x, params, num_heads=H, head_dim=Dh)
    assert out.shape == (B, S, D)
    # bf16 MXU operands / bf16 activation handoff (f32 accumulation & LayerNorm math)
    # vs an all-f32 reference -> bf16-level tolerance.
    err = float(jnp.max(jnp.abs(out.astype(jnp.float32) - ref)))
    assert jnp.allclose(out.astype(jnp.float32), ref, atol=8e-2, rtol=8e-2), err

    print("KERNEL_OK")
</pallas_src>

<mosaic_0001>
module attributes {stable_mosaic.version = 11 : i64} {
  func.func @_qkv_proj_kernel(%arg0: i32, %arg1: i32, %arg2: memref<1x16x32xf32, #tpu.memory_space<vmem>>, %arg3: memref<32x96xbf16, #tpu.memory_space<vmem>>, %arg4: memref<1x96xf32, #tpu.memory_space<vmem>>, %arg5: memref<1x2x16x16xbf16, #tpu.memory_space<vmem>>, %arg6: memref<1x2x16x16xbf16, #tpu.memory_space<vmem>>, %arg7: memref<1x2x16x16xbf16, #tpu.memory_space<vmem>>) attributes {dimension_semantics = [#tpu.dimension_semantics<parallel>, #tpu.dimension_semantics<parallel>], iteration_bounds = array<i64: 2, 2>, scalar_prefetch = 0 : i64, scratch_operands = 0 : i64, tpu.core_type = #tpu.core_type<tc>, window_params = [{transform_indices = @transform_0, window_bounds = array<i64: 1, 16, 32>}, {pipeline_mode = #tpu.pipeline_mode<synchronous>, transform_indices = @transform_1, window_bounds = array<i64: 32, 96>}, {pipeline_mode = #tpu.pipeline_mode<synchronous>, transform_indices = @transform_2, window_bounds = array<i64: 1, 96>}, {transform_indices = @transform_3, window_bounds = array<i64: 1, 2, 16, 16>}, {transform_indices = @transform_4, window_bounds = array<i64: 1, 2, 16, 16>}, {transform_indices = @transform_5, window_bounds = array<i64: 1, 2, 16, 16>}]} {
    %c0 = arith.constant 0 : index
    %c0_0 = arith.constant 0 : index
    %c0_1 = arith.constant 0 : index
    %0 = vector.load %arg2[%c0, %c0_0, %c0_1] : memref<1x16x32xf32, #tpu.memory_space<vmem>>, vector<1x16x32xf32>
    %1 = vector.shape_cast %0 : vector<1x16x32xf32> to vector<16x32xf32>
    %2 = arith.truncf %1 : vector<16x32xf32> to vector<16x32xbf16>
    %c0_2 = arith.constant 0 : index
    %c0_3 = arith.constant 0 : index
    %3 = vector.load %arg3[%c0_2, %c0_3] : memref<32x96xbf16, #tpu.memory_space<vmem>>, vector<32x96xbf16>
    %cst = arith.constant dense<0.000000e+00> : vector<16x96xf32>
    %4 = tpu.matmul %2, %3, %cst {dimension_numbers = #tpu.dot_dimension_numbers<[1], [0], [0], [1], [0, 0, 1, 1], [], []>} : vector<16x32xbf16>, vector<32x96xbf16>, vector<16x96xf32> -> vector<16x96xf32>
    %c0_4 = arith.constant 0 : index
    %c0_5 = arith.constant 0 : index
    %5 = vector.load %arg4[%c0_4, %c0_5] : memref<1x96xf32, #tpu.memory_space<vmem>>, vector<1x96xf32>
    %6 = vector.broadcast %5 : vector<1x96xf32> to vector<16x96xf32>
    %7 = arith.addf %4, %6 : vector<16x96xf32>
    %8 = arith.truncf %7 : vector<16x96xf32> to vector<16x96xbf16>
    %9 = vector.extract_strided_slice %8 {offsets = [0, 0], sizes = [16, 16], strides = [1, 1]} : vector<16x96xbf16> to vector<16x16xbf16>
    %c0_6 = arith.constant 0 : index
    %c0_7 = arith.constant 0 : index
    %c0_8 = arith.constant 0 : index
    %c0_9 = arith.constant 0 : index
    %10 = vector.load %arg5[%c0_6, %c0_7, %c0_8, %c0_9] : memref<1x2x16x16xbf16, #tpu.memory_space<vmem>>, vector<1x1x16x16xbf16>
    %11 = vector.shape_cast %10 : vector<1x1x16x16xbf16> to vector<16x16xbf16>
    %12 = vector.shape_cast %9 : vector<16x16xbf16> to vector<1x1x16x16xbf16>
    tpu.vector_store %arg5[%c0_6, %c0_7, %c0_8, %c0_9], %12 {strides = array<i32>} : memref<1x2x16x16xbf16, #tpu.memory_space<vmem>>, vector<1x1x16x16xbf16>,
    %13 = vector.extract_strided_slice %8 {offsets = [0, 32], sizes = [16, 16], strides = [1, 1]} : vector<16x96xbf16> to vector<16x16xbf16>
    %c0_10 = arith.constant 0 : index
    %c0_11 = arith.constant 0 : index
    %c0_12 = arith.constant 0 : index
    %c0_13 = arith.constant 0 : index
    %14 = vector.load %arg6[%c0_10, %c0_11, %c0_12, %c0_13] : memref<1x2x16x16xbf16, #tpu.memory_space<vmem>>, vector<1x1x16x16xbf16>
    %15 = vector.shape_cast %14 : vector<1x1x16x16xbf16> to vector<16x16xbf16>
    %16 = vector.shape_cast %13 : vector<16x16xbf16> to vector<1x1x16x16xbf16>
    tpu.vector_store %arg6[%c0_10, %c0_11, %c0_12, %c0_13], %16 {strides = array<i32>} : memref<1x2x16x16xbf16, #tpu.memory_space<vmem>>, vector<1x1x16x16xbf16>,
    %17 = vector.extract_strided_slice %8 {offsets = [0, 64], sizes = [16, 16], strides = [1, 1]} : vector<16x96xbf16> to vector<16x16xbf16>
    %c0_14 = arith.constant 0 : index
    %c0_15 = arith.constant 0 : index
    %c0_16 = arith.constant 0 : index
    %c0_17 = arith.constant 0 : index
    %18 = vector.load %arg7[%c0_14, %c0_15, %c0_16, %c0_17] : memref<1x2x16x16xbf16, #tpu.memory_space<vmem>>, vector<1x1x16x16xbf16>
    %19 = vector.shape_cast %18 : vector<1x1x16x16xbf16> to vector<16x16xbf16>
    %20 = vector.shape_cast %17 : vector<16x16xbf16> to vector<1x1x16x16xbf16>
    tpu.vector_store %arg7[%c0_14, %c0_15, %c0_16, %c0_17], %20 {strides = array<i32>} : memref<1x2x16x16xbf16, #tpu.memory_space<vmem>>, vector<1x1x16x16xbf16>,
    %21 = vector.extract_strided_slice %8 {offsets = [0, 16], sizes = [16, 16], strides = [1, 1]} : vector<16x96xbf16> to vector<16x16xbf16>
    %c0_18 = arith.constant 0 : index
    %c1 = arith.constant 1 : index
    %c0_19 = arith.constant 0 : index
    %c0_20 = arith.constant 0 : index
    %22 = vector.load %arg5[%c0_18, %c1, %c0_19, %c0_20] : memref<1x2x16x16xbf16, #tpu.memory_space<vmem>>, vector<1x1x16x16xbf16>
    %23 = vector.shape_cast %22 : vector<1x1x16x16xbf16> to vector<16x16xbf16>
    %24 = vector.shape_cast %21 : vector<16x16xbf16> to vector<1x1x16x16xbf16>
    tpu.vector_store %arg5[%c0_18, %c1, %c0_19, %c0_20], %24 {strides = array<i32>} : memref<1x2x16x16xbf16, #tpu.memory_space<vmem>>, vector<1x1x16x16xbf16>,
    %25 = vector.extract_strided_slice %8 {offsets = [0, 48], sizes = [16, 16], strides = [1, 1]} : vector<16x96xbf16> to vector<16x16xbf16>
    %c0_21 = arith.constant 0 : index
    %c1_22 = arith.constant 1 : index
    %c0_23 = arith.constant 0 : index
    %c0_24 = arith.constant 0 : index
    %26 = vector.load %arg6[%c0_21, %c1_22, %c0_23, %c0_24] : memref<1x2x16x16xbf16, #tpu.memory_space<vmem>>, vector<1x1x16x16xbf16>
    %27 = vector.shape_cast %26 : vector<1x1x16x16xbf16> to vector<16x16xbf16>
    %28 = vector.shape_cast %25 : vector<16x16xbf16> to vector<1x1x16x16xbf16>
    tpu.vector_store %arg6[%c0_21, %c1_22, %c0_23, %c0_24], %28 {strides = array<i32>} : memref<1x2x16x16xbf16, #tpu.memory_space<vmem>>, vector<1x1x16x16xbf16>,
    %29 = vector.extract_strided_slice %8 {offsets = [0, 80], sizes = [16, 16], strides = [1, 1]} : vector<16x96xbf16> to vector<16x16xbf16>
    %c0_25 = arith.constant 0 : index
    %c1_26 = arith.constant 1 : index
    %c0_27 = arith.constant 0 : index
    %c0_28 = arith.constant 0 : index
    %30 = vector.load %arg7[%c0_25, %c1_26, %c0_27, %c0_28] : memref<1x2x16x16xbf16, #tpu.memory_space<vmem>>, vector<1x1x16x16xbf16>
    %31 = vector.shape_cast %30 : vector<1x1x16x16xbf16> to vector<16x16xbf16>
    %32 = vector.shape_cast %29 : vector<16x16xbf16> to vector<1x1x16x16xbf16>
    tpu.vector_store %arg7[%c0_25, %c1_26, %c0_27, %c0_28], %32 {strides = array<i32>} : memref<1x2x16x16xbf16, #tpu.memory_space<vmem>>, vector<1x1x16x16xbf16>,
    return
  }
  func.func @transform_0(%arg0: i32, %arg1: i32) -> (i32, i32, i32) {
    %c0_i32 = arith.constant 0 : i32
    %c0_i32_0 = arith.constant 0 : i32
    return %arg0, %arg1, %c0_i32 : i32, i32, i32
  }
  func.func @transform_1(%arg0: i32, %arg1: i32) -> (i32, i32) {
    %c0_i32 = arith.constant 0 : i32
    %c0_i32_0 = arith.constant 0 : i32
    %c0_i32_1 = arith.constant 0 : i32
    return %c0_i32, %c0_i32_0 : i32, i32
  }
  func.func @transform_2(%arg0: i32, %arg1: i32) -> (i32, i32) {
    %c0_i32 = arith.constant 0 : i32
    %c0_i32_0 = arith.constant 0 : i32
    %c0_i32_1 = arith.constant 0 : i32
    return %c0_i32, %c0_i32_0 : i32, i32
  }
  func.func @transform_3(%arg0: i32, %arg1: i32) -> (i32, i32, i32, i32) {
    %c0_i32 = arith.constant 0 : i32
    %c0_i32_0 = arith.constant 0 : i32
    %c0_i32_1 = arith.constant 0 : i32
    return %arg0, %c0_i32, %arg1, %c0_i32_0 : i32, i32, i32, i32
  }
  func.func @transform_4(%arg0: i32, %arg1: i32) -> (i32, i32, i32, i32) {
    %c0_i32 = arith.constant 0 : i32
    %c0_i32_0 = arith.constant 0 : i32
    %c0_i32_1 = arith.constant 0 : i32
    return %arg0, %c0_i32, %arg1, %c0_i32_0 : i32, i32, i32, i32
  }
  func.func @transform_5(%arg0: i32, %arg1: i32) -> (i32, i32, i32, i32) {
    %c0_i32 = arith.constant 0 : i32
    %c0_i32_0 = arith.constant 0 : i32
    %c0_i32_1 = arith.constant 0 : i32
    return %arg0, %c0_i32, %arg1, %c0_i32_0 : i32, i32, i32, i32
  }
}

module attributes {stable_mosaic.version = 11 : i64} {
  func.func @_ffn_addnorm_kernel(%arg0: i32, %arg1: i32, %arg2: memref<16x32xbf16, #tpu.memory_space<vmem>>, %arg3: memref<32x128xbf16, #tpu.memory_space<vmem>>, %arg4: memref<1x128xf32, #tpu.memory_space<vmem>>, %arg5: memref<128x32xbf16, #tpu.memory_space<vmem>>, %arg6: memref<1x32xf32, #tpu.memory_space<vmem>>, %arg7: memref<1x32xf32, #tpu.memory_space<vmem>>, %arg8: memref<1x32xf32, #tpu.memory_space<vmem>>, %arg9: memref<16x32xbf16, #tpu.memory_space<vmem>>, %arg10: memref<16x32xf32, #tpu.memory_space<vmem>>) attributes {dimension_semantics = [#tpu.dimension_semantics<parallel>, #tpu.dimension_semantics<arbitrary>], iteration_bounds = array<i64: 4, 2>, scalar_prefetch = 0 : i64, scratch_operands = 1 : i64, tpu.core_type = #tpu.core_type<tc>, window_params = [{transform_indices = @transform_0, window_bounds = array<i64: 16, 32>}, {transform_indices = @transform_1, window_bounds = array<i64: 32, 128>}, {transform_indices = @transform_2, window_bounds = array<i64: 1, 128>}, {transform_indices = @transform_3, window_bounds = array<i64: 128, 32>}, {pipeline_mode = #tpu.pipeline_mode<synchronous>, transform_indices = @transform_4, window_bounds = array<i64: 1, 32>}, {pipeline_mode = #tpu.pipeline_mode<synchronous>, transform_indices = @transform_5, window_bounds = array<i64: 1, 32>}, {pipeline_mode = #tpu.pipeline_mode<synchronous>, transform_indices = @transform_6, window_bounds = array<i64: 1, 32>}, {transform_indices = @transform_7, window_bounds = array<i64: 16, 32>}]} {
    %c0_i32 = arith.constant 0 : i32
    %0 = arith.cmpi eq, %arg1, %c0_i32 : i32
    %1 = arith.extui %0 : i1 to i32
    %c0_i32_0 = arith.constant 0 : i32
    %2 = arith.cmpi ne, %1, %c0_i32_0 : i32
    scf.if %2 {
      %cst_15 = arith.constant 0.000000e+00 : f32
      %20 = vector.broadcast %cst_15 : f32 to vector<16x32xf32>
      %c0_16 = arith.constant 0 : index
      %c0_17 = arith.constant 0 : index
      %21 = vector.load %arg10[%c0_16, %c0_17] : memref<16x32xf32, #tpu.memory_space<vmem>>, vector<16x32xf32>
      tpu.vector_store %arg10[%c0_16, %c0_17], %20 {strides = array<i32>} : memref<16x32xf32, #tpu.memory_space<vmem>>, vector<16x32xf32>,
    } else {
    }
    %c0 = arith.constant 0 : index
    %c0_1 = arith.constant 0 : index
    %3 = vector.load %arg2[%c0, %c0_1] : memref<16x32xbf16, #tpu.memory_space<vmem>>, vector<16x32xbf16>
    %c0_2 = arith.constant 0 : index
    %c0_3 = arith.constant 0 : index
    %4 = vector.load %arg3[%c0_2, %c0_3] : memref<32x128xbf16, #tpu.memory_space<vmem>>, vector<32x128xbf16>
    %cst = arith.constant dense<0.000000e+00> : vector<16x128xf32>
    %5 = tpu.matmul %3, %4, %cst {dimension_numbers = #tpu.dot_dimension_numbers<[1], [0], [0], [1], [0, 0, 1, 1], [], []>} : vector<16x32xbf16>, vector<32x128xbf16>, vector<16x128xf32> -> vector<16x128xf32>
    %c0_4 = arith.constant 0 : index
    %c0_5 = arith.constant 0 : index
    %6 = vector.load %arg4[%c0_4, %c0_5] : memref<1x128xf32, #tpu.memory_space<vmem>>, vector<1x128xf32>
    %7 = vector.broadcast %6 : vector<1x128xf32> to vector<16x128xf32>
    %8 = arith.addf %5, %7 : vector<16x128xf32>
    %cst_6 = arith.constant 0.000000e+00 : f32
    %9 = vector.broadcast %cst_6 : f32 to vector<16x128xf32>
    %10 = arith.maximumf %8, %9 : vector<16x128xf32>
    %c0_7 = arith.constant 0 : index
    %c0_8 = arith.constant 0 : index
    %11 = vector.load %arg10[%c0_7, %c0_8] : memref<16x32xf32, #tpu.memory_space<vmem>>, vector<16x32xf32>
    %12 = arith.truncf %10 : vector<16x128xf32> to vector<16x128xbf16>
    %c0_9 = arith.constant 0 : index
    %c0_10 = arith.constant 0 : index
    %13 = vector.load %arg5[%c0_9, %c0_10] : memref<128x32xbf16, #tpu.memory_space<vmem>>, vector<128x32xbf16>
    %cst_11 = arith.constant dense<0.000000e+00> : vector<16x32xf32>
    %14 = tpu.matmul %12, %13, %cst_11 {dimension_numbers = #tpu.dot_dimension_numbers<[1], [0], [0], [1], [0, 0, 1, 1], [], []>} : vector<16x128xbf16>, vector<128x32xbf16>, vector<16x32xf32> -> vector<16x32xf32>
    %15 = arith.addf %11, %14 : vector<16x32xf32>
    %c0_12 = arith.constant 0 : index
    %c0_13 = arith.constant 0 : index
    %16 = vector.load %arg10[%c0_12, %c0_13] : memref<16x32xf32, #tpu.memory_space<vmem>>, vector<16x32xf32>
    tpu.vector_store %arg10[%c0_12, %c0_13], %15 {strides = array<i32>} : memref<16x32xf32, #tpu.memory_space<vmem>>, vector<16x32xf32>,
    %c1_i32 = arith.constant 1 : i32
    %17 = arith.cmpi eq, %arg1, %c1_i32 : i32
    %18 = arith.extui %17 : i1 to i32
    %c0_i32_14 = arith.constant 0 : i32
    %19 = arith.cmpi ne, %18, %c0_i32_14 : i32
    scf.if %19 {
      %c0_15 = arith.constant 0 : index
      %c0_16 = arith.constant 0 : index
      %20 = vector.load %arg2[%c0_15, %c0_16] : memref<16x32xbf16, #tpu.memory_space<vmem>>, vector<16x32xbf16>
      %21 = arith.extf %20 : vector<16x32xbf16> to vector<16x32xf32>
      %c0_17 = arith.constant 0 : index
      %c0_18 = arith.constant 0 : index
      %22 = vector.load %arg10[%c0_17, %c0_18] : memref<16x32xf32, #tpu.memory_space<vmem>>, vector<16x32xf32>
      %23 = arith.addf %21, %22 : vector<16x32xf32>
      %c0_19 = arith.constant 0 : index
      %c0_20 = arith.constant 0 : index
      %24 = vector.load %arg6[%c0_19, %c0_20] : memref<1x32xf32, #tpu.memory_space<vmem>>, vector<1x32xf32>
      %25 = vector.broadcast %24 : vector<1x32xf32> to vector<16x32xf32>
      %26 = arith.addf %23, %25 : vector<16x32xf32>
      %c0_21 = arith.constant 0 : index
      %c0_22 = arith.constant 0 : index
      %27 = vector.load %arg7[%c0_21, %c0_22] : memref<1x32xf32, #tpu.memory_space<vmem>>, vector<1x32xf32>
      %c0_23 = arith.constant 0 : index
      %c0_24 = arith.constant 0 : index
      %28 = vector.load %arg8[%c0_23, %c0_24] : memref<1x32xf32, #tpu.memory_space<vmem>>, vector<1x32xf32>
      %cst_25 = arith.constant dense<0.000000e+00> : vector<16xf32>
      %29 = vector.multi_reduction <add>, %26, %cst_25 [1] : vector<16x32xf32> to vector<16xf32>
      %30 = vector.shape_cast %29 : vector<16xf32> to vector<16x1xf32>
      %cst_26 = arith.constant 3.200000e+01 : f32
      %31 = vector.broadcast %cst_26 : f32 to vector<16x1xf32>
      %32 = arith.divf %30, %31 : vector<16x1xf32>
      %33 = vector.broadcast %32 : vector<16x1xf32> to vector<16x32xf32>
      %34 = arith.subf %26, %33 : vector<16x32xf32>
      %35 = arith.mulf %34, %34 : vector<16x32xf32>
      %cst_27 = arith.constant dense<0.000000e+00> : vector<16xf32>
      %36 = vector.multi_reduction <add>, %35, %cst_27 [1] : vector<16x32xf32> to vector<16xf32>
      %37 = vector.shape_cast %36 : vector<16xf32> to vector<16x1xf32>
      %cst_28 = arith.constant 3.200000e+01 : f32
      %38 = vector.broadcast %cst_28 : f32 to vector<16x1xf32>
      %39 = arith.divf %37, %38 : vector<16x1xf32>
      %cst_29 = arith.constant 9.99999974E-6 : f32
      %40 = vector.broadcast %cst_29 : f32 to vector<16x1xf32>
      %41 = arith.addf %39, %40 : vector<16x1xf32>
      %42 = math.rsqrt %41 : vector<16x1xf32>
      %43 = vector.broadcast %42 : vector<16x1xf32> to vector<16x32xf32>
      %44 = arith.mulf %34, %43 : vector<16x32xf32>
      %45 = vector.broadcast %27 : vector<1x32xf32> to vector<16x32xf32>
      %46 = arith.mulf %44, %45 : vector<16x32xf32>
      %47 = vector.broadcast %28 : vector<1x32xf32> to vector<16x32xf32>
      %48 = arith.addf %46, %47 : vector<16x32xf32>
      %49 = arith.truncf %48 : vector<16x32xf32> to vector<16x32xbf16>
      %c0_30 = arith.constant 0 : index
      %c0_31 = arith.constant 0 : index
      %50 = vector.load %arg9[%c0_30, %c0_31] : memref<16x32xbf16, #tpu.memory_space<vmem>>, vector<16x32xbf16>
      tpu.vector_store %arg9[%c0_30, %c0_31], %49 {strides = array<i32>} : memref<16x32xbf16, #tpu.memory_space<vmem>>, vector<16x32xbf16>,
    } else {
    }
    return
  }
  func.func @transform_0(%arg0: i32, %arg1: i32) -> (i32, i32) {
    %c0_i32 = arith.constant 0 : i32
    %c0_i32_0 = arith.constant 0 : i32
    return %arg0, %c0_i32 : i32, i32
  }
  func.func @transform_1(%arg0: i32, %arg1: i32) -> (i32, i32) {
    %c0_i32 = arith.constant 0 : i32
    %c0_i32_0 = arith.constant 0 : i32
    return %c0_i32, %arg1 : i32, i32
  }
  func.func @transform_2(%arg0: i32, %arg1: i32) -> (i32, i32) {
    %c0_i32 = arith.constant 0 : i32
    %c0_i32_0 = arith.constant 0 : i32
    return %c0_i32, %arg1 : i32, i32
  }
  func.func @transform_3(%arg0: i32, %arg1: i32) -> (i32, i32) {
    %c0_i32 = arith.constant 0 : i32
    %c0_i32_0 = arith.constant 0 : i32
    return %arg1, %c0_i32 : i32, i32
  }
  func.func @transform_4(%arg0: i32, %arg1: i32) -> (i32, i32) {
    %c0_i32 = arith.constant 0 : i32
    %c0_i32_0 = arith.constant 0 : i32
    %c0_i32_1 = arith.constant 0 : i32
    return %c0_i32, %c0_i32_0 : i32, i32
  }
  func.func @transform_5(%arg0: i32, %arg1: i32) -> (i32, i32) {
    %c0_i32 = arith.constant 0 : i32
    %c0_i32_0 = arith.constant 0 : i32
    %c0_i32_1 = arith.constant 0 : i32
    return %c0_i32, %c0_i32_0 : i32, i32
  }
  func.func @transform_6(%arg0: i32, %arg1: i32) -> (i32, i32) {
    %c0_i32 = arith.constant 0 : i32
    %c0_i32_0 = arith.constant 0 : i32
    %c0_i32_1 = arith.constant 0 : i32
    return %c0_i32, %c0_i32_0 : i32, i32
  }
  func.func @transform_7(%arg0: i32, %arg1: i32) -> (i32, i32) {
    %c0_i32 = arith.constant 0 : i32
    %c0_i32_0 = arith.constant 0 : i32
    return %arg0, %c0_i32 : i32, i32
  }
}

module attributes {stable_mosaic.version = 11 : i64} {
  func.func @_mha_addnorm_kernel(%arg0: i32, %arg1: i32, %arg2: i32, %arg3: memref<1x16x32xf32, #tpu.memory_space<vmem>>, %arg4: memref<1x2x16x16xbf16, #tpu.memory_space<vmem>>, %arg5: memref<1x2x16x16xbf16, #tpu.memory_space<vmem>>, %arg6: memref<1x2x16x16xbf16, #tpu.memory_space<vmem>>, %arg7: memref<32x32xbf16, #tpu.memory_space<vmem>>, %arg8: memref<1x32xf32, #tpu.memory_space<vmem>>, %arg9: memref<1x32xf32, #tpu.memory_space<vmem>>, %arg10: memref<1x32xf32, #tpu.memory_space<vmem>>, %arg11: memref<1x16x32xbf16, #tpu.memory_space<vmem>>, %arg12: memref<2x16x1xf32, #tpu.memory_space<vmem>>, %arg13: memref<2x16x1xf32, #tpu.memory_space<vmem>>, %arg14: memref<2x16x16xf32, #tpu.memory_space<vmem>>) attributes {dimension_semantics = [#tpu.dimension_semantics<parallel>, #tpu.dimension_semantics<parallel>, #tpu.dimension_semantics<arbitrary>], iteration_bounds = array<i64: 2, 2, 2>, scalar_prefetch = 0 : i64, scratch_operands = 3 : i64, tpu.core_type = #tpu.core_type<tc>, window_params = [{transform_indices = @transform_0, window_bounds = array<i64: 1, 16, 32>}, {transform_indices = @transform_1, window_bounds = array<i64: 1, 2, 16, 16>}, {transform_indices = @transform_2, window_bounds = array<i64: 1, 2, 16, 16>}, {transform_indices = @transform_3, window_bounds = array<i64: 1, 2, 16, 16>}, {pipeline_mode = #tpu.pipeline_mode<synchronous>, transform_indices = @transform_4, window_bounds = array<i64: 32, 32>}, {pipeline_mode = #tpu.pipeline_mode<synchronous>, transform_indices = @transform_5, window_bounds = array<i64: 1, 32>}, {pipeline_mode = #tpu.pipeline_mode<synchronous>, transform_indices = @transform_6, window_bounds = array<i64: 1, 32>}, {pipeline_mode = #tpu.pipeline_mode<synchronous>, transform_indices = @transform_7, window_bounds = array<i64: 1, 32>}, {transform_indices = @transform_8, window_bounds = array<i64: 1, 16, 32>}]} {
    %c0_i32 = arith.constant 0 : i32
    %0 = arith.cmpi eq, %arg2, %c0_i32 : i32
    %1 = arith.extui %0 : i1 to i32
    %c0_i32_0 = arith.constant 0 : i32
    %2 = arith.cmpi ne, %1, %c0_i32_0 : i32
    scf.if %2 {
      %cst_34 = arith.constant 0xFF800000 : f32
      %36 = vector.broadcast %cst_34 : f32 to vector<2x16x1xf32>
      %c0_35 = arith.constant 0 : index
      %c0_36 = arith.constant 0 : index
      %c0_37 = arith.constant 0 : index
      %37 = vector.load %arg12[%c0_35, %c0_36, %c0_37] : memref<2x16x1xf32, #tpu.memory_space<vmem>>, vector<2x16x1xf32>
      tpu.vector_store %arg12[%c0_35, %c0_36, %c0_37], %36 {strides = array<i32>} : memref<2x16x1xf32, #tpu.memory_space<vmem>>, vector<2x16x1xf32>,
      %cst_38 = arith.constant 0.000000e+00 : f32
      %38 = vector.broadcast %cst_38 : f32 to vector<2x16x1xf32>
      %c0_39 = arith.constant 0 : index
      %c0_40 = arith.constant 0 : index
      %c0_41 = arith.constant 0 : index
      %39 = vector.load %arg13[%c0_39, %c0_40, %c0_41] : memref<2x16x1xf32, #tpu.memory_space<vmem>>, vector<2x16x1xf32>
      tpu.vector_store %arg13[%c0_39, %c0_40, %c0_41], %38 {strides = array<i32>} : memref<2x16x1xf32, #tpu.memory_space<vmem>>, vector<2x16x1xf32>,
      %cst_42 = arith.constant 0.000000e+00 : f32
      %40 = vector.broadcast %cst_42 : f32 to vector<2x16x16xf32>
      %c0_43 = arith.constant 0 : index
      %c0_44 = arith.constant 0 : index
      %c0_45 = arith.constant 0 : index
      %41 = vector.load %arg14[%c0_43, %c0_44, %c0_45] : memref<2x16x16xf32, #tpu.memory_space<vmem>>, vector<2x16x16xf32>
      tpu.vector_store %arg14[%c0_43, %c0_44, %c0_45], %40 {strides = array<i32>} : memref<2x16x16xf32, #tpu.memory_space<vmem>>, vector<2x16x16xf32>,
    } else {
    }
    %c0 = arith.constant 0 : index
    %c0_1 = arith.constant 0 : index
    %c0_2 = arith.constant 0 : index
    %c0_3 = arith.constant 0 : index
    %3 = vector.load %arg4[%c0, %c0_1, %c0_2, %c0_3] : memref<1x2x16x16xbf16, #tpu.memory_space<vmem>>, vector<1x2x16x16xbf16>
    %4 = vector.shape_cast %3 : vector<1x2x16x16xbf16> to vector<2x16x16xbf16>
    %c0_4 = arith.constant 0 : index
    %c0_5 = arith.constant 0 : index
    %c0_6 = arith.constant 0 : index
    %c0_7 = arith.constant 0 : index
    %5 = vector.load %arg5[%c0_4, %c0_5, %c0_6, %c0_7] : memref<1x2x16x16xbf16, #tpu.memory_space<vmem>>, vector<1x2x16x16xbf16>
    %6 = vector.shape_cast %5 : vector<1x2x16x16xbf16> to vector<2x16x16xbf16>
    %c0_8 = arith.constant 0 : index
    %c0_9 = arith.constant 0 : index
    %c0_10 = arith.constant 0 : index
    %c0_11 = arith.constant 0 : index
    %7 = vector.load %arg6[%c0_8, %c0_9, %c0_10, %c0_11] : memref<1x2x16x16xbf16, #tpu.memory_space<vmem>>, vector<1x2x16x16xbf16>
    %8 = vector.shape_cast %7 : vector<1x2x16x16xbf16> to vector<2x16x16xbf16>
    "tpu.trace_start"() <{level = 10 : i32, message = "hqd,hkd->hqk"}> : () -> ()
    %cst = arith.constant dense<0.000000e+00> : vector<2x16x16xf32>
    %9 = tpu.matmul %4, %6, %cst {dimension_numbers = #tpu.dot_dimension_numbers<[2], [2], [1], [1], [0, 0, 0, 1, 1, 1], [0], [0]>} : vector<2x16x16xbf16>, vector<2x16x16xbf16>, vector<2x16x16xf32> -> vector<2x16x16xf32>
    "tpu.trace_stop"() : () -> ()
    %c0_12 = arith.constant 0 : index
    %c0_13 = arith.constant 0 : index
    %c0_14 = arith.constant 0 : index
    %10 = vector.load %arg12[%c0_12, %c0_13, %c0_14] : memref<2x16x1xf32, #tpu.memory_space<vmem>>, vector<2x16x1xf32>
    %cst_15 = arith.constant dense<0xFF800000> : vector<2x16xf32>
    %11 = vector.multi_reduction <maximumf>, %9, %cst_15 [2] : vector<2x16x16xf32> to vector<2x16xf32>
    %12 = vector.shape_cast %11 : vector<2x16xf32> to vector<2x16x1xf32>
    %13 = arith.maximumf %10, %12 : vector<2x16x1xf32>
    %14 = arith.subf %10, %13 : vector<2x16x1xf32>
    %15 = math.exp %14 : vector<2x16x1xf32>
    %16 = vector.broadcast %13 : vector<2x16x1xf32> to vector<2x16x16xf32>
    %17 = arith.subf %9, %16 : vector<2x16x16xf32>
    %18 = math.exp %17 : vector<2x16x16xf32>
    %c0_16 = arith.constant 0 : index
    %c0_17 = arith.constant 0 : index
    %c0_18 = arith.constant 0 : index
    %19 = vector.load %arg13[%c0_16, %c0_17, %c0_18] : memref<2x16x1xf32, #tpu.memory_space<vmem>>, vector<2x16x1xf32>
    %20 = arith.mulf %15, %19 : vector<2x16x1xf32>
    %cst_19 = arith.constant dense<0.000000e+00> : vector<2x16xf32>
    %21 = vector.multi_reduction <add>, %18, %cst_19 [2] : vector<2x16x16xf32> to vector<2x16xf32>
    %22 = vector.shape_cast %21 : vector<2x16xf32> to vector<2x16x1xf32>
    %23 = arith.addf %20, %22 : vector<2x16x1xf32>
    %c0_20 = arith.constant 0 : index
    %c0_21 = arith.constant 0 : index
    %c0_22 = arith.constant 0 : index
    %24 = vector.load %arg13[%c0_20, %c0_21, %c0_22] : memref<2x16x1xf32, #tpu.memory_space<vmem>>, vector<2x16x1xf32>
    tpu.vector_store %arg13[%c0_20, %c0_21, %c0_22], %23 {strides = array<i32>} : memref<2x16x1xf32, #tpu.memory_space<vmem>>, vector<2x16x1xf32>,
    %c0_23 = arith.constant 0 : index
    %c0_24 = arith.constant 0 : index
    %c0_25 = arith.constant 0 : index
    %25 = vector.load %arg14[%c0_23, %c0_24, %c0_25] : memref<2x16x16xf32, #tpu.memory_space<vmem>>, vector<2x16x16xf32>
    %26 = vector.broadcast %15 : vector<2x16x1xf32> to vector<2x16x16xf32>
    %27 = arith.mulf %26, %25 : vector<2x16x16xf32>
    %28 = arith.truncf %18 : vector<2x16x16xf32> to vector<2x16x16xbf16>
    "tpu.trace_start"() <{level = 10 : i32, message = "hqk,hkd->hqd"}> : () -> ()
    %cst_26 = arith.constant dense<0.000000e+00> : vector<2x16x16xf32>
    %29 = tpu.matmul %28, %8, %cst_26 {dimension_numbers = #tpu.dot_dimension_numbers<[2], [1], [1], [2], [0, 0, 0, 1, 1, 2], [0], [0]>} : vector<2x16x16xbf16>, vector<2x16x16xbf16>, vector<2x16x16xf32> -> vector<2x16x16xf32>
    "tpu.trace_stop"() : () -> ()
    %30 = arith.addf %27, %29 : vector<2x16x16xf32>
    %c0_27 = arith.constant 0 : index
    %c0_28 = arith.constant 0 : index
    %c0_29 = arith.constant 0 : index
    %31 = vector.load %arg14[%c0_27, %c0_28, %c0_29] : memref<2x16x16xf32, #tpu.memory_space<vmem>>, vector<2x16x16xf32>
    tpu.vector_store %arg14[%c0_27, %c0_28, %c0_29], %30 {strides = array<i32>} : memref<2x16x16xf32, #tpu.memory_space<vmem>>, vector<2x16x16xf32>,
    %c0_30 = arith.constant 0 : index
    %c0_31 = arith.constant 0 : index
    %c0_32 = arith.constant 0 : index
    %32 = vector.load %arg12[%c0_30, %c0_31, %c0_32] : memref<2x16x1xf32, #tpu.memory_space<vmem>>, vector<2x16x1xf32>
    tpu.vector_store %arg12[%c0_30, %c0_31, %c0_32], %13 {strides = array<i32>} : memref<2x16x1xf32, #tpu.memory_space<vmem>>, vector<2x16x1xf32>,
    %c1_i32 = arith.constant 1 : i32
    %33 = arith.cmpi eq, %arg2, %c1_i32 : i32
    %34 = arith.extui %33 : i1 to i32
    %c0_i32_33 = arith.constant 0 : i32
    %35 = arith.cmpi ne, %34, %c0_i32_33 : i32
    scf.if %35 {
      %c0_34 = arith.constant 0 : index
      %c0_35 = arith.constant 0 : index
      %c0_36 = arith.constant 0 : index
      %36 = vector.load %arg14[%c0_34, %c0_35, %c0_36] : memref<2x16x16xf32, #tpu.memory_space<vmem>>, vector<2x16x16xf32>
      %c0_37 = arith.constant 0 : index
      %c0_38 = arith.constant 0 : index
      %c0_39 = arith.constant 0 : index
      %37 = vector.load %arg13[%c0_37, %c0_38, %c0_39] : memref<2x16x1xf32, #tpu.memory_space<vmem>>, vector<2x16x1xf32>
      %38 = tpu.reciprocal %37 {approx = true} : vector<2x16x1xf32> -> vector<2x16x1xf32>
      %39 = vector.broadcast %38 : vector<2x16x1xf32> to vector<2x16x16xf32>
      %40 = arith.mulf %36, %39 : vector<2x16x16xf32>
      %41 = vector.extract_strided_slice %40 {offsets = [0, 0, 0], sizes = [1, 16, 16], strides = [1, 1, 1]} : vector<2x16x16xf32> to vector<1x16x16xf32>
      %42 = vector.shape_cast %41 : vector<1x16x16xf32> to vector<16x16xf32>
      %43 = vector.extract_strided_slice %40 {offsets = [1, 0, 0], sizes = [1, 16, 16], strides = [1, 1, 1]} : vector<2x16x16xf32> to vector<1x16x16xf32>
      %44 = vector.shape_cast %43 : vector<1x16x16xf32> to vector<16x16xf32>
      %45 = tpu.concatenate %42, %44 in 1 : vector<16x16xf32>, vector<16x16xf32> -> vector<16x32xf32>
      %46 = arith.truncf %45 : vector<16x32xf32> to vector<16x32xbf16>
      %c0_40 = arith.constant 0 : index
      %c0_41 = arith.constant 0 : index
      %47 = vector.load %arg7[%c0_40, %c0_41] : memref<32x32xbf16, #tpu.memory_space<vmem>>, vector<32x32xbf16>
      %cst_42 = arith.constant dense<0.000000e+00> : vector<16x32xf32>
      %48 = tpu.matmul %46, %47, %cst_42 {dimension_numbers = #tpu.dot_dimension_numbers<[1], [0], [0], [1], [0, 0, 1, 1], [], []>} : vector<16x32xbf16>, vector<32x32xbf16>, vector<16x32xf32> -> vector<16x32xf32>
      %c0_43 = arith.constant 0 : index
      %c0_44 = arith.constant 0 : index
      %49 = vector.load %arg8[%c0_43, %c0_44] : memref<1x32xf32, #tpu.memory_space<vmem>>, vector<1x32xf32>
      %50 = vector.broadcast %49 : vector<1x32xf32> to vector<16x32xf32>
      %51 = arith.addf %48, %50 : vector<16x32xf32>
      %c0_45 = arith.constant 0 : index
      %c0_46 = arith.constant 0 : index
      %c0_47 = arith.constant 0 : index
      %52 = vector.load %arg3[%c0_45, %c0_46, %c0_47] : memref<1x16x32xf32, #tpu.memory_space<vmem>>, vector<1x16x32xf32>
      %53 = vector.shape_cast %52 : vector<1x16x32xf32> to vector<16x32xf32>
      %54 = arith.addf %53, %51 : vector<16x32xf32>
      %c0_48 = arith.constant 0 : index
      %c0_49 = arith.constant 0 : index
      %55 = vector.load %arg9[%c0_48, %c0_49] : memref<1x32xf32, #tpu.memory_space<vmem>>, vector<1x32xf32>
      %c0_50 = arith.constant 0 : index
      %c0_51 = arith.constant 0 : index
      %56 = vector.load %arg10[%c0_50, %c0_51] : memref<1x32xf32, #tpu.memory_space<vmem>>, vector<1x32xf32>
      %cst_52 = arith.constant dense<0.000000e+00> : vector<16xf32>
      %57 = vector.multi_reduction <add>, %54, %cst_52 [1] : vector<16x32xf32> to vector<16xf32>
      %58 = vector.shape_cast %57 : vector<16xf32> to vector<16x1xf32>
      %cst_53 = arith.constant 3.200000e+01 : f32
      %59 = vector.broadcast %cst_53 : f32 to vector<16x1xf32>
      %60 = arith.divf %58, %59 : vector<16x1xf32>
      %61 = vector.broadcast %60 : vector<16x1xf32> to vector<16x32xf32>
      %62 = arith.subf %54, %61 : vector<16x32xf32>
      %63 = arith.mulf %62, %62 : vector<16x32xf32>
      %cst_54 = arith.constant dense<0.000000e+00> : vector<16xf32>
      %64 = vector.multi_reduction <add>, %63, %cst_54 [1] : vector<16x32xf32> to vector<16xf32>
      %65 = vector.shape_cast %64 : vector<16xf32> to vector<16x1xf32>
      %cst_55 = arith.constant 3.200000e+01 : f32
      %66 = vector.broadcast %cst_55 : f32 to vector<16x1xf32>
      %67 = arith.divf %65, %66 : vector<16x1xf32>
      %cst_56 = arith.constant 9.99999974E-6 : f32
      %68 = vector.broadcast %cst_56 : f32 to vector<16x1xf32>
      %69 = arith.addf %67, %68 : vector<16x1xf32>
      %70 = math.rsqrt %69 : vector<16x1xf32>
      %71 = vector.broadcast %70 : vector<16x1xf32> to vector<16x32xf32>
      %72 = arith.mulf %62, %71 : vector<16x32xf32>
      %73 = vector.broadcast %55 : vector<1x32xf32> to vector<16x32xf32>
      %74 = arith.mulf %72, %73 : vector<16x32xf32>
      %75 = vector.broadcast %56 : vector<1x32xf32> to vector<16x32xf32>
      %76 = arith.addf %74, %75 : vector<16x32xf32>
      %77 = arith.truncf %76 : vector<16x32xf32> to vector<16x32xbf16>
      %c0_57 = arith.constant 0 : index
      %c0_58 = arith.constant 0 : index
      %c0_59 = arith.constant 0 : index
      %78 = vector.load %arg11[%c0_57, %c0_58, %c0_59] : memref<1x16x32xbf16, #tpu.memory_space<vmem>>, vector<1x16x32xbf16>
      %79 = vector.shape_cast %78 : vector<1x16x32xbf16> to vector<16x32xbf16>
      %80 = vector.shape_cast %77 : vector<16x32xbf16> to vector<1x16x32xbf16>
      tpu.vector_store %arg11[%c0_57, %c0_58, %c0_59], %80 {strides = array<i32>} : memref<1x16x32xbf16, #tpu.memory_space<vmem>>, vector<1x16x32xbf16>,
    } else {
    }
    return
  }
  func.func @transform_0(%arg0: i32, %arg1: i32, %arg2: i32) -> (i32, i32, i32) {
    %c0_i32 = arith.constant 0 : i32
    %c0_i32_0 = arith.constant 0 : i32
    return %arg0, %arg1, %c0_i32 : i32, i32, i32
  }
  func.func @transform_1(%arg0: i32, %arg1: i32, %arg2: i32) -> (i32, i32, i32, i32) {
    %c0_i32 = arith.constant 0 : i32
    %c0_i32_0 = arith.constant 0 : i32
    %c0_i32_1 = arith.constant 0 : i32
    return %arg0, %c0_i32, %arg1, %c0_i32_0 : i32, i32, i32, i32
  }
  func.func @transform_2(%arg0: i32, %arg1: i32, %arg2: i32) -> (i32, i32, i32, i32) {
    %c0_i32 = arith.constant 0 : i32
    %c0_i32_0 = arith.constant 0 : i32
    %c0_i32_1 = arith.constant 0 : i32
    return %arg0, %c0_i32, %arg2, %c0_i32_0 : i32, i32, i32, i32
  }
  func.func @transform_3(%arg0: i32, %arg1: i32, %arg2: i32) -> (i32, i32, i32, i32) {
    %c0_i32 = arith.constant 0 : i32
    %c0_i32_0 = arith.constant 0 : i32
    %c0_i32_1 = arith.constant 0 : i32
    return %arg0, %c0_i32, %arg2, %c0_i32_0 : i32, i32, i32, i32
  }
  func.func @transform_4(%arg0: i32, %arg1: i32, %arg2: i32) -> (i32, i32) {
    %c0_i32 = arith.constant 0 : i32
    %c0_i32_0 = arith.constant 0 : i32
    %c0_i32_1 = arith.constant 0 : i32
    return %c0_i32, %c0_i32_0 : i32, i32
  }
  func.func @transform_5(%arg0: i32, %arg1: i32, %arg2: i32) -> (i32, i32) {
    %c0_i32 = arith.constant 0 : i32
    %c0_i32_0 = arith.constant 0 : i32
    %c0_i32_1 = arith.constant 0 : i32
    return %c0_i32, %c0_i32_0 : i32, i32
  }
  func.func @transform_6(%arg0: i32, %arg1: i32, %arg2: i32) -> (i32, i32) {
    %c0_i32 = arith.constant 0 : i32
    %c0_i32_0 = arith.constant 0 : i32
    %c0_i32_1 = arith.constant 0 : i32
    return %c0_i32, %c0_i32_0 : i32, i32
  }
  func.func @transform_7(%arg0: i32, %arg1: i32, %arg2: i32) -> (i32, i32) {
    %c0_i32 = arith.constant 0 : i32
    %c0_i32_0 = arith.constant 0 : i32
    %c0_i32_1 = arith.constant 0 : i32
    return %c0_i32, %c0_i32_0 : i32, i32
  }
  func.func @transform_8(%arg0: i32, %arg1: i32, %arg2: i32) -> (i32, i32, i32) {
    %c0_i32 = arith.constant 0 : i32
    %c0_i32_0 = arith.constant 0 : i32
    return %arg0, %arg1, %c0_i32 : i32, i32, i32
  }
}

module attributes {stable_mosaic.version = 11 : i64} {
  func.func @_qkv_proj_kernel(%arg0: i32, %arg1: i32, %arg2: memref<1x16x32xbf16, #tpu.memory_space<vmem>>, %arg3: memref<32x96xbf16, #tpu.memory_space<vmem>>, %arg4: memref<1x96xf32, #tpu.memory_space<vmem>>, %arg5: memref<1x2x16x16xbf16, #tpu.memory_space<vmem>>, %arg6: memref<1x2x16x16xbf16, #tpu.memory_space<vmem>>, %arg7: memref<1x2x16x16xbf16, #tpu.memory_space<vmem>>) attributes {dimension_semantics = [#tpu.dimension_semantics<parallel>, #tpu.dimension_semantics<parallel>], iteration_bounds = array<i64: 2, 2>, scalar_prefetch = 0 : i64, scratch_operands = 0 : i64, tpu.core_type = #tpu.core_type<tc>, window_params = [{transform_indices = @transform_0, window_bounds = array<i64: 1, 16, 32>}, {pipeline_mode = #tpu.pipeline_mode<synchronous>, transform_indices = @transform_1, window_bounds = array<i64: 32, 96>}, {pipeline_mode = #tpu.pipeline_mode<synchronous>, transform_indices = @transform_2, window_bounds = array<i64: 1, 96>}, {transform_indices = @transform_3, window_bounds = array<i64: 1, 2, 16, 16>}, {transform_indices = @transform_4, window_bounds = array<i64: 1, 2, 16, 16>}, {transform_indices = @transform_5, window_bounds = array<i64: 1, 2, 16, 16>}]} {
    %c0 = arith.constant 0 : index
    %c0_0 = arith.constant 0 : index
    %c0_1 = arith.constant 0 : index
    %0 = vector.load %arg2[%c0, %c0_0, %c0_1] : memref<1x16x32xbf16, #tpu.memory_space<vmem>>, vector<1x16x32xbf16>
    %1 = vector.shape_cast %0 : vector<1x16x32xbf16> to vector<16x32xbf16>
    %c0_2 = arith.constant 0 : index
    %c0_3 = arith.constant 0 : index
    %2 = vector.load %arg3[%c0_2, %c0_3] : memref<32x96xbf16, #tpu.memory_space<vmem>>, vector<32x96xbf16>
    %cst = arith.constant dense<0.000000e+00> : vector<16x96xf32>
    %3 = tpu.matmul %1, %2, %cst {dimension_numbers = #tpu.dot_dimension_numbers<[1], [0], [0], [1], [0, 0, 1, 1], [], []>} : vector<16x32xbf16>, vector<32x96xbf16>, vector<16x96xf32> -> vector<16x96xf32>
    %c0_4 = arith.constant 0 : index
    %c0_5 = arith.constant 0 : index
    %4 = vector.load %arg4[%c0_4, %c0_5] : memref<1x96xf32, #tpu.memory_space<vmem>>, vector<1x96xf32>
    %5 = vector.broadcast %4 : vector<1x96xf32> to vector<16x96xf32>
    %6 = arith.addf %3, %5 : vector<16x96xf32>
    %7 = arith.truncf %6 : vector<16x96xf32> to vector<16x96xbf16>
    %8 = vector.extract_strided_slice %7 {offsets = [0, 0], sizes = [16, 16], strides = [1, 1]} : vector<16x96xbf16> to vector<16x16xbf16>
    %c0_6 = arith.constant 0 : index
    %c0_7 = arith.constant 0 : index
    %c0_8 = arith.constant 0 : index
    %c0_9 = arith.constant 0 : index
    %9 = vector.load %arg5[%c0_6, %c0_7, %c0_8, %c0_9] : memref<1x2x16x16xbf16, #tpu.memory_space<vmem>>, vector<1x1x16x16xbf16>
    %10 = vector.shape_cast %9 : vector<1x1x16x16xbf16> to vector<16x16xbf16>
    %11 = vector.shape_cast %8 : vector<16x16xbf16> to vector<1x1x16x16xbf16>
    tpu.vector_store %arg5[%c0_6, %c0_7, %c0_8, %c0_9], %11 {strides = array<i32>} : memref<1x2x16x16xbf16, #tpu.memory_space<vmem>>, vector<1x1x16x16xbf16>,
    %12 = vector.extract_strided_slice %7 {offsets = [0, 32], sizes = [16, 16], strides = [1, 1]} : vector<16x96xbf16> to vector<16x16xbf16>
    %c0_10 = arith.constant 0 : index
    %c0_11 = arith.constant 0 : index
    %c0_12 = arith.constant 0 : index
    %c0_13 = arith.constant 0 : index
    %13 = vector.load %arg6[%c0_10, %c0_11, %c0_12, %c0_13] : memref<1x2x16x16xbf16, #tpu.memory_space<vmem>>, vector<1x1x16x16xbf16>
    %14 = vector.shape_cast %13 : vector<1x1x16x16xbf16> to vector<16x16xbf16>
    %15 = vector.shape_cast %12 : vector<16x16xbf16> to vector<1x1x16x16xbf16>
    tpu.vector_store %arg6[%c0_10, %c0_11, %c0_12, %c0_13], %15 {strides = array<i32>} : memref<1x2x16x16xbf16, #tpu.memory_space<vmem>>, vector<1x1x16x16xbf16>,
    %16 = vector.extract_strided_slice %7 {offsets = [0, 64], sizes = [16, 16], strides = [1, 1]} : vector<16x96xbf16> to vector<16x16xbf16>
    %c0_14 = arith.constant 0 : index
    %c0_15 = arith.constant 0 : index
    %c0_16 = arith.constant 0 : index
    %c0_17 = arith.constant 0 : index
    %17 = vector.load %arg7[%c0_14, %c0_15, %c0_16, %c0_17] : memref<1x2x16x16xbf16, #tpu.memory_space<vmem>>, vector<1x1x16x16xbf16>
    %18 = vector.shape_cast %17 : vector<1x1x16x16xbf16> to vector<16x16xbf16>
    %19 = vector.shape_cast %16 : vector<16x16xbf16> to vector<1x1x16x16xbf16>
    tpu.vector_store %arg7[%c0_14, %c0_15, %c0_16, %c0_17], %19 {strides = array<i32>} : memref<1x2x16x16xbf16, #tpu.memory_space<vmem>>, vector<1x1x16x16xbf16>,
    %20 = vector.extract_strided_slice %7 {offsets = [0, 16], sizes = [16, 16], strides = [1, 1]} : vector<16x96xbf16> to vector<16x16xbf16>
    %c0_18 = arith.constant 0 : index
    %c1 = arith.constant 1 : index
    %c0_19 = arith.constant 0 : index
    %c0_20 = arith.constant 0 : index
    %21 = vector.load %arg5[%c0_18, %c1, %c0_19, %c0_20] : memref<1x2x16x16xbf16, #tpu.memory_space<vmem>>, vector<1x1x16x16xbf16>
    %22 = vector.shape_cast %21 : vector<1x1x16x16xbf16> to vector<16x16xbf16>
    %23 = vector.shape_cast %20 : vector<16x16xbf16> to vector<1x1x16x16xbf16>
    tpu.vector_store %arg5[%c0_18, %c1, %c0_19, %c0_20], %23 {strides = array<i32>} : memref<1x2x16x16xbf16, #tpu.memory_space<vmem>>, vector<1x1x16x16xbf16>,
    %24 = vector.extract_strided_slice %7 {offsets = [0, 48], sizes = [16, 16], strides = [1, 1]} : vector<16x96xbf16> to vector<16x16xbf16>
    %c0_21 = arith.constant 0 : index
    %c1_22 = arith.constant 1 : index
    %c0_23 = arith.constant 0 : index
    %c0_24 = arith.constant 0 : index
    %25 = vector.load %arg6[%c0_21, %c1_22, %c0_23, %c0_24] : memref<1x2x16x16xbf16, #tpu.memory_space<vmem>>, vector<1x1x16x16xbf16>
    %26 = vector.shape_cast %25 : vector<1x1x16x16xbf16> to vector<16x16xbf16>
    %27 = vector.shape_cast %24 : vector<16x16xbf16> to vector<1x1x16x16xbf16>
    tpu.vector_store %arg6[%c0_21, %c1_22, %c0_23, %c0_24], %27 {strides = array<i32>} : memref<1x2x16x16xbf16, #tpu.memory_space<vmem>>, vector<1x1x16x16xbf16>,
    %28 = vector.extract_strided_slice %7 {offsets = [0, 80], sizes = [16, 16], strides = [1, 1]} : vector<16x96xbf16> to vector<16x16xbf16>
    %c0_25 = arith.constant 0 : index
    %c1_26 = arith.constant 1 : index
    %c0_27 = arith.constant 0 : index
    %c0_28 = arith.constant 0 : index
    %29 = vector.load %arg7[%c0_25, %c1_26, %c0_27, %c0_28] : memref<1x2x16x16xbf16, #tpu.memory_space<vmem>>, vector<1x1x16x16xbf16>
    %30 = vector.shape_cast %29 : vector<1x1x16x16xbf16> to vector<16x16xbf16>
    %31 = vector.shape_cast %28 : vector<16x16xbf16> to vector<1x1x16x16xbf16>
    tpu.vector_store %arg7[%c0_25, %c1_26, %c0_27, %c0_28], %31 {strides = array<i32>} : memref<1x2x16x16xbf16, #tpu.memory_space<vmem>>, vector<1x1x16x16xbf16>,
    return
  }
  func.func @transform_0(%arg0: i32, %arg1: i32) -> (i32, i32, i32) {
    %c0_i32 = arith.constant 0 : i32
    %c0_i32_0 = arith.constant 0 : i32
    return %arg0, %arg1, %c0_i32 : i32, i32, i32
  }
  func.func @transform_1(%arg0: i32, %arg1: i32) -> (i32, i32) {
    %c0_i32 = arith.constant 0 : i32
    %c0_i32_0 = arith.constant 0 : i32
    %c0_i32_1 = arith.constant 0 : i32
    return %c0_i32, %c0_i32_0 : i32, i32
  }
  func.func @transform_2(%arg0: i32, %arg1: i32) -> (i32, i32) {
    %c0_i32 = arith.constant 0 : i32
    %c0_i32_0 = arith.constant 0 : i32
    %c0_i32_1 = arith.constant 0 : i32
    return %c0_i32, %c0_i32_0 : i32, i32
  }
  func.func @transform_3(%arg0: i32, %arg1: i32) -> (i32, i32, i32, i32) {
    %c0_i32 = arith.constant 0 : i32
    %c0_i32_0 = arith.constant 0 : i32
    %c0_i32_1 = arith.constant 0 : i32
    return %arg0, %c0_i32, %arg1, %c0_i32_0 : i32, i32, i32, i32
  }
  func.func @transform_4(%arg0: i32, %arg1: i32) -> (i32, i32, i32, i32) {
    %c0_i32 = arith.constant 0 : i32
    %c0_i32_0 = arith.constant 0 : i32
    %c0_i32_1 = arith.constant 0 : i32
    return %arg0, %c0_i32, %arg1, %c0_i32_0 : i32, i32, i32, i32
  }
  func.func @transform_5(%arg0: i32, %arg1: i32) -> (i32, i32, i32, i32) {
    %c0_i32 = arith.constant 0 : i32
    %c0_i32_0 = arith.constant 0 : i32
    %c0_i32_1 = arith.constant 0 : i32
    return %arg0, %c0_i32, %arg1, %c0_i32_0 : i32, i32, i32, i32
  }
}

module attributes {stable_mosaic.version = 11 : i64} {
  func.func @_ffn_addnorm_kernel(%arg0: i32, %arg1: i32, %arg2: memref<16x32xbf16, #tpu.memory_space<vmem>>, %arg3: memref<32x128xbf16, #tpu.memory_space<vmem>>, %arg4: memref<1x128xf32, #tpu.memory_space<vmem>>, %arg5: memref<128x32xbf16, #tpu.memory_space<vmem>>, %arg6: memref<1x32xf32, #tpu.memory_space<vmem>>, %arg7: memref<1x32xf32, #tpu.memory_space<vmem>>, %arg8: memref<1x32xf32, #tpu.memory_space<vmem>>, %arg9: memref<16x32xf32, #tpu.memory_space<vmem>>, %arg10: memref<16x32xf32, #tpu.memory_space<vmem>>) attributes {dimension_semantics = [#tpu.dimension_semantics<parallel>, #tpu.dimension_semantics<arbitrary>], iteration_bounds = array<i64: 4, 2>, scalar_prefetch = 0 : i64, scratch_operands = 1 : i64, tpu.core_type = #tpu.core_type<tc>, window_params = [{transform_indices = @transform_0, window_bounds = array<i64: 16, 32>}, {transform_indices = @transform_1, window_bounds = array<i64: 32, 128>}, {transform_indices = @transform_2, window_bounds = array<i64: 1, 128>}, {transform_indices = @transform_3, window_bounds = array<i64: 128, 32>}, {pipeline_mode = #tpu.pipeline_mode<synchronous>, transform_indices = @transform_4, window_bounds = array<i64: 1, 32>}, {pipeline_mode = #tpu.pipeline_mode<synchronous>, transform_indices = @transform_5, window_bounds = array<i64: 1, 32>}, {pipeline_mode = #tpu.pipeline_mode<synchronous>, transform_indices = @transform_6, window_bounds = array<i64: 1, 32>}, {transform_indices = @transform_7, window_bounds = array<i64: 16, 32>}]} {
    %c0_i32 = arith.constant 0 : i32
    %0 = arith.cmpi eq, %arg1, %c0_i32 : i32
    %1 = arith.extui %0 : i1 to i32
    %c0_i32_0 = arith.constant 0 : i32
    %2 = arith.cmpi ne, %1, %c0_i32_0 : i32
    scf.if %2 {
      %cst_15 = arith.constant 0.000000e+00 : f32
      %20 = vector.broadcast %cst_15 : f32 to vector<16x32xf32>
      %c0_16 = arith.constant 0 : index
      %c0_17 = arith.constant 0 : index
      %21 = vector.load %arg10[%c0_16, %c0_17] : memref<16x32xf32, #tpu.memory_space<vmem>>, vector<16x32xf32>
      tpu.vector_store %arg10[%c0_16, %c0_17], %20 {strides = array<i32>} : memref<16x32xf32, #tpu.memory_space<vmem>>, vector<16x32xf32>,
    } else {
    }
    %c0 = arith.constant 0 : index
    %c0_1 = arith.constant 0 : index
    %3 = vector.load %arg2[%c0, %c0_1] : memref<16x32xbf16, #tpu.memory_space<vmem>>, vector<16x32xbf16>
    %c0_2 = arith.constant 0 : index
    %c0_3 = arith.constant 0 : index
    %4 = vector.load %arg3[%c0_2, %c0_3] : memref<32x128xbf16, #tpu.memory_space<vmem>>, vector<32x128xbf16>
    %cst = arith.constant dense<0.000000e+00> : vector<16x128xf32>
    %5 = tpu.matmul %3, %4, %cst {dimension_numbers = #tpu.dot_dimension_numbers<[1], [0], [0], [1], [0, 0, 1, 1], [], []>} : vector<16x32xbf16>, vector<32x128xbf16>, vector<16x128xf32> -> vector<16x128xf32>
    %c0_4 = arith.constant 0 : index
    %c0_5 = arith.constant 0 : index
    %6 = vector.load %arg4[%c0_4, %c0_5] : memref<1x128xf32, #tpu.memory_space<vmem>>, vector<1x128xf32>
    %7 = vector.broadcast %6 : vector<1x128xf32> to vector<16x128xf32>
    %8 = arith.addf %5, %7 : vector<16x128xf32>
    %cst_6 = arith.constant 0.000000e+00 : f32
    %9 = vector.broadcast %cst_6 : f32 to vector<16x128xf32>
    %10 = arith.maximumf %8, %9 : vector<16x128xf32>
    %c0_7 = arith.constant 0 : index
    %c0_8 = arith.constant 0 : index
    %11 = vector.load %arg10[%c0_7, %c0_8] : memref<16x32xf32, #tpu.memory_space<vmem>>, vector<16x32xf32>
    %12 = arith.truncf %10 : vector<16x128xf32> to vector<16x128xbf16>
    %c0_9 = arith.constant 0 : index
    %c0_10 = arith.constant 0 : index
    %13 = vector.load %arg5[%c0_9, %c0_10] : memref<128x32xbf16, #tpu.memory_space<vmem>>, vector<128x32xbf16>
    %cst_11 = arith.constant dense<0.000000e+00> : vector<16x32xf32>
    %14 = tpu.matmul %12, %13, %cst_11 {dimension_numbers = #tpu.dot_dimension_numbers<[1], [0], [0], [1], [0, 0, 1, 1], [], []>} : vector<16x128xbf16>, vector<128x32xbf16>, vector<16x32xf32> -> vector<16x32xf32>
    %15 = arith.addf %11, %14 : vector<16x32xf32>
    %c0_12 = arith.constant 0 : index
    %c0_13 = arith.constant 0 : index
    %16 = vector.load %arg10[%c0_12, %c0_13] : memref<16x32xf32, #tpu.memory_space<vmem>>, vector<16x32xf32>
    tpu.vector_store %arg10[%c0_12, %c0_13], %15 {strides = array<i32>} : memref<16x32xf32, #tpu.memory_space<vmem>>, vector<16x32xf32>,
    %c1_i32 = arith.constant 1 : i32
    %17 = arith.cmpi eq, %arg1, %c1_i32 : i32
    %18 = arith.extui %17 : i1 to i32
    %c0_i32_14 = arith.constant 0 : i32
    %19 = arith.cmpi ne, %18, %c0_i32_14 : i32
    scf.if %19 {
      %c0_15 = arith.constant 0 : index
      %c0_16 = arith.constant 0 : index
      %20 = vector.load %arg2[%c0_15, %c0_16] : memref<16x32xbf16, #tpu.memory_space<vmem>>, vector<16x32xbf16>
      %21 = arith.extf %20 : vector<16x32xbf16> to vector<16x32xf32>
      %c0_17 = arith.constant 0 : index
      %c0_18 = arith.constant 0 : index
      %22 = vector.load %arg10[%c0_17, %c0_18] : memref<16x32xf32, #tpu.memory_space<vmem>>, vector<16x32xf32>
      %23 = arith.addf %21, %22 : vector<16x32xf32>
      %c0_19 = arith.constant 0 : index
      %c0_20 = arith.constant 0 : index
      %24 = vector.load %arg6[%c0_19, %c0_20] : memref<1x32xf32, #tpu.memory_space<vmem>>, vector<1x32xf32>
      %25 = vector.broadcast %24 : vector<1x32xf32> to vector<16x32xf32>
      %26 = arith.addf %23, %25 : vector<16x32xf32>
      %c0_21 = arith.constant 0 : index
      %c0_22 = arith.constant 0 : index
      %27 = vector.load %arg7[%c0_21, %c0_22] : memref<1x32xf32, #tpu.memory_space<vmem>>, vector<1x32xf32>
      %c0_23 = arith.constant 0 : index
      %c0_24 = arith.constant 0 : index
      %28 = vector.load %arg8[%c0_23, %c0_24] : memref<1x32xf32, #tpu.memory_space<vmem>>, vector<1x32xf32>
      %cst_25 = arith.constant dense<0.000000e+00> : vector<16xf32>
      %29 = vector.multi_reduction <add>, %26, %cst_25 [1] : vector<16x32xf32> to vector<16xf32>
      %30 = vector.shape_cast %29 : vector<16xf32> to vector<16x1xf32>
      %cst_26 = arith.constant 3.200000e+01 : f32
      %31 = vector.broadcast %cst_26 : f32 to vector<16x1xf32>
      %32 = arith.divf %30, %31 : vector<16x1xf32>
      %33 = vector.broadcast %32 : vector<16x1xf32> to vector<16x32xf32>
      %34 = arith.subf %26, %33 : vector<16x32xf32>
      %35 = arith.mulf %34, %34 : vector<16x32xf32>
      %cst_27 = arith.constant dense<0.000000e+00> : vector<16xf32>
      %36 = vector.multi_reduction <add>, %35, %cst_27 [1] : vector<16x32xf32> to vector<16xf32>
      %37 = vector.shape_cast %36 : vector<16xf32> to vector<16x1xf32>
      %cst_28 = arith.constant 3.200000e+01 : f32
      %38 = vector.broadcast %cst_28 : f32 to vector<16x1xf32>
      %39 = arith.divf %37, %38 : vector<16x1xf32>
      %cst_29 = arith.constant 9.99999974E-6 : f32
      %40 = vector.broadcast %cst_29 : f32 to vector<16x1xf32>
      %41 = arith.addf %39, %40 : vector<16x1xf32>
      %42 = math.rsqrt %41 : vector<16x1xf32>
      %43 = vector.broadcast %42 : vector<16x1xf32> to vector<16x32xf32>
      %44 = arith.mulf %34, %43 : vector<16x32xf32>
      %45 = vector.broadcast %27 : vector<1x32xf32> to vector<16x32xf32>
      %46 = arith.mulf %44, %45 : vector<16x32xf32>
      %47 = vector.broadcast %28 : vector<1x32xf32> to vector<16x32xf32>
      %48 = arith.addf %46, %47 : vector<16x32xf32>
      %c0_30 = arith.constant 0 : index
      %c0_31 = arith.constant 0 : index
      %49 = vector.load %arg9[%c0_30, %c0_31] : memref<16x32xf32, #tpu.memory_space<vmem>>, vector<16x32xf32>
      tpu.vector_store %arg9[%c0_30, %c0_31], %48 {strides = array<i32>} : memref<16x32xf32, #tpu.memory_space<vmem>>, vector<16x32xf32>,
    } else {
    }
    return
  }
  func.func @transform_0(%arg0: i32, %arg1: i32) -> (i32, i32) {
    %c0_i32 = arith.constant 0 : i32
    %c0_i32_0 = arith.constant 0 : i32
    return %arg0, %c0_i32 : i32, i32
  }
  func.func @transform_1(%arg0: i32, %arg1: i32) -> (i32, i32) {
    %c0_i32 = arith.constant 0 : i32
    %c0_i32_0 = arith.constant 0 : i32
    return %c0_i32, %arg1 : i32, i32
  }
  func.func @transform_2(%arg0: i32, %arg1: i32) -> (i32, i32) {
    %c0_i32 = arith.constant 0 : i32
    %c0_i32_0 = arith.constant 0 : i32
    return %c0_i32, %arg1 : i32, i32
  }
  func.func @transform_3(%arg0: i32, %arg1: i32) -> (i32, i32) {
    %c0_i32 = arith.constant 0 : i32
    %c0_i32_0 = arith.constant 0 : i32
    return %arg1, %c0_i32 : i32, i32
  }
  func.func @transform_4(%arg0: i32, %arg1: i32) -> (i32, i32) {
    %c0_i32 = arith.constant 0 : i32
    %c0_i32_0 = arith.constant 0 : i32
    %c0_i32_1 = arith.constant 0 : i32
    return %c0_i32, %c0_i32_0 : i32, i32
  }
  func.func @transform_5(%arg0: i32, %arg1: i32) -> (i32, i32) {
    %c0_i32 = arith.constant 0 : i32
    %c0_i32_0 = arith.constant 0 : i32
    %c0_i32_1 = arith.constant 0 : i32
    return %c0_i32, %c0_i32_0 : i32, i32
  }
  func.func @transform_6(%arg0: i32, %arg1: i32) -> (i32, i32) {
    %c0_i32 = arith.constant 0 : i32
    %c0_i32_0 = arith.constant 0 : i32
    %c0_i32_1 = arith.constant 0 : i32
    return %c0_i32, %c0_i32_0 : i32, i32
  }
  func.func @transform_7(%arg0: i32, %arg1: i32) -> (i32, i32) {
    %c0_i32 = arith.constant 0 : i32
    %c0_i32_0 = arith.constant 0 : i32
    return %arg0, %c0_i32 : i32, i32
  }
}

module attributes {stable_mosaic.version = 11 : i64} {
  func.func @_mha_addnorm_kernel(%arg0: i32, %arg1: i32, %arg2: i32, %arg3: memref<1x16x32xbf16, #tpu.memory_space<vmem>>, %arg4: memref<1x2x16x16xbf16, #tpu.memory_space<vmem>>, %arg5: memref<1x2x16x16xbf16, #tpu.memory_space<vmem>>, %arg6: memref<1x2x16x16xbf16, #tpu.memory_space<vmem>>, %arg7: memref<32x32xbf16, #tpu.memory_space<vmem>>, %arg8: memref<1x32xf32, #tpu.memory_space<vmem>>, %arg9: memref<1x32xf32, #tpu.memory_space<vmem>>, %arg10: memref<1x32xf32, #tpu.memory_space<vmem>>, %arg11: memref<1x16x32xbf16, #tpu.memory_space<vmem>>, %arg12: memref<2x16x1xf32, #tpu.memory_space<vmem>>, %arg13: memref<2x16x1xf32, #tpu.memory_space<vmem>>, %arg14: memref<2x16x16xf32, #tpu.memory_space<vmem>>) attributes {dimension_semantics = [#tpu.dimension_semantics<parallel>, #tpu.dimension_semantics<parallel>, #tpu.dimension_semantics<arbitrary>], iteration_bounds = array<i64: 2, 2, 2>, scalar_prefetch = 0 : i64, scratch_operands = 3 : i64, tpu.core_type = #tpu.core_type<tc>, window_params = [{transform_indices = @transform_0, window_bounds = array<i64: 1, 16, 32>}, {transform_indices = @transform_1, window_bounds = array<i64: 1, 2, 16, 16>}, {transform_indices = @transform_2, window_bounds = array<i64: 1, 2, 16, 16>}, {transform_indices = @transform_3, window_bounds = array<i64: 1, 2, 16, 16>}, {pipeline_mode = #tpu.pipeline_mode<synchronous>, transform_indices = @transform_4, window_bounds = array<i64: 32, 32>}, {pipeline_mode = #tpu.pipeline_mode<synchronous>, transform_indices = @transform_5, window_bounds = array<i64: 1, 32>}, {pipeline_mode = #tpu.pipeline_mode<synchronous>, transform_indices = @transform_6, window_bounds = array<i64: 1, 32>}, {pipeline_mode = #tpu.pipeline_mode<synchronous>, transform_indices = @transform_7, window_bounds = array<i64: 1, 32>}, {transform_indices = @transform_8, window_bounds = array<i64: 1, 16, 32>}]} {
    %c0_i32 = arith.constant 0 : i32
    %0 = arith.cmpi eq, %arg2, %c0_i32 : i32
    %1 = arith.extui %0 : i1 to i32
    %c0_i32_0 = arith.constant 0 : i32
    %2 = arith.cmpi ne, %1, %c0_i32_0 : i32
    scf.if %2 {
      %cst_34 = arith.constant 0xFF800000 : f32
      %36 = vector.broadcast %cst_34 : f32 to vector<2x16x1xf32>
      %c0_35 = arith.constant 0 : index
      %c0_36 = arith.constant 0 : index
      %c0_37 = arith.constant 0 : index
      %37 = vector.load %arg12[%c0_35, %c0_36, %c0_37] : memref<2x16x1xf32, #tpu.memory_space<vmem>>, vector<2x16x1xf32>
      tpu.vector_store %arg12[%c0_35, %c0_36, %c0_37], %36 {strides = array<i32>} : memref<2x16x1xf32, #tpu.memory_space<vmem>>, vector<2x16x1xf32>,
      %cst_38 = arith.constant 0.000000e+00 : f32
      %38 = vector.broadcast %cst_38 : f32 to vector<2x16x1xf32>
      %c0_39 = arith.constant 0 : index
      %c0_40 = arith.constant 0 : index
      %c0_41 = arith.constant 0 : index
      %39 = vector.load %arg13[%c0_39, %c0_40, %c0_41] : memref<2x16x1xf32, #tpu.memory_space<vmem>>, vector<2x16x1xf32>
      tpu.vector_store %arg13[%c0_39, %c0_40, %c0_41], %38 {strides = array<i32>} : memref<2x16x1xf32, #tpu.memory_space<vmem>>, vector<2x16x1xf32>,
      %cst_42 = arith.constant 0.000000e+00 : f32
      %40 = vector.broadcast %cst_42 : f32 to vector<2x16x16xf32>
      %c0_43 = arith.constant 0 : index
      %c0_44 = arith.constant 0 : index
      %c0_45 = arith.constant 0 : index
      %41 = vector.load %arg14[%c0_43, %c0_44, %c0_45] : memref<2x16x16xf32, #tpu.memory_space<vmem>>, vector<2x16x16xf32>
      tpu.vector_store %arg14[%c0_43, %c0_44, %c0_45], %40 {strides = array<i32>} : memref<2x16x16xf32, #tpu.memory_space<vmem>>, vector<2x16x16xf32>,
    } else {
    }
    %c0 = arith.constant 0 : index
    %c0_1 = arith.constant 0 : index
    %c0_2 = arith.constant 0 : index
    %c0_3 = arith.constant 0 : index
    %3 = vector.load %arg4[%c0, %c0_1, %c0_2, %c0_3] : memref<1x2x16x16xbf16, #tpu.memory_space<vmem>>, vector<1x2x16x16xbf16>
    %4 = vector.shape_cast %3 : vector<1x2x16x16xbf16> to vector<2x16x16xbf16>
    %c0_4 = arith.constant 0 : index
    %c0_5 = arith.constant 0 : index
    %c0_6 = arith.constant 0 : index
    %c0_7 = arith.constant 0 : index
    %5 = vector.load %arg5[%c0_4, %c0_5, %c0_6, %c0_7] : memref<1x2x16x16xbf16, #tpu.memory_space<vmem>>, vector<1x2x16x16xbf16>
    %6 = vector.shape_cast %5 : vector<1x2x16x16xbf16> to vector<2x16x16xbf16>
    %c0_8 = arith.constant 0 : index
    %c0_9 = arith.constant 0 : index
    %c0_10 = arith.constant 0 : index
    %c0_11 = arith.constant 0 : index
    %7 = vector.load %arg6[%c0_8, %c0_9, %c0_10, %c0_11] : memref<1x2x16x16xbf16, #tpu.memory_space<vmem>>, vector<1x2x16x16xbf16>
    %8 = vector.shape_cast %7 : vector<1x2x16x16xbf16> to vector<2x16x16xbf16>
    "tpu.trace_start"() <{level = 10 : i32, message = "hqd,hkd->hqk"}> : () -> ()
    %cst = arith.constant dense<0.000000e+00> : vector<2x16x16xf32>
    %9 = tpu.matmul %4, %6, %cst {dimension_numbers = #tpu.dot_dimension_numbers<[2], [2], [1], [1], [0, 0, 0, 1, 1, 1], [0], [0]>} : vector<2x16x16xbf16>, vector<2x16x16xbf16>, vector<2x16x16xf32> -> vector<2x16x16xf32>
    "tpu.trace_stop"() : () -> ()
    %c0_12 = arith.constant 0 : index
    %c0_13 = arith.constant 0 : index
    %c0_14 = arith.constant 0 : index
    %10 = vector.load %arg12[%c0_12, %c0_13, %c0_14] : memref<2x16x1xf32, #tpu.memory_space<vmem>>, vector<2x16x1xf32>
    %cst_15 = arith.constant dense<0xFF800000> : vector<2x16xf32>
    %11 = vector.multi_reduction <maximumf>, %9, %cst_15 [2] : vector<2x16x16xf32> to vector<2x16xf32>
    %12 = vector.shape_cast %11 : vector<2x16xf32> to vector<2x16x1xf32>
    %13 = arith.maximumf %10, %12 : vector<2x16x1xf32>
    %14 = arith.subf %10, %13 : vector<2x16x1xf32>
    %15 = math.exp %14 : vector<2x16x1xf32>
    %16 = vector.broadcast %13 : vector<2x16x1xf32> to vector<2x16x16xf32>
    %17 = arith.subf %9, %16 : vector<2x16x16xf32>
    %18 = math.exp %17 : vector<2x16x16xf32>
    %c0_16 = arith.constant 0 : index
    %c0_17 = arith.constant 0 : index
    %c0_18 = arith.constant 0 : index
    %19 = vector.load %arg13[%c0_16, %c0_17, %c0_18] : memref<2x16x1xf32, #tpu.memory_space<vmem>>, vector<2x16x1xf32>
    %20 = arith.mulf %15, %19 : vector<2x16x1xf32>
    %cst_19 = arith.constant dense<0.000000e+00> : vector<2x16xf32>
    %21 = vector.multi_reduction <add>, %18, %cst_19 [2] : vector<2x16x16xf32> to vector<2x16xf32>
    %22 = vector.shape_cast %21 : vector<2x16xf32> to vector<2x16x1xf32>
    %23 = arith.addf %20, %22 : vector<2x16x1xf32>
    %c0_20 = arith.constant 0 : index
    %c0_21 = arith.constant 0 : index
    %c0_22 = arith.constant 0 : index
    %24 = vector.load %arg13[%c0_20, %c0_21, %c0_22] : memref<2x16x1xf32, #tpu.memory_space<vmem>>, vector<2x16x1xf32>
    tpu.vector_store %arg13[%c0_20, %c0_21, %c0_22], %23 {strides = array<i32>} : memref<2x16x1xf32, #tpu.memory_space<vmem>>, vector<2x16x1xf32>,
    %c0_23 = arith.constant 0 : index
    %c0_24 = arith.constant 0 : index
    %c0_25 = arith.constant 0 : index
    %25 = vector.load %arg14[%c0_23, %c0_24, %c0_25] : memref<2x16x16xf32, #tpu.memory_space<vmem>>, vector<2x16x16xf32>
    %26 = vector.broadcast %15 : vector<2x16x1xf32> to vector<2x16x16xf32>
    %27 = arith.mulf %26, %25 : vector<2x16x16xf32>
    %28 = arith.truncf %18 : vector<2x16x16xf32> to vector<2x16x16xbf16>
    "tpu.trace_start"() <{level = 10 : i32, message = "hqk,hkd->hqd"}> : () -> ()
    %cst_26 = arith.constant dense<0.000000e+00> : vector<2x16x16xf32>
    %29 = tpu.matmul %28, %8, %cst_26 {dimension_numbers = #tpu.dot_dimension_numbers<[2], [1], [1], [2], [0, 0, 0, 1, 1, 2], [0], [0]>} : vector<2x16x16xbf16>, vector<2x16x16xbf16>, vector<2x16x16xf32> -> vector<2x16x16xf32>
    "tpu.trace_stop"() : () -> ()
    %30 = arith.addf %27, %29 : vector<2x16x16xf32>
    %c0_27 = arith.constant 0 : index
    %c0_28 = arith.constant 0 : index
    %c0_29 = arith.constant 0 : index
    %31 = vector.load %arg14[%c0_27, %c0_28, %c0_29] : memref<2x16x16xf32, #tpu.memory_space<vmem>>, vector<2x16x16xf32>
    tpu.vector_store %arg14[%c0_27, %c0_28, %c0_29], %30 {strides = array<i32>} : memref<2x16x16xf32, #tpu.memory_space<vmem>>, vector<2x16x16xf32>,
    %c0_30 = arith.constant 0 : index
    %c0_31 = arith.constant 0 : index
    %c0_32 = arith.constant 0 : index
    %32 = vector.load %arg12[%c0_30, %c0_31, %c0_32] : memref<2x16x1xf32, #tpu.memory_space<vmem>>, vector<2x16x1xf32>
    tpu.vector_store %arg12[%c0_30, %c0_31, %c0_32], %13 {strides = array<i32>} : memref<2x16x1xf32, #tpu.memory_space<vmem>>, vector<2x16x1xf32>,
    %c1_i32 = arith.constant 1 : i32
    %33 = arith.cmpi eq, %arg2, %c1_i32 : i32
    %34 = arith.extui %33 : i1 to i32
    %c0_i32_33 = arith.constant 0 : i32
    %35 = arith.cmpi ne, %34, %c0_i32_33 : i32
    scf.if %35 {
      %c0_34 = arith.constant 0 : index
      %c0_35 = arith.constant 0 : index
      %c0_36 = arith.constant 0 : index
      %36 = vector.load %arg14[%c0_34, %c0_35, %c0_36] : memref<2x16x16xf32, #tpu.memory_space<vmem>>, vector<2x16x16xf32>
      %c0_37 = arith.constant 0 : index
      %c0_38 = arith.constant 0 : index
      %c0_39 = arith.constant 0 : index
      %37 = vector.load %arg13[%c0_37, %c0_38, %c0_39] : memref<2x16x1xf32, #tpu.memory_space<vmem>>, vector<2x16x1xf32>
      %38 = tpu.reciprocal %37 {approx = true} : vector<2x16x1xf32> -> vector<2x16x1xf32>
      %39 = vector.broadcast %38 : vector<2x16x1xf32> to vector<2x16x16xf32>
      %40 = arith.mulf %36, %39 : vector<2x16x16xf32>
      %41 = vector.extract_strided_slice %40 {offsets = [0, 0, 0], sizes = [1, 16, 16], strides = [1, 1, 1]} : vector<2x16x16xf32> to vector<1x16x16xf32>
      %42 = vector.shape_cast %41 : vector<1x16x16xf32> to vector<16x16xf32>
      %43 = vector.extract_strided_slice %40 {offsets = [1, 0, 0], sizes = [1, 16, 16], strides = [1, 1, 1]} : vector<2x16x16xf32> to vector<1x16x16xf32>
      %44 = vector.shape_cast %43 : vector<1x16x16xf32> to vector<16x16xf32>
      %45 = tpu.concatenate %42, %44 in 1 : vector<16x16xf32>, vector<16x16xf32> -> vector<16x32xf32>
      %46 = arith.truncf %45 : vector<16x32xf32> to vector<16x32xbf16>
      %c0_40 = arith.constant 0 : index
      %c0_41 = arith.constant 0 : index
      %47 = vector.load %arg7[%c0_40, %c0_41] : memref<32x32xbf16, #tpu.memory_space<vmem>>, vector<32x32xbf16>
      %cst_42 = arith.constant dense<0.000000e+00> : vector<16x32xf32>
      %48 = tpu.matmul %46, %47, %cst_42 {dimension_numbers = #tpu.dot_dimension_numbers<[1], [0], [0], [1], [0, 0, 1, 1], [], []>} : vector<16x32xbf16>, vector<32x32xbf16>, vector<16x32xf32> -> vector<16x32xf32>
      %c0_43 = arith.constant 0 : index
      %c0_44 = arith.constant 0 : index
      %49 = vector.load %arg8[%c0_43, %c0_44] : memref<1x32xf32, #tpu.memory_space<vmem>>, vector<1x32xf32>
      %50 = vector.broadcast %49 : vector<1x32xf32> to vector<16x32xf32>
      %51 = arith.addf %48, %50 : vector<16x32xf32>
      %c0_45 = arith.constant 0 : index
      %c0_46 = arith.constant 0 : index
      %c0_47 = arith.constant 0 : index
      %52 = vector.load %arg3[%c0_45, %c0_46, %c0_47] : memref<1x16x32xbf16, #tpu.memory_space<vmem>>, vector<1x16x32xbf16>
      %53 = vector.shape_cast %52 : vector<1x16x32xbf16> to vector<16x32xbf16>
      %54 = arith.extf %53 : vector<16x32xbf16> to vector<16x32xf32>
      %55 = arith.addf %54, %51 : vector<16x32xf32>
      %c0_48 = arith.constant 0 : index
      %c0_49 = arith.constant 0 : index
      %56 = vector.load %arg9[%c0_48, %c0_49] : memref<1x32xf32, #tpu.memory_space<vmem>>, vector<1x32xf32>
      %c0_50 = arith.constant 0 : index
      %c0_51 = arith.constant 0 : index
      %57 = vector.load %arg10[%c0_50, %c0_51] : memref<1x32xf32, #tpu.memory_space<vmem>>, vector<1x32xf32>
      %cst_52 = arith.constant dense<0.000000e+00> : vector<16xf32>
      %58 = vector.multi_reduction <add>, %55, %cst_52 [1] : vector<16x32xf32> to vector<16xf32>
      %59 = vector.shape_cast %58 : vector<16xf32> to vector<16x1xf32>
      %cst_53 = arith.constant 3.200000e+01 : f32
      %60 = vector.broadcast %cst_53 : f32 to vector<16x1xf32>
      %61 = arith.divf %59, %60 : vector<16x1xf32>
      %62 = vector.broadcast %61 : vector<16x1xf32> to vector<16x32xf32>
      %63 = arith.subf %55, %62 : vector<16x32xf32>
      %64 = arith.mulf %63, %63 : vector<16x32xf32>
      %cst_54 = arith.constant dense<0.000000e+00> : vector<16xf32>
      %65 = vector.multi_reduction <add>, %64, %cst_54 [1] : vector<16x32xf32> to vector<16xf32>
      %66 = vector.shape_cast %65 : vector<16xf32> to vector<16x1xf32>
      %cst_55 = arith.constant 3.200000e+01 : f32
      %67 = vector.broadcast %cst_55 : f32 to vector<16x1xf32>
      %68 = arith.divf %66, %67 : vector<16x1xf32>
      %cst_56 = arith.constant 9.99999974E-6 : f32
      %69 = vector.broadcast %cst_56 : f32 to vector<16x1xf32>
      %70 = arith.addf %68, %69 : vector<16x1xf32>
      %71 = math.rsqrt %70 : vector<16x1xf32>
      %72 = vector.broadcast %71 : vector<16x1xf32> to vector<16x32xf32>
      %73 = arith.mulf %63, %72 : vector<16x32xf32>
      %74 = vector.broadcast %56 : vector<1x32xf32> to vector<16x32xf32>
      %75 = arith.mulf %73, %74 : vector<16x32xf32>
      %76 = vector.broadcast %57 : vector<1x32xf32> to vector<16x32xf32>
      %77 = arith.addf %75, %76 : vector<16x32xf32>
      %78 = arith.truncf %77 : vector<16x32xf32> to vector<16x32xbf16>
      %c0_57 = arith.constant 0 : index
      %c0_58 = arith.constant 0 : index
      %c0_59 = arith.constant 0 : index
      %79 = vector.load %arg11[%c0_57, %c0_58, %c0_59] : memref<1x16x32xbf16, #tpu.memory_space<vmem>>, vector<1x16x32xbf16>
      %80 = vector.shape_cast %79 : vector<1x16x32xbf16> to vector<16x32xbf16>
      %81 = vector.shape_cast %78 : vector<16x32xbf16> to vector<1x16x32xbf16>
      tpu.vector_store %arg11[%c0_57, %c0_58, %c0_59], %81 {strides = array<i32>} : memref<1x16x32xbf16, #tpu.memory_space<vmem>>, vector<1x16x32xbf16>,
    } else {
    }
    return
  }
  func.func @transform_0(%arg0: i32, %arg1: i32, %arg2: i32) -> (i32, i32, i32) {
    %c0_i32 = arith.constant 0 : i32
    %c0_i32_0 = arith.constant 0 : i32
    return %arg0, %arg1, %c0_i32 : i32, i32, i32
  }
  func.func @transform_1(%arg0: i32, %arg1: i32, %arg2: i32) -> (i32, i32, i32, i32) {
    %c0_i32 = arith.constant 0 : i32
    %c0_i32_0 = arith.constant 0 : i32
    %c0_i32_1 = arith.constant 0 : i32
    return %arg0, %c0_i32, %arg1, %c0_i32_0 : i32, i32, i32, i32
  }
  func.func @transform_2(%arg0: i32, %arg1: i32, %arg2: i32) -> (i32, i32, i32, i32) {
    %c0_i32 = arith.constant 0 : i32
    %c0_i32_0 = arith.constant 0 : i32
    %c0_i32_1 = arith.constant 0 : i32
    return %arg0, %c0_i32, %arg2, %c0_i32_0 : i32, i32, i32, i32
  }
  func.func @transform_3(%arg0: i32, %arg1: i32, %arg2: i32) -> (i32, i32, i32, i32) {
    %c0_i32 = arith.constant 0 : i32
    %c0_i32_0 = arith.constant 0 : i32
    %c0_i32_1 = arith.constant 0 : i32
    return %arg0, %c0_i32, %arg2, %c0_i32_0 : i32, i32, i32, i32
  }
  func.func @transform_4(%arg0: i32, %arg1: i32, %arg2: i32) -> (i32, i32) {
    %c0_i32 = arith.constant 0 : i32
    %c0_i32_0 = arith.constant 0 : i32
    %c0_i32_1 = arith.constant 0 : i32
    return %c0_i32, %c0_i32_0 : i32, i32
  }
  func.func @transform_5(%arg0: i32, %arg1: i32, %arg2: i32) -> (i32, i32) {
    %c0_i32 = arith.constant 0 : i32
    %c0_i32_0 = arith.constant 0 : i32
    %c0_i32_1 = arith.constant 0 : i32
    return %c0_i32, %c0_i32_0 : i32, i32
  }
  func.func @transform_6(%arg0: i32, %arg1: i32, %arg2: i32) -> (i32, i32) {
    %c0_i32 = arith.constant 0 : i32
    %c0_i32_0 = arith.constant 0 : i32
    %c0_i32_1 = arith.constant 0 : i32
    return %c0_i32, %c0_i32_0 : i32, i32
  }
  func.func @transform_7(%arg0: i32, %arg1: i32, %arg2: i32) -> (i32, i32) {
    %c0_i32 = arith.constant 0 : i32
    %c0_i32_0 = arith.constant 0 : i32
    %c0_i32_1 = arith.constant 0 : i32
    return %c0_i32, %c0_i32_0 : i32, i32
  }
  func.func @transform_8(%arg0: i32, %arg1: i32, %arg2: i32) -> (i32, i32, i32) {
    %c0_i32 = arith.constant 0 : i32
    %c0_i32_0 = arith.constant 0 : i32
    return %arg0, %arg1, %c0_i32 : i32, i32, i32
  }
}

</mosaic_0001>

<bundles_post_ra>
// kernel: encoder_forward.9
= control target key start
LH: loop header
LB: loop body
LE: loop exit
PB: predicated region body
PF: predicated region fallthrough
CT: control target
= control target key end

     0   :  { %s937_s18 = smov 0   ;;  %s939_s19 = smov 0   ;;  %s1099_s0 = inlined_call_operand.vmem [shape: bf16[2,32,32], index: 0, kind: input, shape index: {}]   ;;  %s1100_s1 = inlined_call_operand.vmem [shape: bf16[32,96], index: 1, kind: input, shape index: {}]   ;;  %s1101_s2 = inlined_call_operand.vmem [shape: f32[1,96], index: 2, kind: input, shape index: {}]   ;;  %s1102_s3 = inlined_call_operand.vmem [shape: bf16[2,2,32,16], index: 3, kind: output, shape index: {0}]   ;;  %s1103_s4 = inlined_call_operand.vmem [shape: bf16[2,2,32,16], index: 4, kind: output, shape index: {1}]   ;;  %s1104_s5 = inlined_call_operand.vmem [shape: bf16[2,2,32,16], index: 5, kind: output, shape index: {2}]  }
   0x1   :  { %s941_s20 = smov 0   ;;  %s943_s21 = smov 0  }
   0x2   :  { %s945_s22 = smov 0   ;;  %s947_s23 = smov 0  }
   0x3   :  { %s949_s24 = smov 0  }
   0x4 LB: > { %s25_s25 = sadd.s32 1, %s890_s22  ;;  %s28_s26 = sadd.s32 1, %s894_s23  ;;  %s898_s24 = sphi %s949_s24, %s16_s24   ;;  %s894_s23 = sphi %s947_s23, %s1111_s23   ;;  %s890_s22 = sphi %s945_s22, %s1110_s22   ;;  %s886_s21 = sphi %s943_s21, %s1109_s21   ;;  %s882_s20 = sphi %s941_s20, %s1108_s20   ;;  %s878_s19 = sphi %s939_s19, %s1107_s19   ;;  %s874_s18 = sphi %s937_s18, %s1106_s18  }
   0x5   : > { %p26_p0 = scmp.ge.s32.totalorder %s25_s25, 2  ;;  %s727_s27 = sadd.s32 4294967295, %s898_s24  }
   0x6   : > { %p117_p1 = scmp.ne.s32.totalorder %s878_s19, %s874_s18  ;;  %p118_p2 = scmp.eq.s32.totalorder %s727_s27, 3 }
   0x7   : > { %s1113_s25 = smov (%p26_p0, %s25_s25), 0  ;;  %s1115_s26 = smov (!%p26_p0, %s28_s26), %s894_s23 }
   0x8   : > { %s103_s28 = ssub.s32 %s890_s22, %s1113_s25  ;;  %p30_p3 = scmp.ge.s32.totalorder %s1115_s26, 2 }
   0x9   : > { %p731_p4 = scmp.ge.s32.totalorder %s898_s24, 1  ;;  %p983_p5 = por %p118_p2, %p117_p1 }
   0xa   : > { %p217_p6 = scmp.lt.s32.totalorder %s898_s24, 5  ;;  %s1117_s26 = smov (%p30_p3, %s1115_s26), 0 }
   0xb   : > { %s102_s30 = ssub.s32 %s894_s23, %s1117_s26  ;;  %s107_s7 = sadd.s32 1, %s878_s19 }
   0xc   : > { %p218_p7 = pnand %p731_p4, %p217_p6  ;;  %s104_s6 = sor.u32 %s103_s28, %s102_s30 }
   0xd   : > { %p105_p8 = scmp.eq.s32.totalorder %s104_s6, 0  ;;  %s1003_s13 = sshll.u32 (!%p218_p7), %s882_s20, 1 }
   0xe   : > { %221 = sbr.rel (%p218_p7) target bundleno = 368 (0x170), region = 32  ;;  %p257_p9 = scmp.lt.s32.totalorder (!%p218_p7), %s886_s21, 1 }
   0xf   : > { %s994_s8 = scalar_select %p105_p8, %s878_s19, %s107_s7  }
  0x10   : > { %p259_p10 = scmp.lt.s32.totalorder (!%p218_p7), %s1003_s13, 3  ;;  %s241_s20 = sand.u32 (!%p218_p7), 1, %s874_s18  }
  0x11   : > { %s1016_s10 = sshll.u32 (!%p218_p7), %s241_s20, 4  ;;  %s902_s11 = smov (!%p218_p7), 64  }
  0x12   : > { %s903_s12 = smov (!%p218_p7), 96   ;;  %s904_s18 = smov (!%p218_p7), 112  }
  0x13   : > { %v841_v0 = vld [vmem:[%s1100_s1 + $0x8] sm:$0xff]   ;;  %v900_v1 = vmov 0.0   ;;  %v842_v2 = vld [vmem:[%s1100_s1] sm:$0xff]   ;;  %vm901_vm0 = vmmov 0   ;;  %s258_s14 = scalar_select %p257_p9, %s886_s21, 1  ;;  %vm300_vm1 = vcmask 261120  }
  0x14   : > { %770 = vmatprep.subr.bf16.mxu0 %v900_v1  ;;  %774 = vmatprep.mubr.msk.bf16.mxu0 %vm901_vm0, %v900_v1  ;;  %s260_s15 = scalar_select %p259_p10, %s1003_s13, 3  ;;  %v738_v4 = vld [vmem:[%s1101_s2] ss:$0 sm:$0xff]  ;;  %vm353_vm2 = vcmask 125952  }
  0x15   : > { %771 = vmatpush3.bf16.msra.mxu0 %v841_v0  ;;  %s736_s16 = sshll.u32 %s258_s14, 2  ;;  %s1019_s14 = scalar_lea.vmem [#allocation2], %s1016_s10 }
  0x16   : > { %772 = vmatprep.subr.bf16.mxu0 %v900_v1  ;;  %s262_s17 = sadd.s32 %s736_s16, %s260_s15  ;;  %s905_s15 = smov 80  }
  0x17   : > { %s737_s27 = sshll.u32 %s262_s17, 2  ;;  %s906_s16 = smov 48  }
  0x18   : > { %s264_s6 = scalar_lea.vmem %s1099_s0, %s737_s27  ;;  %s1026_s17 = scalar_lea.vmem [#allocation4], %s1016_s10 }
  0x19   : > { %773 = vmatpush3.bf16.msra.mxu0 %v842_v2  ;;  %v843_v3 = vld [vmem:[%s264_s6] sm:$0xff]   ;;  %s1031_s27 = scalar_lea.vmem [#allocation3], %s1016_s10  ;;  %s755_s28 = sshll.u32 (%p983_p5), %s886_s21, 3 }
  0x1a   : > { %s416_s30 = sadd.s32 (%p983_p5), %s755_s28, %s1003_s13 }
  0x1b   : > { %s756_s6 = sshll.u32 (%p983_p5), %s416_s30, 2 }
  0x1c   : > { %775 = vmatmul.mubr.msk.bf16.vlgmr.msra.gmra.mxu0 %vm300_vm1, %v843_v3  ;;  %s418_s9 = scalar_lea.vmem (%p983_p5), %s1102_s3, %s756_s6 }
  0xdc   : > { %v338_v5 = vpop.f32.mrf.mxu0 }
  0xdd   : > { %v339_v6 = vadd.f32 %v738_v4, %v338_v5 }
  0xde   : > { %v776_v7 = vpop.f32.mrf.mxu0 }
  0xdf   : > { %v765_v8 = vpack.c.bf16 %v339_v6, %v339_v6 }
  0xe0   : > { %v341_v9 = vpop.f32.mrf.mxu0 }
  0xe1   : > { %v342_v10 = vadd.f32 %v738_v4, %v341_v9  ;;  %364 = vrot.lane.b32.xlu1 %v765_v8, %s902_s11  ;;  %356 = vrot.lane.b32.xlu0 %v765_v8, %s903_s12  ;;  %354 = vst.msk [vmem:[%s1019_s14] sm:$0xf] %vm353_vm2, %v765_v8 }
  0xe2   : > { %v777_v11 = vpop.f32.mrf.mxu0 }
  0xe3   : > { %v766_v12 = vpack.c.bf16 %v342_v10, %v342_v10 }
  0xe5   : > { %372 = vrot.lane.b32.xlu0 %v765_v8, %s904_s18  ;;  %366 = vrot.lane.b32.xlu1 %v766_v12, %s902_s11  ;;  %355 = vst.msk [vmem:[%s1019_s14 + $0x4] sm:$0xf] %vm353_vm2, %v766_v12 }
  0xe9   : > { %381 = vrot.lane.b32.xlu0 %v765_v8, %s905_s15  ;;  %374 = vrot.lane.b32.xlu1 %v766_v12, %s904_s18 }
  0xec   : > { %v435_v23 = vld [vmem:[%s1019_s14] sm:$0xff] (%p983_p5)  }
  0xed   : > { %383 = vrot.lane.b32.xlu1 %v766_v12, %s905_s15  ;;  %358 = vrot.lane.b32.xlu0 %v766_v12, %s903_s12  ;;  %436 = vst [vmem:[%s418_s9] sm:$0xff] (%p983_p5), %v435_v23  }
  0xf1   : > { %392 = vrot.lane.b32.xlu1 %v766_v12, %s906_s16  ;;  %390 = vrot.lane.b32.xlu0 %v765_v8, %s906_s16 }
 0x153   : > { %v365_v13 = vpop.permute.xlu1 %364  ;;  %v357_v14 = vpop.permute.xlu0 %356 }
 0x154   : > { %370 = vst.msk [vmem:[%s1026_s17] sm:$0xf] %vm353_vm2, %v365_v13  ;;  %362 = vst.msk [vmem:[%s1031_s27] sm:$0xf] %vm353_vm2, %v357_v14 }
 0x157   : > { %v373_v15 = vpop.permute.xlu0 %372  ;;  %v367_v16 = vpop.permute.xlu1 %366 }
 0x158   : > { %745 = vst.msk [vmem:[%s1019_s14 + $0x8] sm:$0xf] %vm353_vm2, %v373_v15  ;;  %371 = vst.msk [vmem:[%s1026_s17 + $0x4] sm:$0xf] %vm353_vm2, %v367_v16 }
 0x15b   : > { %v382_v17 = vpop.permute.xlu0 %381  ;;  %v375_v18 = vpop.permute.xlu1 %374 }
 0x15c   : > { %747 = vst.msk [vmem:[%s1031_s27 + $0x8] sm:$0xf] %vm353_vm2, %v382_v17  ;;  %746 = vst.msk [vmem:[%s1019_s14 + $0xc] sm:$0xf] %vm353_vm2, %v375_v18 }
 0x15f   : > { %v384_v19 = vpop.permute.xlu1 %383  ;;  %v359_v20 = vpop.permute.xlu0 %358 }
 0x160   : > { %748 = vst.msk [vmem:[%s1031_s27 + $0xc] sm:$0xf] %vm353_vm2, %v384_v19  ;;  %363 = vst.msk [vmem:[%s1031_s27 + $0x4] sm:$0xf] %vm353_vm2, %v359_v20  ;;  %413 = sbr.rel (!%p983_p5) target bundleno = 358 (0x166), region = 36 }
 0x163   : > { %v393_v21 = vpop.permute.xlu1 %392  ;;  %v391_v22 = vpop.permute.xlu0 %390  ;;  %v439_v24 = vld [vmem:[%s1019_s14 + $0x8] sm:$0xff] (%p983_p5)  }
 0x164   : > { %750 = vst.msk [vmem:[%s1026_s17 + $0xc] sm:$0xf] %vm353_vm2, %v393_v21  ;;  %749 = vst.msk [vmem:[%s1026_s17 + $0x8] sm:$0xf] %vm353_vm2, %v391_v22 }
 0x165   : > { %440 = vst [vmem:[%s418_s9 + $0x10] sm:$0xff] %v439_v24  }
 0x166 PF: > { %474 = sbr.rel (!%p983_p5) target bundleno = 363 (0x16b), region = 77  ;;  %s758_s10 = sshll.u32 (%p983_p5), %s886_s21, 3 }
 0x167   : > { %s477_s11 = sadd.s32 (%p983_p5), %s758_s10, %s1003_s13 }
 0x168   : > { %v496_v25 = vld [vmem:[%s1031_s27] sm:$0xff] (%p983_p5)   ;;  %v500_v26 = vld [vmem:[%s1031_s27 + $0x8] sm:$0xff] (%p983_p5)   ;;  %s759_s12 = sshll.u32 (%p983_p5), %s477_s11, 2 }
 0x169   : > { %s479_s15 = scalar_lea.vmem (%p983_p5), %s1103_s4, %s759_s12 }
 0x16a   : > { %497 = vst [vmem:[%s479_s15] sm:$0xff] (%p983_p5), %v496_v25   ;;  %501 = vst [vmem:[%s479_s15 + $0x10] sm:$0xff] (%p983_p5), %v500_v26  }
 0x16b PF: > { %535 = sbr.rel (!%p983_p5) target bundleno = 368 (0x170), region = 118  ;;  %s761_s16 = sshll.u32 (%p983_p5), %s886_s21, 3  ;;  %v557_v27 = vld [vmem:[%s1026_s17] sm:$0xff] (%p983_p5)  }
 0x16c   : > { %s538_s28 = sadd.s32 (%p983_p5), %s761_s16, %s1003_s13  ;;  %v561_v28 = vld [vmem:[%s1026_s17 + $0x8] sm:$0xff] (%p983_p5)  }
 0x16d   : > { %s762_s27 = sshll.u32 (%p983_p5), %s538_s28, 2 }
 0x16e   : > { %s540_s20 = scalar_lea.vmem (%p983_p5), %s1104_s5, %s762_s27 }
 0x16f   : > { %558 = vst [vmem:[%s540_s20] sm:$0xff] (%p983_p5), %v557_v27   ;;  %562 = vst [vmem:[%s540_s20 + $0x10] sm:$0xff] (%p983_p5), %v561_v28  }
 0x170 PF: > { %s16_s24 = sadd.s32 1, %s898_s24   ;;  %s1106_s18 = smov %s878_s19 }
 0x171   : > { %p13_p11 = scmp.ge.s32.totalorder %s16_s24, 6   ;;  %s1107_s19 = smov %s994_s8 }
 0x172   : > { %s1108_s20 = smov %s890_s22  ;;  %s1109_s21 = smov %s894_s23 }
 0x173   : > { %s1110_s22 = smov %s1113_s25  ;;  %s1111_s23 = smov %s1117_s26 }
 0x174   :  { %15 = sbr.rel (!%p13_p11) target bundleno = 4 (0x4), region = 212 }

// kernel: encoder_forward.6
= control target key start
LH: loop header
LB: loop body
LE: loop exit
PB: predicated region body
PF: predicated region fallthrough
CT: control target
= control target key end

     0   :  { %s931_s18 = smov 0   ;;  %s933_s19 = smov 0   ;;  %s1093_s0 = inlined_call_operand.vmem [shape: f32[2,32,32], index: 0, kind: input, shape index: {}]   ;;  %s1094_s1 = inlined_call_operand.vmem [shape: bf16[32,96], index: 1, kind: input, shape index: {}]   ;;  %s1095_s2 = inlined_call_operand.vmem [shape: f32[1,96], index: 2, kind: input, shape index: {}]   ;;  %s1096_s3 = inlined_call_operand.vmem [shape: bf16[2,2,32,16], index: 3, kind: output, shape index: {0}]   ;;  %s1097_s4 = inlined_call_operand.vmem [shape: bf16[2,2,32,16], index: 4, kind: output, shape index: {1}]   ;;  %s1098_s5 = inlined_call_operand.vmem [shape: bf16[2,2,32,16], index: 5, kind: output, shape index: {2}]  }
   0x1   :  { %s935_s20 = smov 0   ;;  %s937_s21 = smov 0  }
   0x2   :  { %s939_s22 = smov 0   ;;  %s941_s23 = smov 0  }
   0x3   :  { %s943_s24 = smov 0  }
   0x4 LB: > { %s25_s25 = sadd.s32 1, %s884_s22  ;;  %s28_s26 = sadd.s32 1, %s888_s23  ;;  %s892_s24 = sphi %s943_s24, %s16_s24   ;;  %s888_s23 = sphi %s941_s23, %s1105_s23   ;;  %s884_s22 = sphi %s939_s22, %s1104_s22   ;;  %s880_s21 = sphi %s937_s21, %s1103_s21   ;;  %s876_s20 = sphi %s935_s20, %s1102_s20   ;;  %s872_s19 = sphi %s933_s19, %s1101_s19   ;;  %s868_s18 = sphi %s931_s18, %s1100_s18  }
   0x5   : > { %p26_p0 = scmp.ge.s32.totalorder %s25_s25, 2  ;;  %s723_s27 = sadd.s32 4294967295, %s892_s24  }
   0x6   : > { %p117_p1 = scmp.ne.s32.totalorder %s872_s19, %s868_s18  ;;  %p118_p2 = scmp.eq.s32.totalorder %s723_s27, 3 }
   0x7   : > { %s1107_s25 = smov (%p26_p0, %s25_s25), 0  ;;  %s1109_s26 = smov (!%p26_p0, %s28_s26), %s888_s23 }
   0x8   : > { %s103_s28 = ssub.s32 %s884_s22, %s1107_s25  ;;  %p30_p3 = scmp.ge.s32.totalorder %s1109_s26, 2 }
   0x9   : > { %p727_p4 = scmp.ge.s32.totalorder %s892_s24, 1  ;;  %p977_p5 = por %p118_p2, %p117_p1 }
   0xa   : > { %p217_p6 = scmp.lt.s32.totalorder %s892_s24, 5  ;;  %s1111_s26 = smov (%p30_p3, %s1109_s26), 0 }
   0xb   : > { %s102_s30 = ssub.s32 %s888_s23, %s1111_s26  ;;  %s107_s7 = sadd.s32 1, %s872_s19 }
   0xc   : > { %p218_p7 = pnand %p727_p4, %p217_p6  ;;  %s104_s6 = sor.u32 %s103_s28, %s102_s30 }
   0xd   : > { %p105_p8 = scmp.eq.s32.totalorder %s104_s6, 0  ;;  %s997_s13 = sshll.u32 (!%p218_p7), %s876_s20, 1 }
   0xe   : > { %221 = sbr.rel (%p218_p7) target bundleno = 368 (0x170), region = 32  ;;  %p257_p9 = scmp.lt.s32.totalorder (!%p218_p7), %s880_s21, 1 }
   0xf   : > { %s988_s8 = scalar_select %p105_p8, %s872_s19, %s107_s7  }
  0x10   : > { %p259_p10 = scmp.lt.s32.totalorder (!%p218_p7), %s997_s13, 3  ;;  %s241_s20 = sand.u32 (!%p218_p7), 1, %s868_s18  }
  0x11   : > { %s1010_s10 = sshll.u32 (!%p218_p7), %s241_s20, 4  ;;  %s896_s11 = smov (!%p218_p7), 64  }
  0x12   : > { %s897_s12 = smov (!%p218_p7), 96   ;;  %s898_s18 = smov (!%p218_p7), 112  }
  0x13   : > { %v836_v0 = vld [vmem:[%s1094_s1 + $0x8] sm:$0xff]   ;;  %v894_v1 = vmov 0.0   ;;  %v837_v2 = vld [vmem:[%s1094_s1] sm:$0xff]   ;;  %vm895_vm0 = vmmov 0   ;;  %s258_s14 = scalar_select %p257_p9, %s880_s21, 1  ;;  %vm296_vm1 = vcmask 261120  }
  0x14   : > { %765 = vmatprep.subr.bf16.mxu0 %v894_v1  ;;  %769 = vmatprep.mubr.msk.bf16.mxu0 %vm895_vm0, %v894_v1  ;;  %s260_s15 = scalar_select %p259_p10, %s997_s13, 3  ;;  %v734_v6 = vld [vmem:[%s1095_s2] ss:$0 sm:$0xff]  ;;  %vm349_vm2 = vcmask 125952  }
  0x15   : > { %766 = vmatpush3.bf16.msra.mxu0 %v836_v0  ;;  %s732_s16 = sshll.u32 %s258_s14, 2  ;;  %s1013_s14 = scalar_lea.vmem [#allocation2], %s1010_s10 }
  0x16   : > { %767 = vmatprep.subr.bf16.mxu0 %v894_v1  ;;  %s262_s17 = sadd.s32 %s732_s16, %s260_s15  ;;  %s899_s15 = smov 80  }
  0x17   : > { %s733_s27 = sshll.u32 %s262_s17, 3  ;;  %s900_s16 = smov 48  }
  0x18   : > { %s264_s6 = scalar_lea.vmem %s1093_s0, %s733_s27  ;;  %s1020_s17 = scalar_lea.vmem [#allocation4], %s1010_s10 }
  0x19   : > { %768 = vmatpush3.bf16.msra.mxu0 %v837_v2  ;;  %v270_v3 = vld [vmem:[%s264_s6] sm:$0xff]  ;;  %v271_v4 = vld [vmem:[%s264_s6 + $0x8] sm:$0xff]  ;;  %s1025_s27 = scalar_lea.vmem [#allocation3], %s1010_s10  ;;  %s750_s28 = sshll.u32 (%p977_p5), %s880_s21, 3 }
  0x1a   : > { %v272_v5 = vpack.c.bf16 %v271_v4, %v270_v3  ;;  %s412_s30 = sadd.s32 (%p977_p5), %s750_s28, %s997_s13 }
  0x1b   : > { %s751_s6 = sshll.u32 (%p977_p5), %s412_s30, 2 }
  0x1c   : > { %770 = vmatmul.mubr.msk.bf16.vlgmr.msra.gmra.mxu0 %vm296_vm1, %v272_v5  ;;  %s414_s9 = scalar_lea.vmem (%p977_p5), %s1096_s3, %s751_s6 }
  0xdc   : > { %v334_v7 = vpop.f32.mrf.mxu0 }
  0xdd   : > { %v335_v8 = vadd.f32 %v734_v6, %v334_v7 }
  0xde   : > { %v771_v9 = vpop.f32.mrf.mxu0 }
  0xdf   : > { %v760_v10 = vpack.c.bf16 %v335_v8, %v335_v8 }
  0xe0   : > { %v337_v11 = vpop.f32.mrf.mxu0 }
  0xe1   : > { %v338_v12 = vadd.f32 %v734_v6, %v337_v11  ;;  %360 = vrot.lane.b32.xlu1 %v760_v10, %s896_s11  ;;  %352 = vrot.lane.b32.xlu0 %v760_v10, %s897_s12  ;;  %350 = vst.msk [vmem:[%s1013_s14] sm:$0xf] %vm349_vm2, %v760_v10 }
  0xe2   : > { %v772_v13 = vpop.f32.mrf.mxu0 }
  0xe3   : > { %v761_v14 = vpack.c.bf16 %v338_v12, %v338_v12 }
  0xe5   : > { %368 = vrot.lane.b32.xlu0 %v760_v10, %s898_s18  ;;  %362 = vrot.lane.b32.xlu1 %v761_v14, %s896_s11  ;;  %351 = vst.msk [vmem:[%s1013_s14 + $0x4] sm:$0xf] %vm349_vm2, %v761_v14 }
  0xe9   : > { %377 = vrot.lane.b32.xlu0 %v760_v10, %s899_s15  ;;  %370 = vrot.lane.b32.xlu1 %v761_v14, %s898_s18 }
  0xec   : > { %v431_v25 = vld [vmem:[%s1013_s14] sm:$0xff] (%p977_p5)  }
  0xed   : > { %379 = vrot.lane.b32.xlu1 %v761_v14, %s899_s15  ;;  %354 = vrot.lane.b32.xlu0 %v761_v14, %s897_s12  ;;  %432 = vst [vmem:[%s414_s9] sm:$0xff] (%p977_p5), %v431_v25  }
  0xf1   : > { %388 = vrot.lane.b32.xlu1 %v761_v14, %s900_s16  ;;  %386 = vrot.lane.b32.xlu0 %v760_v10, %s900_s16 }
 0x153   : > { %v361_v15 = vpop.permute.xlu1 %360  ;;  %v353_v16 = vpop.permute.xlu0 %352 }
 0x154   : > { %366 = vst.msk [vmem:[%s1020_s17] sm:$0xf] %vm349_vm2, %v361_v15  ;;  %358 = vst.msk [vmem:[%s1025_s27] sm:$0xf] %vm349_vm2, %v353_v16 }
 0x157   : > { %v369_v17 = vpop.permute.xlu0 %368  ;;  %v363_v18 = vpop.permute.xlu1 %362 }
 0x158   : > { %740 = vst.msk [vmem:[%s1013_s14 + $0x8] sm:$0xf] %vm349_vm2, %v369_v17  ;;  %367 = vst.msk [vmem:[%s1020_s17 + $0x4] sm:$0xf] %vm349_vm2, %v363_v18 }
 0x15b   : > { %v378_v19 = vpop.permute.xlu0 %377  ;;  %v371_v20 = vpop.permute.xlu1 %370 }
 0x15c   : > { %742 = vst.msk [vmem:[%s1025_s27 + $0x8] sm:$0xf] %vm349_vm2, %v378_v19  ;;  %741 = vst.msk [vmem:[%s1013_s14 + $0xc] sm:$0xf] %vm349_vm2, %v371_v20 }
 0x15f   : > { %v380_v21 = vpop.permute.xlu1 %379  ;;  %v355_v22 = vpop.permute.xlu0 %354 }
 0x160   : > { %743 = vst.msk [vmem:[%s1025_s27 + $0xc] sm:$0xf] %vm349_vm2, %v380_v21  ;;  %359 = vst.msk [vmem:[%s1025_s27 + $0x4] sm:$0xf] %vm349_vm2, %v355_v22  ;;  %409 = sbr.rel (!%p977_p5) target bundleno = 358 (0x166), region = 36 }
 0x163   : > { %v389_v23 = vpop.permute.xlu1 %388  ;;  %v387_v24 = vpop.permute.xlu0 %386  ;;  %v435_v26 = vld [vmem:[%s1013_s14 + $0x8] sm:$0xff] (%p977_p5)  }
 0x164   : > { %745 = vst.msk [vmem:[%s1020_s17 + $0xc] sm:$0xf] %vm349_vm2, %v389_v23  ;;  %744 = vst.msk [vmem:[%s1020_s17 + $0x8] sm:$0xf] %vm349_vm2, %v387_v24 }
 0x165   : > { %436 = vst [vmem:[%s414_s9 + $0x10] sm:$0xff] %v435_v26  }
 0x166 PF: > { %470 = sbr.rel (!%p977_p5) target bundleno = 363 (0x16b), region = 77  ;;  %s753_s10 = sshll.u32 (%p977_p5), %s880_s21, 3 }
 0x167   : > { %s473_s11 = sadd.s32 (%p977_p5), %s753_s10, %s997_s13 }
 0x168   : > { %v492_v27 = vld [vmem:[%s1025_s27] sm:$0xff] (%p977_p5)   ;;  %v496_v28 = vld [vmem:[%s1025_s27 + $0x8] sm:$0xff] (%p977_p5)   ;;  %s754_s12 = sshll.u32 (%p977_p5), %s473_s11, 2 }
 0x169   : > { %s475_s15 = scalar_lea.vmem (%p977_p5), %s1097_s4, %s754_s12 }
 0x16a   : > { %493 = vst [vmem:[%s475_s15] sm:$0xff] (%p977_p5), %v492_v27   ;;  %497 = vst [vmem:[%s475_s15 + $0x10] sm:$0xff] (%p977_p5), %v496_v28  }
 0x16b PF: > { %531 = sbr.rel (!%p977_p5) target bundleno = 368 (0x170), region = 118  ;;  %s756_s16 = sshll.u32 (%p977_p5), %s880_s21, 3  ;;  %v553_v29 = vld [vmem:[%s1020_s17] sm:$0xff] (%p977_p5)  }
 0x16c   : > { %s534_s28 = sadd.s32 (%p977_p5), %s756_s16, %s997_s13  ;;  %v557_v30 = vld [vmem:[%s1020_s17 + $0x8] sm:$0xff] (%p977_p5)  }
 0x16d   : > { %s757_s27 = sshll.u32 (%p977_p5), %s534_s28, 2 }
 0x16e   : > { %s536_s20 = scalar_lea.vmem (%p977_p5), %s1098_s5, %s757_s27 }
 0x16f   : > { %554 = vst [vmem:[%s536_s20] sm:$0xff] (%p977_p5), %v553_v29   ;;  %558 = vst [vmem:[%s536_s20 + $0x10] sm:$0xff] (%p977_p5), %v557_v30  }
 0x170 PF: > { %s16_s24 = sadd.s32 1, %s892_s24   ;;  %s1100_s18 = smov %s872_s19 }
 0x171   : > { %p13_p11 = scmp.ge.s32.totalorder %s16_s24, 6   ;;  %s1101_s19 = smov %s988_s8 }
 0x172   : > { %s1102_s20 = smov %s884_s22  ;;  %s1103_s21 = smov %s888_s23 }
 0x173   : > { %s1104_s22 = smov %s1107_s25  ;;  %s1105_s23 = smov %s1111_s26 }
 0x174   :  { %15 = sbr.rel (!%p13_p11) target bundleno = 4 (0x4), region = 212 }

// kernel: encoder_forward.8
= control target key start
LH: loop header
LB: loop body
LE: loop exit
PB: predicated region body
PF: predicated region fallthrough
CT: control target
= control target key end

     0   :  { %s1182_s0 = inlined_call_operand.vmem [shape: bf16[64,32], index: 0, kind: input, shape index: {}]   ;;  %s1183_s1 = inlined_call_operand.vmem [shape: bf16[32,256], index: 1, kind: input, shape index: {}]   ;;  %s1184_s2 = inlined_call_operand.vmem [shape: f32[1,256], index: 2, kind: input, shape index: {}]   ;;  %s1185_s3 = inlined_call_operand.vmem [shape: bf16[256,32], index: 3, kind: input, shape index: {}]   ;;  %s1186_s4 = inlined_call_operand.vmem [shape: f32[1,32], index: 4, kind: input, shape index: {}]   ;;  %s1187_s5 = inlined_call_operand.vmem [shape: f32[1,32], index: 5, kind: input, shape index: {}]   ;;  %s1188_s6 = inlined_call_operand.vmem [shape: f32[1,32], index: 6, kind: input, shape index: {}]   ;;  %s1189_s7 = inlined_call_operand.vmem [shape: bf16[64,32], index: 7, kind: output, shape index: {}]  }
   0x1   :  { %1190 = sst [smem:[#allocation5_spill]] %s1183_s1 }
   0x2   :  { %s1041_s24 = smov 0   ;;  %s1043_s25 = smov 0  }
   0x3   :  { %s1045_s26 = smov 0   ;;  %s1047_s27 = smov 0  }
   0x4   :  { %s1049_s28 = smov 0   ;;  %s1051_s29 = smov 0  }
   0x5   :  { %s1053_s30 = smov 0  }
   0x6 LB: > { %s26_s8 = sadd.s32 1, %s988_s28  ;;  %s29_s9 = sadd.s32 1, %s992_s29  ;;  %s996_s30 = sphi %s1053_s30, %s17_s30   ;;  %s992_s29 = sphi %s1051_s29, %s1199_s29   ;;  %s988_s28 = sphi %s1049_s28, %s1198_s28   ;;  %s984_s27 = sphi %s1047_s27, %s1197_s27   ;;  %s980_s26 = sphi %s1045_s26, %s1196_s26   ;;  %s976_s25 = sphi %s1043_s25, %s1195_s25   ;;  %s972_s24 = sphi %s1041_s24, %s1194_s24  }
   0x7   : > { %p27_p0 = scmp.ge.s32.totalorder %s26_s8, 2  ;;  %s62_s10 = sadd.s32 1, %s976_s25 }
   0x8   : > { %p69_p1 = scmp.ne.s32.totalorder %s976_s25, %s972_s24  ;;  %p70_p2 = scmp.eq.s32.totalorder %s996_s30, 0 }
   0x9   : > { %s1201_s8 = smov (%p27_p0, %s26_s8), 0  ;;  %s1203_s9 = smov (!%p27_p0, %s29_s9), %s992_s29 }
   0xa   : > { %s59_s11 = ssub.s32 %s988_s28, %s1201_s8  ;;  %p71_p3 = por %p70_p2, %p69_p1 }
   0xb   : > { %p31_p4 = scmp.ge.s32.totalorder %s1203_s9, 4  ;;  %p60_p5 = scmp.eq.s32.totalorder %s59_s11, 0 }
   0xc   : > { %p789_p6 = scmp.ge.s32.totalorder %s996_s30, 8 }
   0xd   : > { %s1205_s9 = smov (%p31_p4, %s1203_s9), 0 }
   0xe   : > { %1191 = sst [smem:[#allocation4_spill]] %s1205_s9  ;;  %245 = sbr.rel (%p789_p6) target bundleno = 31 (0x1f), region = 28 }
   0xf   : > { %s1090_s12 = scalar_select %p60_p5, %s976_s25, %s62_s10  }
  0x13   : > { %257 = sbr.rel (!%p71_p3) target bundleno = 31 (0x1f), region = 36  ;;  %s259_s13 = sand.u32 (%p71_p3), 1, %s976_s25  }
  0x14   : > { %s791_s14 = sshll.u32 (%p71_p3), %s988_s28, 2  ;;  %s790_s15 = sshll.u32 (%p71_p3), %s259_s13, 4 }
  0x15   : > { %s1192_s1 = sld [smem:[#allocation5_spill]] (%p71_p3)  ;;  %s261_s19 = scalar_lea.vmem (%p71_p3), [#allocation3], %s790_s15 }
  0x1b   : > { %s263_s18 = scalar_lea.vmem %s1192_s1, %s791_s14 }
  0x1c   : > { %v280_v0 = vld [vmem:[%s263_s18] sm:$0xf]  ;;  %v282_v1 = vld [vmem:[%s263_s18 + $0x8] sm:$0xf]  ;;  %v284_v2 = vld [vmem:[%s263_s18 + $0x10] sm:$0xf] }
  0x1d   : > { %281 = vst [vmem:[%s261_s19] sm:$0xf] %v280_v0  ;;  %283 = vst [vmem:[%s261_s19 + $0x4] sm:$0xf] %v282_v1  ;;  %v286_v3 = vld [vmem:[%s263_s18 + $0x18] sm:$0xf] }
  0x1e   : > { %285 = vst [vmem:[%s261_s19 + $0x8] sm:$0xf] %v284_v2  ;;  %287 = vst [vmem:[%s261_s19 + $0xc] sm:$0xf] %v286_v3 }
  0x1f PF: > { %p792_p7 = scmp.ge.s32.totalorder %s996_s30, 1  ;;  %p333_p8 = scmp.lt.s32.totalorder %s996_s30, 9 }
  0x21   : > { %p334_p9 = pnand %p792_p7, %p333_p8 }
  0x22   : > { %s340_s20 = sand.u32 (!%p334_p9), 1, %s972_s24   ;;  %s794_s21 = sshll.u32 (!%p334_p9), %s984_s27, 1 }
  0x23   : > { %337 = sbr.rel (%p334_p9) target bundleno = 786 (0x312), region = 85  ;;  %s793_s22 = sshll.u32 (!%p334_p9), %s340_s20, 4 }
  0x24   : > { %p385_p10 = scmp.lt.s32.totalorder (!%p334_p9), %s794_s21, 7  ;;  %p390_p11 = scmp.lt.s32.totalorder (!%p334_p9), %s980_s26, 1 }
  0x25   : > { %s796_s11 = sshll.u32 (!%p334_p9), %s980_s26, 4  ;;  %s342_s13 = scalar_lea.vmem (!%p334_p9), [#allocation3], %s793_s22 }
  0x26   : > { %p394_p12 = scmp.lt.s32.totalorder (!%p334_p9), %s796_s11, 31  ;;  %p800_p13 = scmp.ne.s32.totalorder (!%p334_p9), %s980_s26, 0 }
  0x28   : > { %s1207_s21 = smov (!%p385_p10, %s794_s21), 7  ;;  %s1209_s11 = smov (!%p394_p12, %s796_s11), 31 }
  0x29   : > { %s1104_s23 = scalar_select %p390_p11, %s980_s26, 1 }
  0x2a   : > { %s795_s10 = sshll.u32 %s1207_s21, 2  ;;  %s797_s20 = sshll.u32 %s1209_s11, 2 }
  0x2b   : > { %s1110_s15 = scalar_lea.vmem %s1182_s0, %s795_s10  ;;  %s392_s18 = scalar_lea.vmem %s1184_s2, %s1104_s23 }
  0x2c   : > { %s1119_s19 = scalar_lea.vmem %s1189_s7, %s795_s10  ;;  %s1124_s9 = scalar_lea.vmem %s1185_s3, %s797_s20 }
  0x2d   : > { %409 = sbr.rel (%p800_p13) target bundleno = 52 (0x34), region = 93 }
  0x32   : > { %vm410_vm0 = vcmask 261120   ;;  %v998_v4 = vmov 0.0  }
  0x33   : > { %411 = vst.msk [vmem:[#allocation2] sm:$0xff] %vm410_vm0, %v998_v4  ;;  %412 = vst.msk [vmem:[#allocation2 + $0x8] sm:$0xff] %vm410_vm0, %v998_v4 }
  0x34 PF: > { %v927_v5 = vld [vmem:[%s342_s13 + $0x8] sm:$0xff]   ;;  %v999_v6 = vmov 0.0   ;;  %v928_v7 = vld [vmem:[%s342_s13] sm:$0xff]   ;;  %vm1000_vm1 = vmmov 0   ;;  %vm443_vm2 = vcmask 261120   ;;  %p814_p0 = scmp.ne.s32.totalorder %s980_s26, 1 }
  0x35   : > { %840 = vmatprep.subr.bf16.mxu0 %v999_v6  ;;  %848 = vmatprep.subr.bf16.mxu1 %v999_v6  ;;  %v930_v8 = vld [vmem:[%s1124_s9 + $0x38] sm:$0xff]   ;;  %v929_v9 = vld [vmem:[%s1110_s15] sm:$0xff]   ;;  %v931_v10 = vld [vmem:[%s1124_s9 + $0x30] sm:$0xff]  }
  0x36   : > { %841 = vmatpush3.bf16.msra.mxu0 %v927_v5  ;;  %844 = vmatprep.mubr.msk.bf16.mxu0 %vm1000_vm1, %v999_v6  ;;  %v932_v11 = vld [vmem:[%s1124_s9 + $0x28] sm:$0xff]   ;;  %v933_v12 = vld [vmem:[%s1124_s9 + $0x20] sm:$0xff]   ;;  %v934_v13 = vld [vmem:[%s1124_s9 + $0x18] sm:$0xff]  }
  0x37   : > { %842 = vmatprep.subr.bf16.mxu0 %v999_v6  ;;  %864 = vmatprep.mubr.msk.bf16.mxu1 %vm1000_vm1, %v999_v6  ;;  %v935_v14 = vld [vmem:[%s1124_s9 + $0x10] sm:$0xff]   ;;  %v936_v15 = vld [vmem:[%s1124_s9 + $0x8] sm:$0xff]   ;;  %v937_v16 = vld [vmem:[%s1124_s9] sm:$0xff]  }
  0x38   : > { %849 = vmatpush3.bf16.msra.mxu1 %v930_v8  ;;  %v801_v17 = vld [vmem:[%s392_s18] ss:$0 sm:$0xff] }
  0x39   : > { %850 = vmatprep.subr.bf16.mxu1 %v999_v6 }
  0x3a   : > { %843 = vmatpush3.bf16.msra.mxu0 %v928_v7  ;;  %v490_v27 = vld [vmem:[#allocation2] sm:$0xff]  ;;  %v491_v31 = vld [vmem:[#allocation2 + $0x8] sm:$0xff] }
  0x3c   : > { %851 = vmatpush3.bf16.msra.mxu1 %v931_v10 }
  0x3d   : > { %845 = vmatmul.mubr.msk.bf16.vlgmr.msra.gmra.mxu0 %vm443_vm2, %v929_v9  ;;  %852 = vmatprep.subr.bf16.mxu1 %v999_v6 }
  0x40   : > { %853 = vmatpush3.bf16.msra.mxu1 %v932_v11 }
  0x41   : > { %854 = vmatprep.subr.bf16.mxu1 %v999_v6 }
  0x44   : > { %855 = vmatpush3.bf16.msra.mxu1 %v933_v12 }
  0x45   : > { %856 = vmatprep.subr.bf16.mxu1 %v999_v6 }
  0x48   : > { %857 = vmatpush3.bf16.msra.mxu1 %v934_v13 }
  0x49   : > { %858 = vmatprep.subr.bf16.mxu1 %v999_v6 }
  0x4c   : > { %859 = vmatpush3.bf16.msra.mxu1 %v935_v14 }
  0x4d   : > { %860 = vmatprep.subr.bf16.mxu1 %v999_v6 }
  0x50   : > { %861 = vmatpush3.bf16.msra.mxu1 %v936_v15 }
  0x51   : > { %862 = vmatprep.subr.bf16.mxu1 %v999_v6 }
  0x54   : > { %863 = vmatpush3.bf16.msra.mxu1 %v937_v16 }
  0xfd   : > { %v481_v18 = vpop.f32.mrf.mxu0 }
  0xfe   : > { %v482_v20 = vadd.f32 %v801_v17, %v481_v18 }
  0xff   : > { %v846_v19 = vpop.f32.mrf.mxu0 }
 0x100   : > { %v488_v24 = vmax.f32 %v482_v20, 0.0 }
 0x101   : > { %v484_v21 = vpop.f32.mrf.mxu0 }
 0x102   : > { %v485_v22 = vadd.f32 %v801_v17, %v484_v21 }
 0x103   : > { %v847_v23 = vpop.f32.mrf.mxu0 }
 0x104   : > { %v489_v25 = vmax.f32 %v485_v22, 0.0 }
 0x106   : > { %v492_v26 = vpack.c.bf16 %v489_v25, %v488_v24 }
 0x108   : > { %865 = vmatmul.mubr.bf16.vlgmr.msra.gmra.mxu1 %v492_v26 }
 0x1c8   : > { %v591_v28 = vpop.f32.mrf.mxu1 }
 0x1c9   : > { %v598_v29 = vadd.f32 %v591_v28, %v490_v27 }
 0x1ca   : > { %v866_v30 = vpop.f32.mrf.mxu1 }
 0x1cb   : > { %600 = vst.msk [vmem:[#allocation2] sm:$0xff] %vm443_vm2, %v598_v29  ;;  %605 = sbr.rel (%p814_p0) target bundleno = 786 (0x312), region = 97 }
 0x1cc   : > { %v594_v32 = vpop.f32.mrf.mxu1 }
 0x1cd   : > { %v599_v33 = vadd.f32 %v594_v32, %v491_v31 }
 0x1ce   : > { %v867_v34 = vpop.f32.mrf.mxu1 }
 0x1cf   : > { %601 = vst.msk [vmem:[#allocation2 + $0x8] sm:$0xff] %vm443_vm2, %v599_v33 }
 0x1d0   : > { %v825_v35 = vld [vmem:[%s1110_s15] sm:$0xff]   ;;  %vm676_vm3 = vcmask 257024  }
 0x1d1   : > { %v826_v37 = vunpack.c.l.bf16 %v825_v35  ;;  %v827_v38 = vunpack.c.h.bf16 %v825_v35  ;;  %v815_v40 = vld [vmem:[%s1186_s4] ss:$0 sm:$0xff] }
 0x1d2   : > { %v610_v36 = vld [vmem:[#allocation2] sm:$0xff] }
 0x1d3   : > { %v612_v41 = vadd.f32 %v826_v37, %v610_v36  ;;  %v816_v0 = vld [vmem:[%s1187_s5] ss:$0 sm:$0xff] }
 0x1d4   : > { %v817_v2 = vld [vmem:[%s1188_s6] ss:$0 sm:$0xff] }
 0x1d5   : > { %v621_v43 = vadd.f32 %v815_v40, %v612_v41 }
 0x1d6   : > { %v611_v39 = vld [vmem:[#allocation2 + $0x8] sm:$0xff] }
 0x1d7   : > { %v613_v42 = vadd.f32 %v827_v38, %v611_v39  ;;  %v625_v45 = vsel %vm443_vm2, %v621_v43, 0.0 }
 0x1d8   : > { %626 = vadd.xlane.f32.xlu0 %v625_v45 }
 0x1d9   : > { %v622_v44 = vadd.f32 %v815_v40, %v613_v42 }
 0x1db   : > { %v628_v46 = vsel %vm443_vm2, %v622_v44, 0.0 }
 0x1dc   : > { %629 = vadd.xlane.f32.xlu0 %v628_v46 }
 0x261   : > { %v627_v47 = vpop.xlane.xlu0 %626 }
 0x262   : > { %v632_v48 = vmul.f32 0.03125, %v627_v47 }
 0x264   : > { %v634_v49 = vsub.f32 %v621_v43, %v632_v48 }
 0x265   : > { %v630_v50 = vpop.xlane.xlu0 %629 }
 0x266   : > { %v633_v51 = vmul.f32 0.03125, %v630_v50  ;;  %v636_v52 = vmul.f32 %v634_v49, %v634_v49 }
 0x268   : > { %v635_v53 = vsub.f32 %v622_v44, %v633_v51  ;;  %v638_v54 = vsel %vm443_vm2, %v636_v52, 0.0 }
 0x269   : > { %639 = vadd.xlane.f32.xlu1 %v638_v54 }
 0x26a   : > { %v637_v55 = vmul.f32 %v635_v53, %v635_v53 }
 0x26c   : > { %v641_v56 = vsel %vm443_vm2, %v637_v55, 0.0 }
 0x26d   : > { %642 = vadd.xlane.f32.xlu1 %v641_v56 }
 0x2f2   : > { %v640_v57 = vpop.xlane.xlu1 %639 }
 0x2f3   : > { %v644_v58 = vmul.f32 0.03125, %v640_v57 }
 0x2f5   : > { %v646_v59 = vadd.f32 1e-05, %v644_v58 }
 0x2f6   : > { %v643_v60 = vpop.xlane.xlu1 %642 }
 0x2f7   : > { %938 = vrsqrt.f32 %v646_v59  ;;  %v645_v61 = vmul.f32 0.03125, %v643_v60 }
 0x2f9   : > { %v647_v62 = vadd.f32 1e-05, %v645_v61 }
 0x2fb   : > { %940 = vrsqrt.f32 %v647_v62 }
 0x304   : > { %v939_v63 = vpop.eup %938 }
 0x305   : > { %v650_v1 = vmul.f32 %v939_v63, %v634_v49 }
 0x307   : > { %v658_v3 = vmul.f32 %v816_v0, %v650_v1 }
 0x308   : > { %v941_v4 = vpop.eup %940 }
 0x309   : > { %v666_v5 = vadd.f32 %v817_v2, %v658_v3  ;;  %v651_v6 = vmul.f32 %v941_v4, %v635_v53 }
 0x30b   : > { %v822_v7 = vpack.c.bf16 %v666_v5, %v666_v5  ;;  %v659_v8 = vmul.f32 %v816_v0, %v651_v6 }
 0x30d   : > { %677 = vst.msk [vmem:[%s1119_s19] sm:$0xf] %vm676_vm3, %v822_v7  ;;  %v667_v9 = vadd.f32 %v817_v2, %v659_v8 }
 0x30f   : > { %v823_v10 = vpack.c.bf16 %v667_v9, %v667_v9 }
 0x311   : > { %678 = vst.msk [vmem:[%s1119_s19 + $0x4] sm:$0xf] %vm676_vm3, %v823_v10 }
 0x312 PF: > { %s17_s30 = sadd.s32 1, %s996_s30   ;;  %s1193_s15 = sld [smem:[#allocation4_spill]] }
 0x313   : > { %p14_p1 = scmp.ge.s32.totalorder %s17_s30, 10   ;;  %s1194_s24 = smov %s976_s25 }
 0x314   : > { %s1195_s25 = smov %s1090_s12  ;;  %s1196_s26 = smov %s988_s28 }
 0x315   : > { %s1197_s27 = smov %s992_s29  ;;  %s1198_s28 = smov %s1201_s8 }
 0x316   :  { %16 = sbr.rel (!%p14_p1) target bundleno = 6 (0x6), region = 141 }
 0x318   : > { %s1199_s29 = smov %s1193_s15 }

// kernel: encoder_forward.7
= control target key start
LH: loop header
LB: loop body
LE: loop exit
PB: predicated region body
PF: predicated region fallthrough
CT: control target
= control target key end

     0   :  { %s1928_s0 = inlined_call_operand.vmem [shape: f32[2,32,32], index: 0, kind: input, shape index: {}]   ;;  %s1929_s1 = inlined_call_operand.vmem [shape: bf16[2,2,32,16], index: 1, kind: input, shape index: {}]   ;;  %s1930_s2 = inlined_call_operand.vmem [shape: bf16[2,2,32,16], index: 2, kind: input, shape index: {}]   ;;  %s1931_s3 = inlined_call_operand.vmem [shape: bf16[2,2,32,16], index: 3, kind: input, shape index: {}]   ;;  %s1932_s4 = inlined_call_operand.vmem [shape: bf16[32,32], index: 4, kind: input, shape index: {}]   ;;  %s1933_s5 = inlined_call_operand.vmem [shape: f32[1,32], index: 5, kind: input, shape index: {}]   ;;  %s1934_s6 = inlined_call_operand.vmem [shape: f32[1,32], index: 6, kind: input, shape index: {}]   ;;  %s1935_s7 = inlined_call_operand.vmem [shape: f32[1,32], index: 7, kind: input, shape index: {}]   ;;  %s1936_s8 = inlined_call_operand.vmem [shape: bf16[2,32,32], index: 8, kind: output, shape index: {}]  }
   0x1   :  { %1941 = sst [smem:[#allocation12_spill]] %s1933_s5 }
   0x2   :  { %1942 = sst [smem:[#allocation13_spill]] %s1934_s6 }
   0x3   :  { %1943 = sst [smem:[#allocation14_spill]] %s1935_s7 }
   0x4   :  { %s1691_s27 = smov 0   ;;  %s1693_s28 = smov 0  }
   0x5   :  { %s1695_s29 = smov 0   ;;  %s1697_s30 = smov 0  }
   0x6   :  { %s1699_s9 = smov 0   ;;  %s1701_s10 = smov 0  }
   0x7   :  { %s1703_s11 = smov 0   ;;  %s1705_s12 = smov 0  }
   0x8   :  { %s1707_s13 = smov 0   ;;  %s1709_s14 = smov 0  }
   0x9   :  { %s1711_s15 = smov 0  }
   0xa LB: > { %1944 = sst [smem:[#allocation8_spill]] %s1627_s13  ;;  %s30_s16 = sadd.s32 1, %s1623_s12  ;;  %s1635_s15 = sphi %s1711_s15, %s18_s15   ;;  %s1631_s14 = sphi %s1709_s14, %s1964_s14   ;;  %s1627_s13 = sphi %s1707_s13, %s1955_s13   ;;  %s1623_s12 = sphi %s1705_s12, %s1963_s12   ;;  %s1619_s11 = sphi %s1703_s11, %s1962_s11   ;;  %s1615_s10 = sphi %s1701_s10, %s1953_s10   ;;  %s1611_s9 = sphi %s1699_s9, %s1961_s9   ;;  %s1607_s30 = sphi %s1697_s30, %s1960_s30   ;;  %s1603_s29 = sphi %s1695_s29, %s1959_s29   ;;  %s1599_s28 = sphi %s1693_s28, %s1958_s28   ;;  %s1595_s27 = sphi %s1691_s27, %s1957_s27  }
   0xb   : > { %p31_p0 = scmp.ge.s32.totalorder %s30_s16, 2  ;;  %s33_s17 = sadd.s32 1, %s1627_s13 }
   0xc   : > { %p81_p1 = scmp.ne.s32.totalorder %s1607_s30, %s1603_s29  ;;  %p82_p2 = scmp.eq.s32.totalorder %s1635_s15, 0 }
   0xd   : > { %s1966_s16 = smov (%p31_p0, %s30_s16), 0  ;;  %s1968_s17 = smov (!%p31_p0, %s33_s17), %s1627_s13 }
   0xe   : > { %1945 = sst [smem:[#allocation9_spill]] %s1966_s16  ;;  %p35_p3 = scmp.ge.s32.totalorder %s1968_s17, 2 }
   0xf   : > { %s37_s18 = sadd.s32 1, %s1631_s14  ;;  %p1755_p4 = por %p82_p2, %p81_p1 }
  0x10   : > { %p109_p5 = scmp.ne.s32.totalorder %s1599_s28, %s1595_s27  ;;  %s1970_s17 = smov (%p35_p3, %s1968_s17), 0 }
  0x11   : > { %1947 = sst [smem:[#allocation10_spill]] %s1970_s17  ;;  %s1972_s18 = smov (!%p35_p3, %s37_s18), %s1631_s14 }
  0x12   : > { %p1764_p6 = por %p109_p5, %p82_p2  ;;  %p39_p7 = scmp.ge.s32.totalorder %s1972_s18, 2 }
  0x13   : > { %s70_s21 = ssub.s32 %s1627_s13, %s1970_s17  ;;  %s98_s22 = ssub.s32 %s1623_s12, %s1966_s16 }
  0x14   : > { %s1974_s18 = smov (%p39_p7, %s1972_s18), 0  ;;  %s74_s23 = sadd.s32 1, %s1607_s30 }
  0x15   : > { %1949 = sst [smem:[#allocation11_spill]] %s1974_s18  ;;  %s69_s24 = ssub.s32 %s1631_s14, %s1974_s18 }
  0x16   : > { %s102_s25 = sadd.s32 1, %s1599_s28  ;;  %s71_s26 = sor.u32 %s70_s21, %s69_s24 }
  0x17   : > { %s99_s7 = sor.u32 %s98_s22, %s69_s24  ;;  %p72_p8 = scmp.eq.s32.totalorder %s71_s26, 0 }
  0x18   : > { %p100_p9 = scmp.eq.s32.totalorder %s99_s7, 0  ;;  %p1317_p10 = scmp.ge.s32.totalorder %s1635_s15, 8 }
  0x19   : > { %s1779_s6 = scalar_select %p72_p8, %s1607_s30, %s74_s23  }
  0x1a   : > { %s1782_s5 = scalar_select %p100_p9, %s1599_s28, %s102_s25  }
  0x1b   : > { %287 = sbr.rel (%p1317_p10) target bundleno = 56 (0x38), region = 32 }
  0x20   : > { %303 = sbr.rel (!%p1755_p4) target bundleno = 40 (0x28), region = 40  ;;  %s305_s17 = sand.u32 (%p1755_p4), 1, %s1607_s30  }
  0x21   : > { %s1319_s18 = sshll.u32 (%p1755_p4), %s1627_s13, 1  ;;  %s1318_s16 = sshll.u32 (%p1755_p4), %s305_s17, 4 }
  0x22   : > { %s1320_s21 = sshll.u32 (%p1755_p4), %s1631_s14, 3  ;;  %s307_s26 = scalar_lea.vmem (%p1755_p4), [#allocation5], %s1318_s16 }
  0x23   : > { %s310_s22 = sadd.s32 (%p1755_p4), %s1320_s21, %s1319_s18 }
  0x24   : > { %s1321_s24 = sshll.u32 (%p1755_p4), %s310_s22, 2 }
  0x25   : > { %s312_s25 = scalar_lea.vmem %s1929_s1, %s1321_s24 }
  0x26   : > { %v329_v0 = vld [vmem:[%s312_s25] sm:$0xff]   ;;  %v333_v1 = vld [vmem:[%s312_s25 + $0x10] sm:$0xff]  }
  0x27   : > { %330 = vst [vmem:[%s307_s26] sm:$0xff] %v329_v0   ;;  %334 = vst [vmem:[%s307_s26 + $0x8] sm:$0xff] %v333_v1  }
  0x28 PF: > { %368 = sbr.rel (!%p1764_p6) target bundleno = 48 (0x30), region = 81  ;;  %s370_s17 = sand.u32 (%p1764_p6), 1, %s1599_s28  }
  0x29   : > { %s1323_s19 = sshll.u32 (%p1764_p6), %s1623_s12, 1  ;;  %s1322_s18 = sshll.u32 (%p1764_p6), %s370_s17, 4 }
  0x2a   : > { %s1324_s21 = sshll.u32 (%p1764_p6), %s1631_s14, 3  ;;  %s372_s16 = scalar_lea.vmem (%p1764_p6), [#allocation6], %s1322_s18 }
  0x2b   : > { %s375_s22 = sadd.s32 (%p1764_p6), %s1324_s21, %s1323_s19 }
  0x2c   : > { %s1325_s13 = sshll.u32 (%p1764_p6), %s375_s22, 2 }
  0x2d   : > { %s377_s23 = scalar_lea.vmem %s1930_s2, %s1325_s13 }
  0x2e   : > { %v394_v2 = vld [vmem:[%s377_s23] sm:$0xff]   ;;  %v398_v3 = vld [vmem:[%s377_s23 + $0x10] sm:$0xff]  }
  0x2f   : > { %395 = vst [vmem:[%s372_s16] sm:$0xff] %v394_v2   ;;  %399 = vst [vmem:[%s372_s16 + $0x8] sm:$0xff] %v398_v3  }
  0x30 PF: > { %433 = sbr.rel (!%p1764_p6) target bundleno = 56 (0x38), region = 122  ;;  %s435_s25 = sand.u32 (%p1764_p6), 1, %s1599_s28  }
  0x31   : > { %s1327_s26 = sshll.u32 (%p1764_p6), %s1623_s12, 1  ;;  %s1326_s17 = sshll.u32 (%p1764_p6), %s435_s25, 4 }
  0x32   : > { %s1328_s19 = sshll.u32 (%p1764_p6), %s1631_s14, 3  ;;  %s437_s18 = scalar_lea.vmem (%p1764_p6), [#allocation7], %s1326_s17 }
  0x33   : > { %s440_s21 = sadd.s32 (%p1764_p6), %s1328_s19, %s1327_s26 }
  0x34   : > { %s1329_s22 = sshll.u32 (%p1764_p6), %s440_s21, 2 }
  0x35   : > { %s442_s24 = scalar_lea.vmem %s1931_s3, %s1329_s22 }
  0x36   : > { %v459_v4 = vld [vmem:[%s442_s24] sm:$0xff]   ;;  %v463_v5 = vld [vmem:[%s442_s24 + $0x10] sm:$0xff]  }
  0x37   : > { %460 = vst [vmem:[%s437_s18] sm:$0xff] %v459_v4   ;;  %464 = vst [vmem:[%s437_s18 + $0x8] sm:$0xff] %v463_v5  }
  0x38 PF: > { %p1330_p11 = scmp.ge.s32.totalorder %s1635_s15, 1  ;;  %p497_p12 = scmp.lt.s32.totalorder %s1635_s15, 9 }
  0x3a   : > { %p498_p13 = pnand %p1330_p11, %p497_p12 }
  0x3b   : > { %s504_s20 = sand.u32 (!%p498_p13), 1, %s1603_s29   ;;  %s511_s23 = sand.u32 (!%p498_p13), 1, %s1595_s27  }
  0x3c   : > { %501 = sbr.rel (%p498_p13) target bundleno = 1553 (0x611), region = 163  ;;  %s1813_s16 = sshll.u32 (!%p498_p13), %s504_s20, 4 }
  0x3d   : > { %s1815_s25 = sshll.u32 (!%p498_p13), %s511_s23, 4  ;;  %s1334_s26 = sshll.u32 (!%p498_p13), %s1615_s10, 1 }
  0x3e   : > { %p573_p0 = scmp.lt.s32.totalorder (!%p498_p13), %s1619_s11, 1  ;;  %p575_p1 = scmp.lt.s32.totalorder (!%p498_p13), %s1334_s26, 3 }
  0x3f   : > { %s506_s20 = scalar_lea.vmem (!%p498_p13), [#allocation5], %s1813_s16  ;;  %s513_s10 = scalar_lea.vmem (!%p498_p13), [#allocation6], %s1815_s25 }
  0x40   : > { %s520_s23 = scalar_lea.vmem (!%p498_p13), [#allocation7], %s1815_s25  ;;  %p1340_p2 = scmp.ne.s32.totalorder (!%p498_p13), %s1611_s9, 0 }
  0x41   : > { %s1976_s11 = smov (!%p573_p0, %s1619_s11), 1  ;;  %s1978_s26 = smov (!%p575_p1, %s1334_s26), 3 }
  0x42   : > { %s1335_s17 = sshll.u32 %s1976_s11, 2  ;;  %599 = sbr.rel (%p1340_p2) target bundleno = 78 (0x4e), region = 179 }
  0x43   : > { %s578_s19 = sadd.s32 %s1335_s17, %s1978_s26 }
  0x44   : > { %s1336_s21 = sshll.u32 %s578_s19, 3  ;;  %s1339_s22 = sshll.u32 %s578_s19, 2 }
  0x45   : > { %s1823_s27 = scalar_lea.vmem %s1928_s0, %s1336_s21  ;;  %s1828_s18 = scalar_lea.vmem %s1936_s8, %s1339_s22 }
  0x47   : > { %vm600_vm0 = vcmask 7168   ;;  %vm609_vm1 = vcmask 130048   ;;  %v1637_v6 = vmov -inf   ;;  %v1638_v7 = vmov 0.0  }
  0x48   : > { %601 = vst.msk [vmem:[#allocation2] sm:$0xff] %vm600_vm0, %v1637_v6  ;;  %602 = vst.msk [vmem:[#allocation2 + $0x8] sm:$0xff] %vm600_vm0, %v1637_v6 }
  0x49   : > { %603 = vst.msk [vmem:[#allocation2 + $0x10] sm:$0xff] %vm600_vm0, %v1637_v6  ;;  %604 = vst.msk [vmem:[#allocation2 + $0x18] sm:$0xff] %vm600_vm0, %v1637_v6 }
  0x4a   : > { %605 = vst.msk [vmem:[#allocation3] sm:$0xff] %vm600_vm0, %v1638_v7  ;;  %606 = vst.msk [vmem:[#allocation3 + $0x8] sm:$0xff] %vm600_vm0, %v1638_v7 }
  0x4b   : > { %607 = vst.msk [vmem:[#allocation3 + $0x10] sm:$0xff] %vm600_vm0, %v1638_v7  ;;  %608 = vst.msk [vmem:[#allocation3 + $0x18] sm:$0xff] %vm600_vm0, %v1638_v7 }
  0x4c   : > { %610 = vst.msk [vmem:[#allocation4] sm:$0xff] %vm609_vm1, %v1638_v7  ;;  %611 = vst.msk [vmem:[#allocation4 + $0x8] sm:$0xff] %vm609_vm1, %v1638_v7 }
  0x4d   : > { %612 = vst.msk [vmem:[#allocation4 + $0x10] sm:$0xff] %vm609_vm1, %v1638_v7  ;;  %613 = vst.msk [vmem:[#allocation4 + $0x18] sm:$0xff] %vm609_vm1, %v1638_v7 }
  0x4e PF: > { %v1506_v8 = vld [vmem:[%s513_s10] sm:$0xff]   ;;  %v1639_v9 = vmov 0.0   ;;  %vm636_vm2 = vcmask 130048   ;;  %v1507_v10 = vld [vmem:[%s513_s10 + $0x8] sm:$0xff]   ;;  %vm1640_vm3 = vmmov 0   ;;  %v1641_v27 = vmov 0  }
  0x4f   : > { %1375 = vmatprep.subr.bf16.mxu0 %v1639_v9  ;;  %1381 = vmatprep.subr.bf16.mxu1 %v1639_v9  ;;  %v641_v11 = vsel %vm636_vm2, %v1506_v8, 0  ;;  %v698_v12 = vsel %vm636_vm2, %v1507_v10, 0  ;;  %v1508_v13 = vld [vmem:[%s506_s20] sm:$0xff]   ;;  %v1509_v14 = vld [vmem:[%s506_s20 + $0x8] sm:$0xff]   ;;  %vm829_vm4 = vcmask 7168   ;;  %p1351_p3 = scmp.ne.s32.totalorder %s1611_s9, 1 }
  0x50   : > { %1376 = vmatpush3.bf16.xpose.msra.mxu0 %v641_v11  ;;  %1377 = vmatprep.mubr.msk.bf16.mxu0 %vm1640_vm3, %v1639_v9  ;;  %v741_v28 = vld [vmem:[#allocation2] sm:$0xff]  ;;  %v743_v29 = vld [vmem:[#allocation2 + $0x10] sm:$0xff]  ;;  %v742_v34 = vld [vmem:[#allocation2 + $0x8] sm:$0xff]  ;;  %s1645_s26 = smov (!%p1351_p3), 16   ;;  %s1950_s21 = sld [smem:[#allocation12_spill]] (!%p1351_p3) }
  0x51   : > { %1382 = vmatpush3.bf16.xpose.msra.mxu1 %v698_v12  ;;  %1383 = vmatprep.mubr.msk.bf16.mxu1 %vm1640_vm3, %v1639_v9  ;;  %v744_v36 = vld [vmem:[#allocation2 + $0x18] sm:$0xff]  ;;  %v1510_v45 = vld [vmem:[%s520_s23] sm:$0xff]   ;;  %s1951_s13 = sld [smem:[#allocation13_spill]] (!%p1351_p3) }
  0x52   : > { %1387 = vmatprep.subr.bf16.mxu0 %v1639_v9  ;;  %1393 = vmatprep.subr.bf16.mxu1 %v1639_v9  ;;  %v1511_v46 = vld [vmem:[%s520_s23 + $0x8] sm:$0xff]   ;;  %s1952_s24 = sld [smem:[#allocation14_spill]] (!%p1351_p3) }
  0x53   : > { %1505 = vset.pattern.permute.xlu1 %v1641_v27  ;;  %1504 = vset.pattern.permute.xlu0 %v1641_v27 }
  0x57   : > { %1378 = vmatmul.mubr.msk.bf16.vlgmr.msra.gmra.mxu0 %vm636_vm2, %v1508_v13  ;;  %v805_v13 = vld [vmem:[#allocation3] sm:$0xff] }
  0x58   : > { %1384 = vmatmul.mubr.msk.bf16.vlgmr.msra.gmra.mxu1 %vm636_vm2, %v1509_v14  ;;  %1389 = vmatprep.mubr.msk.bf16.mxu0 %vm1640_vm3, %v1639_v9 }
  0x59   : > { %1395 = vmatprep.mubr.msk.bf16.mxu1 %vm1640_vm3, %v1639_v9  ;;  %1388 = vmatpush3.bf16.msra.mxu0 %v1510_v45 }
  0x5a   : > { %1394 = vmatpush3.bf16.msra.mxu1 %v1511_v46 }
 0x117   : > { %v677_v15 = vpop.f32.mrf.mxu0 }
 0x118   : > { %v734_v16 = vpop.f32.mrf.mxu1  ;;  %v745_v17 = vsel %vm636_vm2, %v677_v15, -inf }
 0x119   : > { %v751_v18 = vsel %vm636_vm2, %v734_v16, -inf  ;;  %746 = vmax.xlane.f32.xlu0 %v745_v17  ;;  %v1379_v19 = vpop.f32.mrf.mxu0 }
 0x11a   : > { %752 = vmax.xlane.f32.xlu1 %v751_v18  ;;  %v1385_v20 = vpop.f32.mrf.mxu1  ;;  %v806_v18 = vld [vmem:[#allocation3 + $0x8] sm:$0xff] }
 0x11b   : > { %v680_v21 = vpop.f32.mrf.mxu0 }
 0x11c   : > { %v737_v22 = vpop.f32.mrf.mxu1  ;;  %v748_v23 = vsel %vm636_vm2, %v680_v21, -inf }
 0x11d   : > { %v754_v24 = vsel %vm636_vm2, %v737_v22, -inf  ;;  %749 = vmax.xlane.f32.xlu0 %v748_v23  ;;  %v1380_v25 = vpop.f32.mrf.mxu0 }
 0x11e   : > { %755 = vmax.xlane.f32.xlu1 %v754_v24  ;;  %v1386_v26 = vpop.f32.mrf.mxu1 }
 0x11f   : > { %v808_v26 = vld [vmem:[#allocation3 + $0x18] sm:$0xff] }
 0x1a2   : > { %v747_v30 = vpop.xlane.xlu0 %746 }
 0x1a3   : > { %v753_v31 = vpop.xlane.xlu1 %752  ;;  %v757_v32 = vmax.f32 %v741_v28, %v747_v30 }
 0x1a4   : > { %v759_v33 = vmax.f32 %v743_v29, %v753_v31 }
 0x1a5   : > { %v761_v35 = vsub.f32 %v741_v28, %v757_v32  ;;  %972 = vst.msk [vmem:[#allocation2] sm:$0xff] %vm829_vm4, %v757_v32  ;;  %775 = vperm.xlu0 %1504, %v757_v32   ;;  %v834_v28 = vld [vmem:[#allocation4] sm:$0xff]  ;;  %v836_v32 = vld [vmem:[#allocation4 + $0x10] sm:$0xff] }
 0x1a6   : > { %v763_v37 = vsub.f32 %v743_v29, %v759_v33  ;;  %974 = vst.msk [vmem:[#allocation2 + $0x10] sm:$0xff] %vm829_vm4, %v759_v33  ;;  %785 = vperm.xlu1 %1505, %v759_v33   ;;  %v750_v38 = vpop.xlane.xlu0 %749  ;;  %v835_v33 = vld [vmem:[#allocation4 + $0x8] sm:$0xff] }
 0x1a7   : > { %v765_v39 = vmul.f32 1.442695, %v761_v35  ;;  %v756_v40 = vpop.xlane.xlu1 %755  ;;  %v758_v41 = vmax.f32 %v742_v34, %v750_v38 }
 0x1a8   : > { %v760_v42 = vmax.f32 %v744_v36, %v756_v40  ;;  %v769_v0 = vmul.f32 1.442695, %v763_v37 }
 0x1a9   : > { %1512 = vpow2.f32 %v765_v39  ;;  %v762_v43 = vsub.f32 %v742_v34, %v758_v41  ;;  %973 = vst.msk [vmem:[#allocation2 + $0x8] sm:$0xff] %vm829_vm4, %v758_v41 }
 0x1aa   : > { %v764_v44 = vsub.f32 %v744_v36, %v760_v42  ;;  %975 = vst.msk [vmem:[#allocation2 + $0x18] sm:$0xff] %vm829_vm4, %v760_v42  ;;  %780 = vperm.xlu1 %1505, %v758_v41   ;;  %v837_v41 = vld [vmem:[#allocation4 + $0x18] sm:$0xff] }
 0x1ab   : > { %v767_v6 = vmul.f32 1.442695, %v762_v43 }
 0x1ac   : > { %v771_v9 = vmul.f32 1.442695, %v764_v44 }
 0x1ae   : > { %790 = vperm.xlu1 %1505, %v760_v42  }
 0x1b6   : > { %v1513_v47 = vpop.eup %1512 }
 0x1b7   : > { %840 = vperm.xlu1 %1505, %v1513_v47   ;;  %v809_v14 = vmul.f32 %v1513_v47, %v805_v13 }
 0x220   : > { %v776_v48 = vpop.permute.xlu0 %775 }
 0x221   : > { %v786_v49 = vpop.permute.xlu1 %785  ;;  %v793_v50 = vsub.f32 %v677_v15, %v776_v48 }
 0x222   : > { %v795_v51 = vsub.f32 %v734_v16, %v786_v49  ;;  %v807_v16 = vld [vmem:[#allocation3 + $0x10] sm:$0xff] }
 0x223   : > { %v797_v52 = vmul.f32 1.442695, %v793_v50 }
 0x224   : > { %v801_v53 = vmul.f32 1.442695, %v795_v51 }
 0x225   : > { %1514 = vpow2.f32 %v797_v52  ;;  %v781_v54 = vpop.permute.xlu1 %780 }
 0x226   : > { %v794_v55 = vsub.f32 %v680_v21, %v781_v54  ;;  %1516 = vpow2.f32 %v801_v53 }
 0x228   : > { %v799_v56 = vmul.f32 1.442695, %v794_v55 }
 0x229   : > { %v791_v57 = vpop.permute.xlu1 %790 }
 0x22a   : > { %1518 = vpow2.f32 %v799_v56  ;;  %v796_v58 = vsub.f32 %v737_v22, %v791_v57 }
 0x22c   : > { %v803_v59 = vmul.f32 1.442695, %v796_v58 }
 0x22e   : > { %1520 = vpow2.f32 %v803_v59 }
 0x22f   : > { %1522 = vpow2.f32 %v769_v0 }
 0x230   : > { %1524 = vpow2.f32 %v767_v6 }
 0x231   : > { %1526 = vpow2.f32 %v771_v9 }
 0x232   : > { %v1515_v60 = vpop.eup %1514  ;;  %v841_v12 = vpop.permute.xlu1 %840 }
 0x233   : > { %v813_v61 = vsel %vm636_vm2, %v1515_v60, 0.0  ;;  %v1517_v62 = vpop.eup %1516  ;;  %v858_v31 = vmul.f32 %v841_v12, %v834_v28 }
 0x234   : > { %814 = vadd.xlane.f32.xlu1 %v813_v61  ;;  %v819_v1 = vsel %vm636_vm2, %v1517_v62, 0.0 }
 0x237   : > { %v1519_v63 = vpop.eup %1518 }
 0x238   : > { %v816_v2 = vsel %vm636_vm2, %v1519_v63, 0.0  ;;  %820 = vadd.xlane.f32.xlu1 %v819_v1  ;;  %v862_v3 = vpack.c.bf16 %v1519_v63, %v1515_v60 }
 0x239   : > { %817 = vadd.xlane.f32.xlu0 %v816_v2 }
 0x23a   : > { %1390 = vmatmul.mubr.msk.bf16.vlgmr.msra.gmra.mxu0 %vm636_vm2, %v862_v3 }
 0x23b   : > { %v1521_v4 = vpop.eup %1520 }
 0x23c   : > { %v863_v5 = vpack.c.bf16 %v1521_v4, %v1517_v62  ;;  %v1523_v7 = vpop.eup %1522  ;;  %v822_v10 = vsel %vm636_vm2, %v1521_v4, 0.0 }
 0x23d   : > { %v1525_v8 = vpop.eup %1524  ;;  %v811_v19 = vmul.f32 %v1523_v7, %v807_v16 }
 0x23e   : > { %1396 = vmatmul.mubr.msk.bf16.vlgmr.msra.gmra.mxu1 %vm636_vm2, %v863_v5  ;;  %v1527_v11 = vpop.eup %1526  ;;  %v810_v21 = vmul.f32 %v1525_v8, %v806_v18 }
 0x23f   : > { %v812_v27 = vmul.f32 %v1527_v11, %v808_v26 }
 0x249   : > { %850 = vperm.xlu1 %1505, %v1523_v7  }
 0x24f   : > { %845 = vperm.xlu0 %1504, %v1525_v8  }
 0x26d   : > { %823 = vadd.xlane.f32.xlu1 %v822_v10 }
 0x27e   : > { %855 = vperm.xlu1 %1505, %v1527_v11  }
 0x2bd   : > { %v815_v15 = vpop.xlane.xlu1 %814 }
 0x2be   : > { %v825_v17 = vadd.f32 %v815_v15, %v809_v14 }
 0x2c0   : > { %830 = vst.msk [vmem:[#allocation3] sm:$0xff] %vm829_vm4, %v825_v17 }
 0x2c1   : > { %v821_v20 = vpop.xlane.xlu1 %820 }
 0x2c2   : > { %v827_v22 = vadd.f32 %v821_v20, %v811_v19  ;;  %v818_v23 = vpop.xlane.xlu0 %817 }
 0x2c3   : > { %v826_v24 = vadd.f32 %v818_v23, %v810_v21 }
 0x2c4   : > { %832 = vst.msk [vmem:[#allocation3 + $0x10] sm:$0xff] %vm829_vm4, %v827_v22 }
 0x2c5   : > { %831 = vst.msk [vmem:[#allocation3 + $0x8] sm:$0xff] %vm829_vm4, %v826_v24  ;;  %v851_v25 = vpop.permute.xlu1 %850 }
 0x2c6   : > { %v860_v38 = vmul.f32 %v851_v25, %v836_v32 }
 0x2ca   : > { %v846_v34 = vpop.permute.xlu0 %845 }
 0x2cb   : > { %v859_v39 = vmul.f32 %v846_v34, %v835_v33 }
 0x2f6   : > { %v824_v29 = vpop.xlane.xlu1 %823 }
 0x2f7   : > { %v828_v30 = vadd.f32 %v824_v29, %v812_v27 }
 0x2f9   : > { %833 = vst.msk [vmem:[#allocation3 + $0x18] sm:$0xff] %vm829_vm4, %v828_v30 }
 0x2fa   : > { %v907_v35 = vpop.f32.mrf.mxu0  ;;  %v856_v40 = vpop.permute.xlu1 %855 }
 0x2fb   : > { %v964_v36 = vadd.f32 %v907_v35, %v858_v31  ;;  %v861_v48 = vmul.f32 %v856_v40, %v837_v41 }
 0x2fc   : > { %v1391_v37 = vpop.f32.mrf.mxu0 }
 0x2fd   : > { %968 = vst.msk [vmem:[#allocation4] sm:$0xff] %vm636_vm2, %v964_v36 }
 0x2fe   : > { %v910_v42 = vpop.f32.mrf.mxu0  ;;  %v957_v43 = vpop.f32.mrf.mxu1 }
 0x2ff   : > { %v965_v44 = vadd.f32 %v910_v42, %v859_v39  ;;  %v966_v45 = vadd.f32 %v957_v43, %v860_v38 }
 0x300   : > { %v1392_v46 = vpop.f32.mrf.mxu0  ;;  %v1397_v47 = vpop.f32.mrf.mxu1 }
 0x301   : > { %969 = vst.msk [vmem:[#allocation4 + $0x8] sm:$0xff] %vm636_vm2, %v965_v44  ;;  %970 = vst.msk [vmem:[#allocation4 + $0x10] sm:$0xff] %vm636_vm2, %v966_v45  ;;  %979 = sbr.rel (%p1351_p3) target bundleno = 1553 (0x611), region = 183 }
 0x302   : > { %v960_v49 = vpop.f32.mrf.mxu1 }
 0x303   : > { %v967_v50 = vadd.f32 %v960_v49, %v861_v48 }
 0x304   : > { %v1398_v51 = vpop.f32.mrf.mxu1 }
 0x305   : > { %971 = vst.msk [vmem:[#allocation4 + $0x18] sm:$0xff] %vm636_vm2, %v967_v50 }
 0x306   : > { %v986_v52 = vld [vmem:[#allocation3 + $0x10] sm:$0xff]  ;;  %v987_v53 = vld [vmem:[#allocation3 + $0x18] sm:$0xff]  ;;  %v984_v54 = vld [vmem:[#allocation3] sm:$0xff]  ;;  %v1642_v55 = vmov 0   ;;  %v1643_v62 = vmov 0.0   ;;  %vm1644_vm5 = vmmov 0  }
 0x307   : > { %1528 = vset.pattern.permute.xlu0 %v1642_v55  ;;  %1537 = vrcp.f32 %v986_v52  ;;  %1529 = vset.pattern.permute.xlu1 %v1642_v55  ;;  %v985_v56 = vld [vmem:[#allocation3 + $0x8] sm:$0xff]  ;;  %v1536_v63 = vld [vmem:[%s1932_s4] sm:$0xff]   ;;  %vm1050_vm6 = vcmask 261120   ;;  %vm1152_vm7 = vcmask 257024  }
 0x308   : > { %1539 = vrcp.f32 %v987_v53  ;;  %v1535_v61 = vld [vmem:[%s1932_s4 + $0x8] sm:$0xff]   ;;  %1399 = vmatprep.subr.bf16.mxu0 %v1643_v62  ;;  %1403 = vmatprep.mubr.msk.bf16.mxu0 %vm1644_vm5, %v1643_v62  ;;  %v982_v1 = vld [vmem:[#allocation4 + $0x10] sm:$0xff]  ;;  %v980_v8 = vld [vmem:[#allocation4] sm:$0xff] }
 0x309   : > { %1541 = vrcp.f32 %v984_v54  ;;  %1400 = vmatpush3.bf16.msra.mxu0 %v1535_v61  ;;  %v981_v10 = vld [vmem:[#allocation4 + $0x8] sm:$0xff]  ;;  %v1352_v19 = vld [vmem:[%s1950_s21] ss:$0 sm:$0xff] }
 0x30a   : > { %1543 = vrcp.f32 %v985_v56  ;;  %1401 = vmatprep.subr.bf16.mxu0 %v1643_v62  ;;  %v1095_v21 = vld [vmem:[%s1823_s27] sm:$0xff]  ;;  %v1096_v26 = vld [vmem:[%s1823_s27 + $0x8] sm:$0xff] }
 0x30b   : > { %v1356_v49 = vld [vmem:[%s1951_s13] ss:$0 sm:$0xff] }
 0x30c   : > { %v983_v2 = vld [vmem:[#allocation4 + $0x18] sm:$0xff]  ;;  %v1357_v51 = vld [vmem:[%s1952_s24] ss:$0 sm:$0xff] }
 0x30d   : > { %1402 = vmatpush3.bf16.msra.mxu0 %v1536_v63 }
 0x314   : > { %v1538_v57 = vpop.eup %1537 }
 0x315   : > { %v1540_v58 = vpop.eup %1539  ;;  %1004 = vperm.xlu0 %1528, %v1538_v57  }
 0x316   : > { %v1542_v59 = vpop.eup %1541 }
 0x317   : > { %994 = vperm.xlu1 %1529, %v1542_v59   ;;  %v1544_v60 = vpop.eup %1543 }
 0x319   : > { %1009 = vperm.xlu0 %1528, %v1540_v58  }
 0x31b   : > { %999 = vperm.xlu1 %1529, %v1544_v60  }
 0x390   : > { %v1005_v0 = vpop.permute.xlu0 %1004 }
 0x391   : > { %v1014_v4 = vmul.f32 %v1005_v0, %v982_v1 }
 0x392   : > { %v995_v7 = vpop.permute.xlu1 %994 }
 0x393   : > { %v1012_v12 = vmul.f32 %v995_v7, %v980_v8 }
 0x394   : > { %v1010_v3 = vpop.permute.xlu0 %1009 }
 0x395   : > { %v1015_v5 = vmul.f32 %v1010_v3, %v983_v2 }
 0x396   : > { %v1000_v9 = vpop.permute.xlu1 %999 }
 0x397   : > { %v1530_v6 = vpack.i.bf16 %v1015_v5, %v1014_v4  ;;  %v1013_v13 = vmul.f32 %v1000_v9, %v981_v10 }
 0x399   : > { %1531 = vrot.lane.b32.xlu0 %v1530_v6, %s1645_s26 }
 0x40b   : > { %v1532_v11 = vpop.permute.xlu0 %1531 }
 0x40c   : > { %v1534_v14 = vunpack.i.h.bf16 %v1532_v11  ;;  %v1533_v15 = vunpack.i.l.bf16 %v1532_v11 }
 0x40e   : > { %v1024_v16 = vsel %vm636_vm2, %v1012_v12, %v1533_v15  ;;  %v1025_v17 = vsel %vm636_vm2, %v1013_v13, %v1534_v14 }
 0x40f   : > { %v1026_v18 = vpack.c.bf16 %v1025_v17, %v1024_v16 }
 0x411   : > { %1404 = vmatmul.mubr.msk.bf16.vlgmr.msra.gmra.mxu0 %vm1050_vm6, %v1026_v18 }
 0x4d1   : > { %v1088_v20 = vpop.f32.mrf.mxu0 }
 0x4d2   : > { %v1089_v22 = vadd.f32 %v1352_v19, %v1088_v20 }
 0x4d3   : > { %v1405_v23 = vpop.f32.mrf.mxu0 }
 0x4d4   : > { %v1097_v24 = vadd.f32 %v1095_v21, %v1089_v22 }
 0x4d5   : > { %v1091_v25 = vpop.f32.mrf.mxu0 }
 0x4d6   : > { %v1092_v27 = vadd.f32 %v1352_v19, %v1091_v25  ;;  %v1101_v28 = vsel %vm1050_vm6, %v1097_v24, 0.0 }
 0x4d7   : > { %1102 = vadd.xlane.f32.xlu1 %v1101_v28  ;;  %v1406_v29 = vpop.f32.mrf.mxu0 }
 0x4d8   : > { %v1098_v30 = vadd.f32 %v1096_v26, %v1092_v27 }
 0x4da   : > { %v1104_v31 = vsel %vm1050_vm6, %v1098_v30, 0.0 }
 0x4db   : > { %1105 = vadd.xlane.f32.xlu0 %v1104_v31 }
 0x560   : > { %v1103_v32 = vpop.xlane.xlu1 %1102 }
 0x561   : > { %v1108_v33 = vmul.f32 0.03125, %v1103_v32 }
 0x563   : > { %v1110_v34 = vsub.f32 %v1097_v24, %v1108_v33 }
 0x564   : > { %v1106_v35 = vpop.xlane.xlu0 %1105 }
 0x565   : > { %v1109_v36 = vmul.f32 0.03125, %v1106_v35  ;;  %v1112_v37 = vmul.f32 %v1110_v34, %v1110_v34 }
 0x567   : > { %v1111_v38 = vsub.f32 %v1098_v30, %v1109_v36  ;;  %v1114_v39 = vsel %vm1050_vm6, %v1112_v37, 0.0 }
 0x568   : > { %1115 = vadd.xlane.f32.xlu0 %v1114_v39 }
 0x569   : > { %v1113_v40 = vmul.f32 %v1111_v38, %v1111_v38 }
 0x56b   : > { %v1117_v41 = vsel %vm1050_vm6, %v1113_v40, 0.0 }
 0x56c   : > { %1118 = vadd.xlane.f32.xlu1 %v1117_v41 }
 0x5f1   : > { %v1116_v42 = vpop.xlane.xlu0 %1115 }
 0x5f2   : > { %v1120_v43 = vmul.f32 0.03125, %v1116_v42 }
 0x5f4   : > { %v1122_v44 = vadd.f32 1e-05, %v1120_v43 }
 0x5f5   : > { %v1119_v45 = vpop.xlane.xlu1 %1118 }
 0x5f6   : > { %1545 = vrsqrt.f32 %v1122_v44  ;;  %v1121_v46 = vmul.f32 0.03125, %v1119_v45 }
 0x5f8   : > { %v1123_v47 = vadd.f32 1e-05, %v1121_v46 }
 0x5fa   : > { %1547 = vrsqrt.f32 %v1123_v47 }
 0x603   : > { %v1546_v48 = vpop.eup %1545 }
 0x604   : > { %v1126_v50 = vmul.f32 %v1546_v48, %v1110_v34 }
 0x606   : > { %v1134_v52 = vmul.f32 %v1356_v49, %v1126_v50 }
 0x607   : > { %v1548_v53 = vpop.eup %1547 }
 0x608   : > { %v1142_v54 = vadd.f32 %v1357_v51, %v1134_v52  ;;  %v1127_v55 = vmul.f32 %v1548_v53, %v1111_v38 }
 0x60a   : > { %v1362_v56 = vpack.c.bf16 %v1142_v54, %v1142_v54  ;;  %v1135_v57 = vmul.f32 %v1356_v49, %v1127_v55 }
 0x60c   : > { %1153 = vst.msk [vmem:[%s1828_s18] sm:$0xf] %vm1152_vm7, %v1362_v56  ;;  %v1143_v58 = vadd.f32 %v1357_v51, %v1135_v57 }
 0x60e   : > { %v1363_v59 = vpack.c.bf16 %v1143_v58, %v1143_v58 }
 0x610   : > { %1154 = vst.msk [vmem:[%s1828_s18 + $0x4] sm:$0xf] %vm1152_vm7, %v1363_v59 }
 0x611 PF: > { %s18_s15 = sadd.s32 1, %s1635_s15   ;;  %s1953_s10 = sld [smem:[#allocation8_spill]] }
 0x612   : > { %p15_p4 = scmp.ge.s32.totalorder %s18_s15, 10   ;;  %s1954_s20 = sld [smem:[#allocation9_spill]] }
 0x613   : > { %s1955_s13 = sld [smem:[#allocation10_spill]]  ;;  %s1957_s27 = smov %s1599_s28 }
 0x614   : > { %s1956_s23 = sld [smem:[#allocation11_spill]]  ;;  %s1958_s28 = smov %s1782_s5 }
 0x615   : > { %s1959_s29 = smov %s1607_s30  ;;  %s1960_s30 = smov %s1779_s6 }
 0x616   : > { %s1961_s9 = smov %s1623_s12  ;;  %s1962_s11 = smov %s1631_s14 }
 0x617   :  { %17 = sbr.rel (!%p15_p4) target bundleno = 10 (0xa), region = 237 }
 0x618   : > { %s1963_s12 = smov %s1954_s20 }
 0x61a   : > { %s1964_s14 = smov %s1956_s23 }

// kernel: encoder_forward.11
= control target key start
LH: loop header
LB: loop body
LE: loop exit
PB: predicated region body
PF: predicated region fallthrough
CT: control target
= control target key end

     0   :  { %s1372_s0 = inlined_call_operand.vmem [shape: bf16[64,32], index: 0, kind: input, shape index: {}]   ;;  %s1373_s1 = inlined_call_operand.vmem [shape: bf16[32,256], index: 1, kind: input, shape index: {}]   ;;  %s1374_s2 = inlined_call_operand.vmem [shape: f32[1,256], index: 2, kind: input, shape index: {}]   ;;  %s1375_s3 = inlined_call_operand.vmem [shape: bf16[256,32], index: 3, kind: input, shape index: {}]   ;;  %s1376_s4 = inlined_call_operand.vmem [shape: f32[1,32], index: 4, kind: input, shape index: {}]   ;;  %s1377_s5 = inlined_call_operand.vmem [shape: f32[1,32], index: 5, kind: input, shape index: {}]   ;;  %s1378_s6 = inlined_call_operand.vmem [shape: f32[1,32], index: 6, kind: input, shape index: {}]   ;;  %s1379_s7 = inlined_call_operand.hbm [shape: f32[64,32], index: 7, kind: output, shape index: {}]  }
   0x1   :  { %1388 = sst [smem:[#allocation16_spill]] %s1373_s1 }
   0x2   :  { %12 = vsyncpa [#allocation5], 0 }
   0x3   :  { %14 = vsyncpa [#allocation5 + $0x1], 0  ;;  %s1138_s24 = smov 0   ;;  %s1140_s25 = smov 0  }
   0x4   :  { %s1142_s26 = smov 0   ;;  %s1144_s27 = smov 0  }
   0x5   :  { %s1146_s28 = smov 0   ;;  %s1148_s29 = smov 0  }
   0x6   :  { %s1150_s30 = smov 0   ;;  %s1152_s8 = smov 0  }
   0x7   :  { %s1154_s9 = smov 0   ;;  %s1156_s10 = smov 0  }
   0x8 LB: > { %1389 = sst [smem:[#allocation7_spill]] %s1062_s26  ;;  %s794_s11 = sadd.s32 4294967295, %s1090_s10   ;;  %s1090_s10 = sphi %s1156_s10, %s20_s10   ;;  %s1086_s9 = sphi %s1154_s9, %s1411_s9   ;;  %s1082_s8 = sphi %s1152_s8, %s1410_s8   ;;  %s1078_s30 = sphi %s1150_s30, %s1409_s30   ;;  %s1074_s29 = sphi %s1148_s29, %s1408_s29   ;;  %s1070_s28 = sphi %s1146_s28, %s1407_s28   ;;  %s1066_s27 = sphi %s1144_s27, %s1406_s27   ;;  %s1062_s26 = sphi %s1142_s26, %s1405_s26   ;;  %s1058_s25 = sphi %s1140_s25, %s1413_s25   ;;  %s1054_s24 = sphi %s1138_s24, %s1412_s24  }
   0x9   : > { %1390 = sst [smem:[#allocation8_spill]] %s1070_s28  ;;  %s795_s12 = sadd.s32 4294967294, %s1090_s10  }
   0xa   : > { %1391 = sst [smem:[#allocation9_spill]] %s1082_s8  ;;  %s29_s13 = sadd.s32 1, %s1082_s8 }
   0xb   : > { %1392 = sst [smem:[#allocation10_spill]] %s1086_s9  ;;  %s32_s14 = sadd.s32 1, %s1086_s9 }
   0xc   : > { %p30_p0 = scmp.ge.s32.totalorder %s29_s13, 2  ;;  %s65_s15 = sadd.s32 1, %s1070_s28 }
   0xd   : > { %p72_p1 = scmp.ne.s32.totalorder %s1070_s28, %s1066_s27  ;;  %p73_p2 = scmp.eq.s32.totalorder %s1090_s10, 0 }
   0xe   : > { %s1415_s13 = smov (%p30_p0, %s29_s13), 0  ;;  %s1417_s14 = smov (!%p30_p0, %s32_s14), %s1086_s9 }
   0xf   : > { %1393 = sst [smem:[#allocation11_spill]] %s1415_s13  ;;  %s62_s16 = ssub.s32 %s1082_s8, %s1415_s13 }
  0x10   : > { %p1201_p3 = por %p73_p2, %p72_p1  ;;  %p34_p4 = scmp.ge.s32.totalorder %s1417_s14, 4 }
  0x11   : > { %p63_p5 = scmp.eq.s32.totalorder %s62_s16, 0  ;;  %s206_s18 = sadd.s32 1, %s1062_s26 }
  0x12   : > { %p216_p6 = scmp.ne.s32.totalorder %s1062_s26, %s1058_s25  ;;  %s1419_s14 = smov (%p34_p4, %s1417_s14), 0 }
  0x13   : > { %1395 = sst [smem:[#allocation12_spill]] %s1419_s14  ;;  %s203_s20 = ssub.s32 %s1086_s9, %s1419_s14 }
  0x14   : > { %s1211_s19 = scalar_select %p63_p5, %s1070_s28, %s65_s15  }
  0x15   : > { %p217_p7 = scmp.eq.s32.totalorder %s794_s11, 7  ;;  %p204_p8 = scmp.eq.s32.totalorder %s203_s20, 0 }
  0x16   : > { %1396 = sst [smem:[#allocation13_spill]] %s1211_s19  ;;  %p222_p9 = scmp.ne.s32.totalorder %s1058_s25, %s1054_s24 }
  0x17   : > { %p1217_p10 = por %p217_p7, %p216_p6  ;;  %p223_p11 = scmp.eq.s32.totalorder %s795_s12, 7 }
  0x18   : > { %s1222_s22 = scalar_select %p204_p8, %s1062_s26, %s206_s18  }
  0x19   : > { %p1224_p12 = por %p223_p11, %p222_p9  ;;  %p797_p13 = scmp.ge.s32.totalorder %s1090_s10, 8 }
  0x1a   : > { %1398 = sst [smem:[#allocation14_spill]] %s1222_s22 }
  0x1b   : > { %s1399_s23 = scalar_select %p1224_p12, 1, 0 }
  0x1c   : > { %248 = sbr.rel (%p797_p13) target bundleno = 45 (0x2d), region = 28 }
  0x1d   : > { %1400 = sst [smem:[#allocation15_spill]] %s1399_s23 }
  0x21   : > { %260 = sbr.rel (!%p1201_p3) target bundleno = 45 (0x2d), region = 36  ;;  %s262_s11 = sand.u32 (%p1201_p3), 1, %s1070_s28  }
  0x22   : > { %s799_s15 = sshll.u32 (%p1201_p3), %s1082_s8, 2  ;;  %s798_s16 = sshll.u32 (%p1201_p3), %s262_s11, 4 }
  0x23   : > { %s1401_s1 = sld [smem:[#allocation16_spill]] (%p1201_p3)  ;;  %s264_s18 = scalar_lea.vmem (%p1201_p3), [#allocation3], %s798_s16 }
  0x29   : > { %s266_s12 = scalar_lea.vmem %s1401_s1, %s799_s15 }
  0x2a   : > { %v283_v0 = vld [vmem:[%s266_s12] sm:$0xf]  ;;  %v285_v1 = vld [vmem:[%s266_s12 + $0x8] sm:$0xf]  ;;  %v287_v2 = vld [vmem:[%s266_s12 + $0x10] sm:$0xf] }
  0x2b   : > { %284 = vst [vmem:[%s264_s18] sm:$0xf] %v283_v0  ;;  %286 = vst [vmem:[%s264_s18 + $0x4] sm:$0xf] %v285_v1  ;;  %v289_v3 = vld [vmem:[%s266_s12 + $0x18] sm:$0xf] }
  0x2c   : > { %288 = vst [vmem:[%s264_s18 + $0x8] sm:$0xf] %v287_v2  ;;  %290 = vst [vmem:[%s264_s18 + $0xc] sm:$0xf] %v289_v3 }
  0x2d PF: > { %p800_p0 = scmp.ge.s32.totalorder %s1090_s10, 1  ;;  %p336_p1 = scmp.lt.s32.totalorder %s1090_s10, 9 }
  0x2f   : > { %p337_p2 = pnand %p800_p0, %p336_p1 }
  0x30   : > { %s343_s14 = sand.u32 (!%p337_p2), 1, %s1066_s27   ;;  %s1384_s17 = sand.u32 (!%p337_p2), 1, %s1058_s25  }
  0x31   : > { %340 = sbr.rel (%p337_p2) target bundleno = 824 (0x338), region = 85  ;;  %s1240_s11 = sshll.u32 (!%p337_p2), %s343_s14, 4 }
  0x32   : > { %s802_s15 = sshll.u32 (!%p337_p2), %s1384_s17, 4  ;;  %s803_s16 = sshll.u32 (!%p337_p2), %s1078_s30, 1 }
  0x33   : > { %p393_p3 = scmp.lt.s32.totalorder (!%p337_p2), %s1074_s29, 1  ;;  %p388_p4 = scmp.lt.s32.totalorder (!%p337_p2), %s803_s16, 7 }
  0x34   : > { %s805_s20 = sshll.u32 (!%p337_p2), %s1074_s29, 4  ;;  %s345_s26 = scalar_lea.vmem (!%p337_p2), [#allocation3], %s1240_s11 }
  0x35   : > { %p397_p5 = scmp.lt.s32.totalorder (!%p337_p2), %s805_s20, 31  ;;  %s1265_s23 = scalar_lea.vmem (!%p337_p2), [#allocation4], %s802_s15 }
  0x36   : > { %s1248_s12 = scalar_select %p393_p3, %s1074_s29, 1 }
  0x37   : > { %s1421_s16 = smov (!%p388_p4, %s803_s16), 7  ;;  %s1423_s20 = smov (!%p397_p5, %s805_s20), 31 }
  0x38   : > { %s395_s13 = scalar_lea.vmem %s1374_s2, %s1248_s12  ;;  %s804_s27 = sshll.u32 %s1421_s16, 2 }
  0x39   : > { %s1257_s8 = scalar_lea.vmem %s1372_s0, %s804_s27  ;;  %s806_s17 = sshll.u32 %s1423_s20, 2 }
  0x3a   : > { %s1262_s22 = scalar_lea.vmem %s1375_s3, %s806_s17  ;;  %p807_p6 = scmp.ne.s32.totalorder %s1074_s29, 0 }
  0x3c   : > { %407 = sbr.rel (%p807_p6) target bundleno = 67 (0x43), region = 93 }
  0x41   : > { %vm408_vm0 = vcmask 261120   ;;  %v1092_v4 = vmov 0.0  }
  0x42   : > { %409 = vst.msk [vmem:[#allocation2] sm:$0xff] %vm408_vm0, %v1092_v4  ;;  %410 = vst.msk [vmem:[#allocation2 + $0x8] sm:$0xff] %vm408_vm0, %v1092_v4 }
  0x43 PF: > { %v967_v5 = vld [vmem:[%s345_s26 + $0x8] sm:$0xff]   ;;  %v1093_v6 = vmov 0.0   ;;  %v968_v7 = vld [vmem:[%s345_s26] sm:$0xff]   ;;  %vm1094_vm1 = vmmov 0   ;;  %vm441_vm2 = vcmask 261120   ;;  %p821_p7 = scmp.ne.s32.totalorder %s1074_s29, 1 }
  0x44   : > { %847 = vmatprep.subr.bf16.mxu0 %v1093_v6  ;;  %855 = vmatprep.subr.bf16.mxu1 %v1093_v6  ;;  %v970_v8 = vld [vmem:[%s1262_s22 + $0x38] sm:$0xff]   ;;  %v969_v9 = vld [vmem:[%s1257_s8] sm:$0xff]   ;;  %v971_v10 = vld [vmem:[%s1262_s22 + $0x30] sm:$0xff]  }
  0x45   : > { %848 = vmatpush3.bf16.msra.mxu0 %v967_v5  ;;  %851 = vmatprep.mubr.msk.bf16.mxu0 %vm1094_vm1, %v1093_v6  ;;  %v972_v11 = vld [vmem:[%s1262_s22 + $0x28] sm:$0xff]   ;;  %v973_v12 = vld [vmem:[%s1262_s22 + $0x20] sm:$0xff]   ;;  %v974_v13 = vld [vmem:[%s1262_s22 + $0x18] sm:$0xff]  }
  0x46   : > { %849 = vmatprep.subr.bf16.mxu0 %v1093_v6  ;;  %871 = vmatprep.mubr.msk.bf16.mxu1 %vm1094_vm1, %v1093_v6  ;;  %v975_v14 = vld [vmem:[%s1262_s22 + $0x10] sm:$0xff]   ;;  %v976_v15 = vld [vmem:[%s1262_s22 + $0x8] sm:$0xff]   ;;  %v977_v16 = vld [vmem:[%s1262_s22] sm:$0xff]  }
  0x47   : > { %856 = vmatpush3.bf16.msra.mxu1 %v970_v8  ;;  %v808_v17 = vld [vmem:[%s395_s13] ss:$0 sm:$0xff] }
  0x48   : > { %857 = vmatprep.subr.bf16.mxu1 %v1093_v6 }
  0x49   : > { %850 = vmatpush3.bf16.msra.mxu0 %v968_v7  ;;  %v488_v27 = vld [vmem:[#allocation2] sm:$0xff]  ;;  %v489_v31 = vld [vmem:[#allocation2 + $0x8] sm:$0xff] }
  0x4b   : > { %858 = vmatpush3.bf16.msra.mxu1 %v971_v10 }
  0x4c   : > { %852 = vmatmul.mubr.msk.bf16.vlgmr.msra.gmra.mxu0 %vm441_vm2, %v969_v9  ;;  %859 = vmatprep.subr.bf16.mxu1 %v1093_v6 }
  0x4f   : > { %860 = vmatpush3.bf16.msra.mxu1 %v972_v11 }
  0x50   : > { %861 = vmatprep.subr.bf16.mxu1 %v1093_v6 }
  0x53   : > { %862 = vmatpush3.bf16.msra.mxu1 %v973_v12 }
  0x54   : > { %863 = vmatprep.subr.bf16.mxu1 %v1093_v6 }
  0x57   : > { %864 = vmatpush3.bf16.msra.mxu1 %v974_v13 }
  0x58   : > { %865 = vmatprep.subr.bf16.mxu1 %v1093_v6 }
  0x5b   : > { %866 = vmatpush3.bf16.msra.mxu1 %v975_v14 }
  0x5c   : > { %867 = vmatprep.subr.bf16.mxu1 %v1093_v6 }
  0x5f   : > { %868 = vmatpush3.bf16.msra.mxu1 %v976_v15 }
  0x60   : > { %869 = vmatprep.subr.bf16.mxu1 %v1093_v6 }
  0x63   : > { %870 = vmatpush3.bf16.msra.mxu1 %v977_v16 }
 0x10c   : > { %v479_v18 = vpop.f32.mrf.mxu0 }
 0x10d   : > { %v480_v20 = vadd.f32 %v808_v17, %v479_v18 }
 0x10e   : > { %v853_v19 = vpop.f32.mrf.mxu0 }
 0x10f   : > { %v486_v24 = vmax.f32 %v480_v20, 0.0 }
 0x110   : > { %v482_v21 = vpop.f32.mrf.mxu0 }
 0x111   : > { %v483_v22 = vadd.f32 %v808_v17, %v482_v21 }
 0x112   : > { %v854_v23 = vpop.f32.mrf.mxu0 }
 0x113   : > { %v487_v25 = vmax.f32 %v483_v22, 0.0 }
 0x115   : > { %v490_v26 = vpack.c.bf16 %v487_v25, %v486_v24 }
 0x117   : > { %872 = vmatmul.mubr.bf16.vlgmr.msra.gmra.mxu1 %v490_v26 }
 0x1d7   : > { %v589_v28 = vpop.f32.mrf.mxu1 }
 0x1d8   : > { %v596_v29 = vadd.f32 %v589_v28, %v488_v27 }
 0x1d9   : > { %v873_v30 = vpop.f32.mrf.mxu1 }
 0x1da   : > { %598 = vst.msk [vmem:[#allocation2] sm:$0xff] %vm441_vm2, %v596_v29  ;;  %603 = sbr.rel (%p821_p7) target bundleno = 799 (0x31f), region = 97 }
 0x1db   : > { %v592_v32 = vpop.f32.mrf.mxu1 }
 0x1dc   : > { %v597_v33 = vadd.f32 %v592_v32, %v489_v31 }
 0x1dd   : > { %v874_v34 = vpop.f32.mrf.mxu1 }
 0x1de   : > { %599 = vst.msk [vmem:[#allocation2 + $0x8] sm:$0xff] %vm441_vm2, %v597_v33 }
 0x1df   : > { %v832_v35 = vld [vmem:[%s1257_s8] sm:$0xff]  }
 0x1e0   : > { %v833_v37 = vunpack.c.l.bf16 %v832_v35  ;;  %v834_v38 = vunpack.c.h.bf16 %v832_v35  ;;  %v822_v40 = vld [vmem:[%s1376_s4] ss:$0 sm:$0xff] }
 0x1e1   : > { %v608_v36 = vld [vmem:[#allocation2] sm:$0xff] }
 0x1e2   : > { %v610_v41 = vadd.f32 %v833_v37, %v608_v36  ;;  %v823_v0 = vld [vmem:[%s1377_s5] ss:$0 sm:$0xff] }
 0x1e3   : > { %v824_v2 = vld [vmem:[%s1378_s6] ss:$0 sm:$0xff] }
 0x1e4   : > { %v619_v43 = vadd.f32 %v822_v40, %v610_v41 }
 0x1e5   : > { %v609_v39 = vld [vmem:[#allocation2 + $0x8] sm:$0xff] }
 0x1e6   : > { %v611_v42 = vadd.f32 %v834_v38, %v609_v39  ;;  %v623_v45 = vsel %vm441_vm2, %v619_v43, 0.0 }
 0x1e7   : > { %624 = vadd.xlane.f32.xlu0 %v623_v45 }
 0x1e8   : > { %v620_v44 = vadd.f32 %v822_v40, %v611_v42 }
 0x1ea   : > { %v626_v46 = vsel %vm441_vm2, %v620_v44, 0.0 }
 0x1eb   : > { %627 = vadd.xlane.f32.xlu0 %v626_v46 }
 0x270   : > { %v625_v47 = vpop.xlane.xlu0 %624 }
 0x271   : > { %v630_v48 = vmul.f32 0.03125, %v625_v47 }
 0x273   : > { %v632_v49 = vsub.f32 %v619_v43, %v630_v48 }
 0x274   : > { %v628_v50 = vpop.xlane.xlu0 %627 }
 0x275   : > { %v631_v51 = vmul.f32 0.03125, %v628_v50  ;;  %v634_v52 = vmul.f32 %v632_v49, %v632_v49 }
 0x277   : > { %v633_v53 = vsub.f32 %v620_v44, %v631_v51  ;;  %v636_v54 = vsel %vm441_vm2, %v634_v52, 0.0 }
 0x278   : > { %637 = vadd.xlane.f32.xlu1 %v636_v54 }
 0x279   : > { %v635_v55 = vmul.f32 %v633_v53, %v633_v53 }
 0x27b   : > { %v639_v56 = vsel %vm441_vm2, %v635_v55, 0.0 }
 0x27c   : > { %640 = vadd.xlane.f32.xlu1 %v639_v56 }
 0x301   : > { %v638_v57 = vpop.xlane.xlu1 %637 }
 0x302   : > { %v642_v58 = vmul.f32 0.03125, %v638_v57 }
 0x304   : > { %v644_v59 = vadd.f32 1e-05, %v642_v58 }
 0x305   : > { %v641_v60 = vpop.xlane.xlu1 %640 }
 0x306   : > { %978 = vrsqrt.f32 %v644_v59  ;;  %v643_v61 = vmul.f32 0.03125, %v641_v60 }
 0x308   : > { %v645_v62 = vadd.f32 1e-05, %v643_v61 }
 0x30a   : > { %980 = vrsqrt.f32 %v645_v62 }
 0x313   : > { %v979_v63 = vpop.eup %978 }
 0x314   : > { %v648_v1 = vmul.f32 %v979_v63, %v632_v49 }
 0x316   : > { %v656_v3 = vmul.f32 %v823_v0, %v648_v1 }
 0x317   : > { %v981_v4 = vpop.eup %980 }
 0x318   : > { %v664_v5 = vadd.f32 %v824_v2, %v656_v3  ;;  %v649_v6 = vmul.f32 %v981_v4, %v633_v53 }
 0x31a   : > { %666 = vst.msk [vmem:[%s1265_s23] sm:$0xff] %vm441_vm2, %v664_v5  ;;  %v657_v7 = vmul.f32 %v823_v0, %v649_v6 }
 0x31c   : > { %v665_v8 = vadd.f32 %v824_v2, %v657_v7 }
 0x31e   : > { %667 = vst.msk [vmem:[%s1265_s23 + $0x8] sm:$0xff] %vm441_vm2, %v665_v8 }
 0x31f PF: > { %s830_s22 = sshll.u32 %s1078_s30, 8  ;;  %s682_s16 = sshll.u32 %s1265_s23, 4  ;;  %s1311_s16 = int_to_ptr.vmem [resolvable:$true] %s682_s16 }
 0x320   : > { %s1308_s15 = scalar_lea.hbm %s1379_s7, %s830_s22  ;;  %s1402_s20 = sand.u32 1, %s1058_s25  }
 0x321   : > { %s1315_s12 = scalar_lea.sflag [#allocation5], %s1402_s20  ;;  %s982_s18 = scalar_lea.vmem %s1311_s16, 256 }
 0x322   : > { %p983_p8 = scmp.ne.s32.totalorder %s1311_s16, %s982_s18  ;;  %s1095_s30 = smov [#allocation4]  }
 0x323   : > { %s986_s27 = sshll.u32 %s1095_s30, 4  ;;  %s987_s27 = int_to_ptr.vmem [resolvable:$false] %s986_s27 }
 0x324   : > { %p984_p9 = pnand %p983_p8, %p1217_p10  ;;  %s988_s14 = scalar_lea.vmem %s987_s27, 512 }
 0x325   : > { %p989_p13 = scmp.lt.s32.totalorder %s1311_s16, %s987_s27  ;;  %p990_p0 = scmp.lt.s32.totalorder %s988_s14, %s982_s18 }
 0x326   : > { %p985_p11 = pneg %p984_p9 }
 0x327   : > { %p991_p1 = por %p990_p0, %p989_p13 }
 0x329   : > { %p992_p2 = pnand %p991_p1, %p985_p11 }
 0x32b   : > { %995 = shalt.err (!%p992_p2)
}
 0x32c   : > { %s996_s23 = scalar_lea.hbm %s1308_s15, 256  ;;  %s1000_s28 = scalar_lea.hbm %s1379_s7, 1024 }
 0x32d   : > { %p997_p3 = scmp.ne.s32.totalorder %s1308_s15, %s996_s23  ;;  %p1001_p6 = scmp.lt.s32.totalorder %s1308_s15, %s1379_s7 }
 0x32e   : > { %p1002_p7 = scmp.lt.s32.totalorder %s1000_s28, %s996_s23 }
 0x32f   : > { %p998_p4 = pnand %p997_p3, %p1217_p10 }
 0x330   : > { %p1003_p8 = por %p1002_p7, %p1001_p6 }
 0x331   : > { %p999_p5 = pneg %p998_p4 }
 0x333   : > { %p1004_p9 = pnand %p1003_p8, %p999_p5 }
 0x335   : > { %1007 = shalt.err (!%p1004_p9)
}
 0x336   : > { %s1096_s8 = smov 128   ;;  %s1097_s13 = smov 8  }
 0x337   : > { %875 = dma.vmem_to_hbm [thread:$0]  (%p1217_p10), %s1311_s16, 256, %s1308_s15, %s1315_s12, %s1096_s8, %s1096_s8, %s1097_s13  }
 0x338 PF: > { %p881_p11 = scmp.ge.s32.totalorder %s1090_s10, 2  ;;  %s697_s22 = sand.u32 1, %s1054_s24  }
 0x339   : > { %s698_s17 = scalar_lea.sflag [#allocation5], %s697_s22 }
 0x33a   : > { %p878_p13 = pnand %p881_p11, %p1224_p12 }
 0x33c   : > { %p879_p0 = pneg %p878_p13 }
 0x33e   : > { %1049 = dma.done.wait (%p879_p0), %s698_s17, 256  }
 0x33f   : > { %1051 = vsyncadd (%p879_p0), %s698_s17, 4294967040  ;;  %s20_s10 = sadd.s32 1, %s1090_s10   ;;  %s1404_s11 = sld [smem:[#allocation7_spill]] }
 0x340   : > { %p17_p1 = scmp.ge.s32.totalorder %s20_s10, 10   ;;  %s1405_s26 = sld [smem:[#allocation14_spill]] }
 0x341   : > { %s1406_s27 = sld [smem:[#allocation8_spill]]  ;;  %s1412_s24 = smov %s1058_s25 }
 0x342   : > { %s1407_s28 = sld [smem:[#allocation13_spill]]  ;;  %19 = sbr.rel (!%p17_p1) target bundleno = 8 (0x8), region = 146 }
 0x343   : > { %s1408_s29 = sld [smem:[#allocation9_spill]] }
 0x344   : > { %s1409_s30 = sld [smem:[#allocation10_spill]] }
 0x345   : > { %s1410_s8 = sld [smem:[#allocation11_spill]]  ;;  %s1413_s25 = smov %s1404_s11 }
 0x346   : > { %s1411_s9 = sld [smem:[#allocation12_spill]] }
 0x347   :  { %703 = vsyncpa [#allocation5], 1 }
 0x348   :  { %705 = vsyncpa [#allocation5 + $0x1], 1 }

// kernel: encoder_forward.10
= control target key start
LH: loop header
LB: loop body
LE: loop exit
PB: predicated region body
PF: predicated region fallthrough
CT: control target
= control target key end

     0   :  { %s1933_s0 = inlined_call_operand.vmem [shape: bf16[2,32,32], index: 0, kind: input, shape index: {}]   ;;  %s1934_s1 = inlined_call_operand.vmem [shape: bf16[2,2,32,16], index: 1, kind: input, shape index: {}]   ;;  %s1935_s2 = inlined_call_operand.vmem [shape: bf16[2,2,32,16], index: 2, kind: input, shape index: {}]   ;;  %s1936_s3 = inlined_call_operand.vmem [shape: bf16[2,2,32,16], index: 3, kind: input, shape index: {}]   ;;  %s1937_s4 = inlined_call_operand.vmem [shape: bf16[32,32], index: 4, kind: input, shape index: {}]   ;;  %s1938_s5 = inlined_call_operand.vmem [shape: f32[1,32], index: 5, kind: input, shape index: {}]   ;;  %s1939_s6 = inlined_call_operand.vmem [shape: f32[1,32], index: 6, kind: input, shape index: {}]   ;;  %s1940_s7 = inlined_call_operand.vmem [shape: f32[1,32], index: 7, kind: input, shape index: {}]   ;;  %s1941_s8 = inlined_call_operand.vmem [shape: bf16[2,32,32], index: 8, kind: output, shape index: {}]  }
   0x1   :  { %1946 = sst [smem:[#allocation12_spill]] %s1938_s5 }
   0x2   :  { %1947 = sst [smem:[#allocation13_spill]] %s1939_s6 }
   0x3   :  { %1948 = sst [smem:[#allocation14_spill]] %s1940_s7 }
   0x4   :  { %s1697_s27 = smov 0   ;;  %s1699_s28 = smov 0  }
   0x5   :  { %s1701_s29 = smov 0   ;;  %s1703_s30 = smov 0  }
   0x6   :  { %s1705_s9 = smov 0   ;;  %s1707_s10 = smov 0  }
   0x7   :  { %s1709_s11 = smov 0   ;;  %s1711_s12 = smov 0  }
   0x8   :  { %s1713_s13 = smov 0   ;;  %s1715_s14 = smov 0  }
   0x9   :  { %s1717_s15 = smov 0  }
   0xa LB: > { %1949 = sst [smem:[#allocation8_spill]] %s1633_s13  ;;  %s30_s16 = sadd.s32 1, %s1629_s12  ;;  %s1641_s15 = sphi %s1717_s15, %s18_s15   ;;  %s1637_s14 = sphi %s1715_s14, %s1969_s14   ;;  %s1633_s13 = sphi %s1713_s13, %s1960_s13   ;;  %s1629_s12 = sphi %s1711_s12, %s1968_s12   ;;  %s1625_s11 = sphi %s1709_s11, %s1967_s11   ;;  %s1621_s10 = sphi %s1707_s10, %s1958_s10   ;;  %s1617_s9 = sphi %s1705_s9, %s1966_s9   ;;  %s1613_s30 = sphi %s1703_s30, %s1965_s30   ;;  %s1609_s29 = sphi %s1701_s29, %s1964_s29   ;;  %s1605_s28 = sphi %s1699_s28, %s1963_s28   ;;  %s1601_s27 = sphi %s1697_s27, %s1962_s27  }
   0xb   : > { %p31_p0 = scmp.ge.s32.totalorder %s30_s16, 2  ;;  %s33_s17 = sadd.s32 1, %s1633_s13 }
   0xc   : > { %p81_p1 = scmp.ne.s32.totalorder %s1613_s30, %s1609_s29  ;;  %p82_p2 = scmp.eq.s32.totalorder %s1641_s15, 0 }
   0xd   : > { %s1971_s16 = smov (%p31_p0, %s30_s16), 0  ;;  %s1973_s17 = smov (!%p31_p0, %s33_s17), %s1633_s13 }
   0xe   : > { %1950 = sst [smem:[#allocation9_spill]] %s1971_s16  ;;  %p35_p3 = scmp.ge.s32.totalorder %s1973_s17, 2 }
   0xf   : > { %s37_s18 = sadd.s32 1, %s1637_s14  ;;  %p1761_p4 = por %p82_p2, %p81_p1 }
  0x10   : > { %p109_p5 = scmp.ne.s32.totalorder %s1605_s28, %s1601_s27  ;;  %s1975_s17 = smov (%p35_p3, %s1973_s17), 0 }
  0x11   : > { %1952 = sst [smem:[#allocation10_spill]] %s1975_s17  ;;  %s1977_s18 = smov (!%p35_p3, %s37_s18), %s1637_s14 }
  0x12   : > { %p1770_p6 = por %p109_p5, %p82_p2  ;;  %p39_p7 = scmp.ge.s32.totalorder %s1977_s18, 2 }
  0x13   : > { %s70_s21 = ssub.s32 %s1633_s13, %s1975_s17  ;;  %s98_s22 = ssub.s32 %s1629_s12, %s1971_s16 }
  0x14   : > { %s1979_s18 = smov (%p39_p7, %s1977_s18), 0  ;;  %s74_s23 = sadd.s32 1, %s1613_s30 }
  0x15   : > { %1954 = sst [smem:[#allocation11_spill]] %s1979_s18  ;;  %s69_s24 = ssub.s32 %s1637_s14, %s1979_s18 }
  0x16   : > { %s102_s25 = sadd.s32 1, %s1605_s28  ;;  %s71_s26 = sor.u32 %s70_s21, %s69_s24 }
  0x17   : > { %s99_s7 = sor.u32 %s98_s22, %s69_s24  ;;  %p72_p8 = scmp.eq.s32.totalorder %s71_s26, 0 }
  0x18   : > { %p100_p9 = scmp.eq.s32.totalorder %s99_s7, 0  ;;  %p1319_p10 = scmp.ge.s32.totalorder %s1641_s15, 8 }
  0x19   : > { %s1785_s6 = scalar_select %p72_p8, %s1613_s30, %s74_s23  }
  0x1a   : > { %s1788_s5 = scalar_select %p100_p9, %s1605_s28, %s102_s25  }
  0x1b   : > { %287 = sbr.rel (%p1319_p10) target bundleno = 56 (0x38), region = 32 }
  0x20   : > { %303 = sbr.rel (!%p1761_p4) target bundleno = 40 (0x28), region = 40  ;;  %s305_s17 = sand.u32 (%p1761_p4), 1, %s1613_s30  }
  0x21   : > { %s1321_s18 = sshll.u32 (%p1761_p4), %s1633_s13, 1  ;;  %s1320_s16 = sshll.u32 (%p1761_p4), %s305_s17, 4 }
  0x22   : > { %s1322_s21 = sshll.u32 (%p1761_p4), %s1637_s14, 3  ;;  %s307_s26 = scalar_lea.vmem (%p1761_p4), [#allocation5], %s1320_s16 }
  0x23   : > { %s310_s22 = sadd.s32 (%p1761_p4), %s1322_s21, %s1321_s18 }
  0x24   : > { %s1323_s24 = sshll.u32 (%p1761_p4), %s310_s22, 2 }
  0x25   : > { %s312_s25 = scalar_lea.vmem %s1934_s1, %s1323_s24 }
  0x26   : > { %v329_v0 = vld [vmem:[%s312_s25] sm:$0xff]   ;;  %v333_v1 = vld [vmem:[%s312_s25 + $0x10] sm:$0xff]  }
  0x27   : > { %330 = vst [vmem:[%s307_s26] sm:$0xff] %v329_v0   ;;  %334 = vst [vmem:[%s307_s26 + $0x8] sm:$0xff] %v333_v1  }
  0x28 PF: > { %368 = sbr.rel (!%p1770_p6) target bundleno = 48 (0x30), region = 81  ;;  %s370_s17 = sand.u32 (%p1770_p6), 1, %s1605_s28  }
  0x29   : > { %s1325_s19 = sshll.u32 (%p1770_p6), %s1629_s12, 1  ;;  %s1324_s18 = sshll.u32 (%p1770_p6), %s370_s17, 4 }
  0x2a   : > { %s1326_s21 = sshll.u32 (%p1770_p6), %s1637_s14, 3  ;;  %s372_s16 = scalar_lea.vmem (%p1770_p6), [#allocation6], %s1324_s18 }
  0x2b   : > { %s375_s22 = sadd.s32 (%p1770_p6), %s1326_s21, %s1325_s19 }
  0x2c   : > { %s1327_s13 = sshll.u32 (%p1770_p6), %s375_s22, 2 }
  0x2d   : > { %s377_s23 = scalar_lea.vmem %s1935_s2, %s1327_s13 }
  0x2e   : > { %v394_v2 = vld [vmem:[%s377_s23] sm:$0xff]   ;;  %v398_v3 = vld [vmem:[%s377_s23 + $0x10] sm:$0xff]  }
  0x2f   : > { %395 = vst [vmem:[%s372_s16] sm:$0xff] %v394_v2   ;;  %399 = vst [vmem:[%s372_s16 + $0x8] sm:$0xff] %v398_v3  }
  0x30 PF: > { %433 = sbr.rel (!%p1770_p6) target bundleno = 56 (0x38), region = 122  ;;  %s435_s25 = sand.u32 (%p1770_p6), 1, %s1605_s28  }
  0x31   : > { %s1329_s26 = sshll.u32 (%p1770_p6), %s1629_s12, 1  ;;  %s1328_s17 = sshll.u32 (%p1770_p6), %s435_s25, 4 }
  0x32   : > { %s1330_s19 = sshll.u32 (%p1770_p6), %s1637_s14, 3  ;;  %s437_s18 = scalar_lea.vmem (%p1770_p6), [#allocation7], %s1328_s17 }
  0x33   : > { %s440_s21 = sadd.s32 (%p1770_p6), %s1330_s19, %s1329_s26 }
  0x34   : > { %s1331_s22 = sshll.u32 (%p1770_p6), %s440_s21, 2 }
  0x35   : > { %s442_s24 = scalar_lea.vmem %s1936_s3, %s1331_s22 }
  0x36   : > { %v459_v4 = vld [vmem:[%s442_s24] sm:$0xff]   ;;  %v463_v5 = vld [vmem:[%s442_s24 + $0x10] sm:$0xff]  }
  0x37   : > { %460 = vst [vmem:[%s437_s18] sm:$0xff] %v459_v4   ;;  %464 = vst [vmem:[%s437_s18 + $0x8] sm:$0xff] %v463_v5  }
  0x38 PF: > { %p1332_p11 = scmp.ge.s32.totalorder %s1641_s15, 1  ;;  %p497_p12 = scmp.lt.s32.totalorder %s1641_s15, 9 }
  0x3a   : > { %p498_p13 = pnand %p1332_p11, %p497_p12 }
  0x3b   : > { %s504_s20 = sand.u32 (!%p498_p13), 1, %s1609_s29   ;;  %s511_s23 = sand.u32 (!%p498_p13), 1, %s1601_s27  }
  0x3c   : > { %501 = sbr.rel (%p498_p13) target bundleno = 1553 (0x611), region = 163  ;;  %s1819_s16 = sshll.u32 (!%p498_p13), %s504_s20, 4 }
  0x3d   : > { %s1821_s25 = sshll.u32 (!%p498_p13), %s511_s23, 4  ;;  %s1336_s26 = sshll.u32 (!%p498_p13), %s1621_s10, 1 }
  0x3e   : > { %p573_p0 = scmp.lt.s32.totalorder (!%p498_p13), %s1625_s11, 1  ;;  %p575_p1 = scmp.lt.s32.totalorder (!%p498_p13), %s1336_s26, 3 }
  0x3f   : > { %s506_s18 = scalar_lea.vmem (!%p498_p13), [#allocation5], %s1819_s16  ;;  %s513_s20 = scalar_lea.vmem (!%p498_p13), [#allocation6], %s1821_s25 }
  0x40   : > { %s520_s10 = scalar_lea.vmem (!%p498_p13), [#allocation7], %s1821_s25  ;;  %p1342_p2 = scmp.ne.s32.totalorder (!%p498_p13), %s1617_s9, 0 }
  0x41   : > { %s1981_s11 = smov (!%p573_p0, %s1625_s11), 1  ;;  %s1983_s26 = smov (!%p575_p1, %s1336_s26), 3 }
  0x42   : > { %s1337_s17 = sshll.u32 %s1981_s11, 2  ;;  %599 = sbr.rel (%p1342_p2) target bundleno = 78 (0x4e), region = 179 }
  0x43   : > { %s578_s19 = sadd.s32 %s1337_s17, %s1983_s26 }
  0x44   : > { %s1338_s21 = sshll.u32 %s578_s19, 2 }
  0x45   : > { %s1829_s29 = scalar_lea.vmem %s1933_s0, %s1338_s21  ;;  %s1834_s24 = scalar_lea.vmem %s1941_s8, %s1338_s21 }
  0x47   : > { %vm600_vm0 = vcmask 7168   ;;  %vm609_vm1 = vcmask 130048   ;;  %v1643_v6 = vmov -inf   ;;  %v1644_v7 = vmov 0.0  }
  0x48   : > { %601 = vst.msk [vmem:[#allocation2] sm:$0xff] %vm600_vm0, %v1643_v6  ;;  %602 = vst.msk [vmem:[#allocation2 + $0x8] sm:$0xff] %vm600_vm0, %v1643_v6 }
  0x49   : > { %603 = vst.msk [vmem:[#allocation2 + $0x10] sm:$0xff] %vm600_vm0, %v1643_v6  ;;  %604 = vst.msk [vmem:[#allocation2 + $0x18] sm:$0xff] %vm600_vm0, %v1643_v6 }
  0x4a   : > { %605 = vst.msk [vmem:[#allocation3] sm:$0xff] %vm600_vm0, %v1644_v7  ;;  %606 = vst.msk [vmem:[#allocation3 + $0x8] sm:$0xff] %vm600_vm0, %v1644_v7 }
  0x4b   : > { %607 = vst.msk [vmem:[#allocation3 + $0x10] sm:$0xff] %vm600_vm0, %v1644_v7  ;;  %608 = vst.msk [vmem:[#allocation3 + $0x18] sm:$0xff] %vm600_vm0, %v1644_v7 }
  0x4c   : > { %610 = vst.msk [vmem:[#allocation4] sm:$0xff] %vm609_vm1, %v1644_v7  ;;  %611 = vst.msk [vmem:[#allocation4 + $0x8] sm:$0xff] %vm609_vm1, %v1644_v7 }
  0x4d   : > { %612 = vst.msk [vmem:[#allocation4 + $0x10] sm:$0xff] %vm609_vm1, %v1644_v7  ;;  %613 = vst.msk [vmem:[#allocation4 + $0x18] sm:$0xff] %vm609_vm1, %v1644_v7 }
  0x4e PF: > { %v1512_v8 = vld [vmem:[%s513_s20] sm:$0xff]   ;;  %v1645_v9 = vmov 0.0   ;;  %vm636_vm2 = vcmask 130048   ;;  %v1513_v10 = vld [vmem:[%s513_s20 + $0x8] sm:$0xff]   ;;  %vm1646_vm3 = vmmov 0   ;;  %v1647_v27 = vmov 0  }
  0x4f   : > { %1381 = vmatprep.subr.bf16.mxu0 %v1645_v9  ;;  %1387 = vmatprep.subr.bf16.mxu1 %v1645_v9  ;;  %v641_v11 = vsel %vm636_vm2, %v1512_v8, 0  ;;  %v698_v12 = vsel %vm636_vm2, %v1513_v10, 0  ;;  %v1514_v13 = vld [vmem:[%s506_s18] sm:$0xff]   ;;  %v1515_v14 = vld [vmem:[%s506_s18 + $0x8] sm:$0xff]   ;;  %vm829_vm4 = vcmask 7168   ;;  %p1353_p3 = scmp.ne.s32.totalorder %s1617_s9, 1 }
  0x50   : > { %1382 = vmatpush3.bf16.xpose.msra.mxu0 %v641_v11  ;;  %1383 = vmatprep.mubr.msk.bf16.mxu0 %vm1646_vm3, %v1645_v9  ;;  %v741_v28 = vld [vmem:[#allocation2] sm:$0xff]  ;;  %v743_v29 = vld [vmem:[#allocation2 + $0x10] sm:$0xff]  ;;  %v742_v34 = vld [vmem:[#allocation2 + $0x8] sm:$0xff]  ;;  %s1651_s25 = smov (!%p1353_p3), 16   ;;  %s1955_s19 = sld [smem:[#allocation12_spill]] (!%p1353_p3) }
  0x51   : > { %1388 = vmatpush3.bf16.xpose.msra.mxu1 %v698_v12  ;;  %1389 = vmatprep.mubr.msk.bf16.mxu1 %vm1646_vm3, %v1645_v9  ;;  %v744_v36 = vld [vmem:[#allocation2 + $0x18] sm:$0xff]  ;;  %v1516_v45 = vld [vmem:[%s520_s10] sm:$0xff]   ;;  %s1956_s7 = sld [smem:[#allocation13_spill]] (!%p1353_p3) }
  0x52   : > { %1393 = vmatprep.subr.bf16.mxu0 %v1645_v9  ;;  %1399 = vmatprep.subr.bf16.mxu1 %v1645_v9  ;;  %v1517_v46 = vld [vmem:[%s520_s10 + $0x8] sm:$0xff]   ;;  %s1957_s13 = sld [smem:[#allocation14_spill]] (!%p1353_p3) }
  0x53   : > { %1511 = vset.pattern.permute.xlu1 %v1647_v27  ;;  %1510 = vset.pattern.permute.xlu0 %v1647_v27 }
  0x57   : > { %1384 = vmatmul.mubr.msk.bf16.vlgmr.msra.gmra.mxu0 %vm636_vm2, %v1514_v13  ;;  %v805_v13 = vld [vmem:[#allocation3] sm:$0xff] }
  0x58   : > { %1390 = vmatmul.mubr.msk.bf16.vlgmr.msra.gmra.mxu1 %vm636_vm2, %v1515_v14  ;;  %1395 = vmatprep.mubr.msk.bf16.mxu0 %vm1646_vm3, %v1645_v9 }
  0x59   : > { %1401 = vmatprep.mubr.msk.bf16.mxu1 %vm1646_vm3, %v1645_v9  ;;  %1394 = vmatpush3.bf16.msra.mxu0 %v1516_v45 }
  0x5a   : > { %1400 = vmatpush3.bf16.msra.mxu1 %v1517_v46 }
 0x117   : > { %v677_v15 = vpop.f32.mrf.mxu0 }
 0x118   : > { %v734_v16 = vpop.f32.mrf.mxu1  ;;  %v745_v17 = vsel %vm636_vm2, %v677_v15, -inf }
 0x119   : > { %v751_v18 = vsel %vm636_vm2, %v734_v16, -inf  ;;  %746 = vmax.xlane.f32.xlu0 %v745_v17  ;;  %v1385_v19 = vpop.f32.mrf.mxu0 }
 0x11a   : > { %752 = vmax.xlane.f32.xlu1 %v751_v18  ;;  %v1391_v20 = vpop.f32.mrf.mxu1  ;;  %v806_v18 = vld [vmem:[#allocation3 + $0x8] sm:$0xff] }
 0x11b   : > { %v680_v21 = vpop.f32.mrf.mxu0 }
 0x11c   : > { %v737_v22 = vpop.f32.mrf.mxu1  ;;  %v748_v23 = vsel %vm636_vm2, %v680_v21, -inf }
 0x11d   : > { %v754_v24 = vsel %vm636_vm2, %v737_v22, -inf  ;;  %749 = vmax.xlane.f32.xlu0 %v748_v23  ;;  %v1386_v25 = vpop.f32.mrf.mxu0 }
 0x11e   : > { %755 = vmax.xlane.f32.xlu1 %v754_v24  ;;  %v1392_v26 = vpop.f32.mrf.mxu1 }
 0x11f   : > { %v808_v26 = vld [vmem:[#allocation3 + $0x18] sm:$0xff] }
 0x1a2   : > { %v747_v30 = vpop.xlane.xlu0 %746 }
 0x1a3   : > { %v753_v31 = vpop.xlane.xlu1 %752  ;;  %v757_v32 = vmax.f32 %v741_v28, %v747_v30 }
 0x1a4   : > { %v759_v33 = vmax.f32 %v743_v29, %v753_v31 }
 0x1a5   : > { %v761_v35 = vsub.f32 %v741_v28, %v757_v32  ;;  %972 = vst.msk [vmem:[#allocation2] sm:$0xff] %vm829_vm4, %v757_v32  ;;  %775 = vperm.xlu0 %1510, %v757_v32   ;;  %v834_v28 = vld [vmem:[#allocation4] sm:$0xff]  ;;  %v836_v32 = vld [vmem:[#allocation4 + $0x10] sm:$0xff] }
 0x1a6   : > { %v763_v37 = vsub.f32 %v743_v29, %v759_v33  ;;  %974 = vst.msk [vmem:[#allocation2 + $0x10] sm:$0xff] %vm829_vm4, %v759_v33  ;;  %785 = vperm.xlu1 %1511, %v759_v33   ;;  %v750_v38 = vpop.xlane.xlu0 %749  ;;  %v835_v33 = vld [vmem:[#allocation4 + $0x8] sm:$0xff] }
 0x1a7   : > { %v765_v39 = vmul.f32 1.442695, %v761_v35  ;;  %v756_v40 = vpop.xlane.xlu1 %755  ;;  %v758_v41 = vmax.f32 %v742_v34, %v750_v38 }
 0x1a8   : > { %v760_v42 = vmax.f32 %v744_v36, %v756_v40  ;;  %v769_v0 = vmul.f32 1.442695, %v763_v37 }
 0x1a9   : > { %1518 = vpow2.f32 %v765_v39  ;;  %v762_v43 = vsub.f32 %v742_v34, %v758_v41  ;;  %973 = vst.msk [vmem:[#allocation2 + $0x8] sm:$0xff] %vm829_vm4, %v758_v41 }
 0x1aa   : > { %v764_v44 = vsub.f32 %v744_v36, %v760_v42  ;;  %975 = vst.msk [vmem:[#allocation2 + $0x18] sm:$0xff] %vm829_vm4, %v760_v42  ;;  %780 = vperm.xlu1 %1511, %v758_v41   ;;  %v837_v41 = vld [vmem:[#allocation4 + $0x18] sm:$0xff] }
 0x1ab   : > { %v767_v6 = vmul.f32 1.442695, %v762_v43 }
 0x1ac   : > { %v771_v9 = vmul.f32 1.442695, %v764_v44 }
 0x1ae   : > { %790 = vperm.xlu1 %1511, %v760_v42  }
 0x1b6   : > { %v1519_v47 = vpop.eup %1518 }
 0x1b7   : > { %840 = vperm.xlu1 %1511, %v1519_v47   ;;  %v809_v14 = vmul.f32 %v1519_v47, %v805_v13 }
 0x220   : > { %v776_v48 = vpop.permute.xlu0 %775 }
 0x221   : > { %v786_v49 = vpop.permute.xlu1 %785  ;;  %v793_v50 = vsub.f32 %v677_v15, %v776_v48 }
 0x222   : > { %v795_v51 = vsub.f32 %v734_v16, %v786_v49  ;;  %v807_v16 = vld [vmem:[#allocation3 + $0x10] sm:$0xff] }
 0x223   : > { %v797_v52 = vmul.f32 1.442695, %v793_v50 }
 0x224   : > { %v801_v53 = vmul.f32 1.442695, %v795_v51 }
 0x225   : > { %1520 = vpow2.f32 %v797_v52  ;;  %v781_v54 = vpop.permute.xlu1 %780 }
 0x226   : > { %v794_v55 = vsub.f32 %v680_v21, %v781_v54  ;;  %1522 = vpow2.f32 %v801_v53 }
 0x228   : > { %v799_v56 = vmul.f32 1.442695, %v794_v55 }
 0x229   : > { %v791_v57 = vpop.permute.xlu1 %790 }
 0x22a   : > { %1524 = vpow2.f32 %v799_v56  ;;  %v796_v58 = vsub.f32 %v737_v22, %v791_v57 }
 0x22c   : > { %v803_v59 = vmul.f32 1.442695, %v796_v58 }
 0x22e   : > { %1526 = vpow2.f32 %v803_v59 }
 0x22f   : > { %1528 = vpow2.f32 %v769_v0 }
 0x230   : > { %1530 = vpow2.f32 %v767_v6 }
 0x231   : > { %1532 = vpow2.f32 %v771_v9 }
 0x232   : > { %v1521_v60 = vpop.eup %1520  ;;  %v841_v12 = vpop.permute.xlu1 %840 }
 0x233   : > { %v813_v61 = vsel %vm636_vm2, %v1521_v60, 0.0  ;;  %v1523_v62 = vpop.eup %1522  ;;  %v858_v31 = vmul.f32 %v841_v12, %v834_v28 }
 0x234   : > { %814 = vadd.xlane.f32.xlu1 %v813_v61  ;;  %v819_v1 = vsel %vm636_vm2, %v1523_v62, 0.0 }
 0x237   : > { %v1525_v63 = vpop.eup %1524 }
 0x238   : > { %v816_v2 = vsel %vm636_vm2, %v1525_v63, 0.0  ;;  %820 = vadd.xlane.f32.xlu1 %v819_v1  ;;  %v862_v3 = vpack.c.bf16 %v1525_v63, %v1521_v60 }
 0x239   : > { %817 = vadd.xlane.f32.xlu0 %v816_v2 }
 0x23a   : > { %1396 = vmatmul.mubr.msk.bf16.vlgmr.msra.gmra.mxu0 %vm636_vm2, %v862_v3 }
 0x23b   : > { %v1527_v4 = vpop.eup %1526 }
 0x23c   : > { %v863_v5 = vpack.c.bf16 %v1527_v4, %v1523_v62  ;;  %v1529_v7 = vpop.eup %1528  ;;  %v822_v10 = vsel %vm636_vm2, %v1527_v4, 0.0 }
 0x23d   : > { %v1531_v8 = vpop.eup %1530  ;;  %v811_v19 = vmul.f32 %v1529_v7, %v807_v16 }
 0x23e   : > { %1402 = vmatmul.mubr.msk.bf16.vlgmr.msra.gmra.mxu1 %vm636_vm2, %v863_v5  ;;  %v1533_v11 = vpop.eup %1532  ;;  %v810_v21 = vmul.f32 %v1531_v8, %v806_v18 }
 0x23f   : > { %v812_v27 = vmul.f32 %v1533_v11, %v808_v26 }
 0x249   : > { %850 = vperm.xlu1 %1511, %v1529_v7  }
 0x24f   : > { %845 = vperm.xlu0 %1510, %v1531_v8  }
 0x26d   : > { %823 = vadd.xlane.f32.xlu1 %v822_v10 }
 0x27e   : > { %855 = vperm.xlu1 %1511, %v1533_v11  }
 0x2bd   : > { %v815_v15 = vpop.xlane.xlu1 %814 }
 0x2be   : > { %v825_v17 = vadd.f32 %v815_v15, %v809_v14 }
 0x2c0   : > { %830 = vst.msk [vmem:[#allocation3] sm:$0xff] %vm829_vm4, %v825_v17 }
 0x2c1   : > { %v821_v20 = vpop.xlane.xlu1 %820 }
 0x2c2   : > { %v827_v22 = vadd.f32 %v821_v20, %v811_v19  ;;  %v818_v23 = vpop.xlane.xlu0 %817 }
 0x2c3   : > { %v826_v24 = vadd.f32 %v818_v23, %v810_v21 }
 0x2c4   : > { %832 = vst.msk [vmem:[#allocation3 + $0x10] sm:$0xff] %vm829_vm4, %v827_v22 }
 0x2c5   : > { %831 = vst.msk [vmem:[#allocation3 + $0x8] sm:$0xff] %vm829_vm4, %v826_v24  ;;  %v851_v25 = vpop.permute.xlu1 %850 }
 0x2c6   : > { %v860_v38 = vmul.f32 %v851_v25, %v836_v32 }
 0x2ca   : > { %v846_v34 = vpop.permute.xlu0 %845 }
 0x2cb   : > { %v859_v39 = vmul.f32 %v846_v34, %v835_v33 }
 0x2f6   : > { %v824_v29 = vpop.xlane.xlu1 %823 }
 0x2f7   : > { %v828_v30 = vadd.f32 %v824_v29, %v812_v27 }
 0x2f9   : > { %833 = vst.msk [vmem:[#allocation3 + $0x18] sm:$0xff] %vm829_vm4, %v828_v30 }
 0x2fa   : > { %v907_v35 = vpop.f32.mrf.mxu0  ;;  %v856_v40 = vpop.permute.xlu1 %855 }
 0x2fb   : > { %v964_v36 = vadd.f32 %v907_v35, %v858_v31  ;;  %v861_v48 = vmul.f32 %v856_v40, %v837_v41 }
 0x2fc   : > { %v1397_v37 = vpop.f32.mrf.mxu0 }
 0x2fd   : > { %968 = vst.msk [vmem:[#allocation4] sm:$0xff] %vm636_vm2, %v964_v36 }
 0x2fe   : > { %v910_v42 = vpop.f32.mrf.mxu0  ;;  %v957_v43 = vpop.f32.mrf.mxu1 }
 0x2ff   : > { %v965_v44 = vadd.f32 %v910_v42, %v859_v39  ;;  %v966_v45 = vadd.f32 %v957_v43, %v860_v38 }
 0x300   : > { %v1398_v46 = vpop.f32.mrf.mxu0  ;;  %v1403_v47 = vpop.f32.mrf.mxu1 }
 0x301   : > { %969 = vst.msk [vmem:[#allocation4 + $0x8] sm:$0xff] %vm636_vm2, %v965_v44  ;;  %970 = vst.msk [vmem:[#allocation4 + $0x10] sm:$0xff] %vm636_vm2, %v966_v45  ;;  %979 = sbr.rel (%p1353_p3) target bundleno = 1553 (0x611), region = 183 }
 0x302   : > { %v960_v49 = vpop.f32.mrf.mxu1 }
 0x303   : > { %v967_v50 = vadd.f32 %v960_v49, %v861_v48 }
 0x304   : > { %v1404_v51 = vpop.f32.mrf.mxu1 }
 0x305   : > { %971 = vst.msk [vmem:[#allocation4 + $0x18] sm:$0xff] %vm636_vm2, %v967_v50 }
 0x306   : > { %v986_v52 = vld [vmem:[#allocation3 + $0x10] sm:$0xff]  ;;  %v987_v53 = vld [vmem:[#allocation3 + $0x18] sm:$0xff]  ;;  %v984_v54 = vld [vmem:[#allocation3] sm:$0xff]  ;;  %v1648_v55 = vmov 0   ;;  %v1649_v62 = vmov 0.0   ;;  %vm1650_vm5 = vmmov 0  }
 0x307   : > { %1534 = vset.pattern.permute.xlu0 %v1648_v55  ;;  %1543 = vrcp.f32 %v986_v52  ;;  %1535 = vset.pattern.permute.xlu1 %v1648_v55  ;;  %v985_v56 = vld [vmem:[#allocation3 + $0x8] sm:$0xff]  ;;  %v1542_v63 = vld [vmem:[%s1937_s4] sm:$0xff]   ;;  %vm1050_vm6 = vcmask 261120   ;;  %vm1154_vm7 = vcmask 257024  }
 0x308   : > { %1545 = vrcp.f32 %v987_v53  ;;  %v1541_v61 = vld [vmem:[%s1937_s4 + $0x8] sm:$0xff]   ;;  %1405 = vmatprep.subr.bf16.mxu0 %v1649_v62  ;;  %1409 = vmatprep.mubr.msk.bf16.mxu0 %vm1650_vm5, %v1649_v62  ;;  %v982_v1 = vld [vmem:[#allocation4 + $0x10] sm:$0xff]  ;;  %v980_v8 = vld [vmem:[#allocation4] sm:$0xff] }
 0x309   : > { %1547 = vrcp.f32 %v984_v54  ;;  %1406 = vmatpush3.bf16.msra.mxu0 %v1541_v61  ;;  %v981_v10 = vld [vmem:[#allocation4 + $0x8] sm:$0xff]  ;;  %v1367_v19 = vld [vmem:[%s1829_s29] sm:$0xff]  }
 0x30a   : > { %1549 = vrcp.f32 %v985_v56  ;;  %1407 = vmatprep.subr.bf16.mxu0 %v1649_v62  ;;  %v1354_v20 = vld [vmem:[%s1955_s19] ss:$0 sm:$0xff]  ;;  %v1368_v21 = vunpack.c.l.bf16 %v1367_v19  ;;  %v1369_v26 = vunpack.c.h.bf16 %v1367_v19 }
 0x30b   : > { %v1358_v50 = vld [vmem:[%s1956_s7] ss:$0 sm:$0xff] }
 0x30c   : > { %v983_v2 = vld [vmem:[#allocation4 + $0x18] sm:$0xff]  ;;  %v1359_v52 = vld [vmem:[%s1957_s13] ss:$0 sm:$0xff] }
 0x30d   : > { %1408 = vmatpush3.bf16.msra.mxu0 %v1542_v63 }
 0x314   : > { %v1544_v57 = vpop.eup %1543 }
 0x315   : > { %v1546_v58 = vpop.eup %1545  ;;  %1004 = vperm.xlu0 %1534, %v1544_v57  }
 0x316   : > { %v1548_v59 = vpop.eup %1547 }
 0x317   : > { %994 = vperm.xlu1 %1535, %v1548_v59   ;;  %v1550_v60 = vpop.eup %1549 }
 0x319   : > { %1009 = vperm.xlu0 %1534, %v1546_v58  }
 0x31b   : > { %999 = vperm.xlu1 %1535, %v1550_v60  }
 0x390   : > { %v1005_v0 = vpop.permute.xlu0 %1004 }
 0x391   : > { %v1014_v4 = vmul.f32 %v1005_v0, %v982_v1 }
 0x392   : > { %v995_v7 = vpop.permute.xlu1 %994 }
 0x393   : > { %v1012_v12 = vmul.f32 %v995_v7, %v980_v8 }
 0x394   : > { %v1010_v3 = vpop.permute.xlu0 %1009 }
 0x395   : > { %v1015_v5 = vmul.f32 %v1010_v3, %v983_v2 }
 0x396   : > { %v1000_v9 = vpop.permute.xlu1 %999 }
 0x397   : > { %v1536_v6 = vpack.i.bf16 %v1015_v5, %v1014_v4  ;;  %v1013_v13 = vmul.f32 %v1000_v9, %v981_v10 }
 0x399   : > { %1537 = vrot.lane.b32.xlu0 %v1536_v6, %s1651_s25 }
 0x40b   : > { %v1538_v11 = vpop.permute.xlu0 %1537 }
 0x40c   : > { %v1540_v14 = vunpack.i.h.bf16 %v1538_v11  ;;  %v1539_v15 = vunpack.i.l.bf16 %v1538_v11 }
 0x40e   : > { %v1024_v16 = vsel %vm636_vm2, %v1012_v12, %v1539_v15  ;;  %v1025_v17 = vsel %vm636_vm2, %v1013_v13, %v1540_v14 }
 0x40f   : > { %v1026_v18 = vpack.c.bf16 %v1025_v17, %v1024_v16 }
 0x411   : > { %1410 = vmatmul.mubr.msk.bf16.vlgmr.msra.gmra.mxu0 %vm1050_vm6, %v1026_v18 }
 0x4d1   : > { %v1088_v22 = vpop.f32.mrf.mxu0 }
 0x4d2   : > { %v1089_v23 = vadd.f32 %v1354_v20, %v1088_v22 }
 0x4d3   : > { %v1411_v24 = vpop.f32.mrf.mxu0 }
 0x4d4   : > { %v1099_v25 = vadd.f32 %v1368_v21, %v1089_v23 }
 0x4d5   : > { %v1091_v27 = vpop.f32.mrf.mxu0 }
 0x4d6   : > { %v1092_v28 = vadd.f32 %v1354_v20, %v1091_v27  ;;  %v1103_v29 = vsel %vm1050_vm6, %v1099_v25, 0.0 }
 0x4d7   : > { %1104 = vadd.xlane.f32.xlu1 %v1103_v29  ;;  %v1412_v30 = vpop.f32.mrf.mxu0 }
 0x4d8   : > { %v1100_v31 = vadd.f32 %v1369_v26, %v1092_v28 }
 0x4da   : > { %v1106_v32 = vsel %vm1050_vm6, %v1100_v31, 0.0 }
 0x4db   : > { %1107 = vadd.xlane.f32.xlu0 %v1106_v32 }
 0x560   : > { %v1105_v33 = vpop.xlane.xlu1 %1104 }
 0x561   : > { %v1110_v34 = vmul.f32 0.03125, %v1105_v33 }
 0x563   : > { %v1112_v35 = vsub.f32 %v1099_v25, %v1110_v34 }
 0x564   : > { %v1108_v36 = vpop.xlane.xlu0 %1107 }
 0x565   : > { %v1111_v37 = vmul.f32 0.03125, %v1108_v36  ;;  %v1114_v38 = vmul.f32 %v1112_v35, %v1112_v35 }
 0x567   : > { %v1113_v39 = vsub.f32 %v1100_v31, %v1111_v37  ;;  %v1116_v40 = vsel %vm1050_vm6, %v1114_v38, 0.0 }
 0x568   : > { %1117 = vadd.xlane.f32.xlu0 %v1116_v40 }
 0x569   : > { %v1115_v41 = vmul.f32 %v1113_v39, %v1113_v39 }
 0x56b   : > { %v1119_v42 = vsel %vm1050_vm6, %v1115_v41, 0.0 }
 0x56c   : > { %1120 = vadd.xlane.f32.xlu1 %v1119_v42 }
 0x5f1   : > { %v1118_v43 = vpop.xlane.xlu0 %1117 }
 0x5f2   : > { %v1122_v44 = vmul.f32 0.03125, %v1118_v43 }
 0x5f4   : > { %v1124_v45 = vadd.f32 1e-05, %v1122_v44 }
 0x5f5   : > { %v1121_v46 = vpop.xlane.xlu1 %1120 }
 0x5f6   : > { %1551 = vrsqrt.f32 %v1124_v45  ;;  %v1123_v47 = vmul.f32 0.03125, %v1121_v46 }
 0x5f8   : > { %v1125_v48 = vadd.f32 1e-05, %v1123_v47 }
 0x5fa   : > { %1553 = vrsqrt.f32 %v1125_v48 }
 0x603   : > { %v1552_v49 = vpop.eup %1551 }
 0x604   : > { %v1128_v51 = vmul.f32 %v1552_v49, %v1112_v35 }
 0x606   : > { %v1136_v53 = vmul.f32 %v1358_v50, %v1128_v51 }
 0x607   : > { %v1554_v54 = vpop.eup %1553 }
 0x608   : > { %v1144_v55 = vadd.f32 %v1359_v52, %v1136_v53  ;;  %v1129_v56 = vmul.f32 %v1554_v54, %v1113_v39 }
 0x60a   : > { %v1364_v57 = vpack.c.bf16 %v1144_v55, %v1144_v55  ;;  %v1137_v58 = vmul.f32 %v1358_v50, %v1129_v56 }
 0x60c   : > { %1155 = vst.msk [vmem:[%s1834_s24] sm:$0xf] %vm1154_vm7, %v1364_v57  ;;  %v1145_v59 = vadd.f32 %v1359_v52, %v1137_v58 }
 0x60e   : > { %v1365_v60 = vpack.c.bf16 %v1145_v59, %v1145_v59 }
 0x610   : > { %1156 = vst.msk [vmem:[%s1834_s24 + $0x4] sm:$0xf] %vm1154_vm7, %v1365_v60 }
 0x611 PF: > { %s18_s15 = sadd.s32 1, %s1641_s15   ;;  %s1958_s10 = sld [smem:[#allocation8_spill]] }
 0x612   : > { %p15_p4 = scmp.ge.s32.totalorder %s18_s15, 10   ;;  %s1959_s18 = sld [smem:[#allocation9_spill]] }
 0x613   : > { %s1960_s13 = sld [smem:[#allocation10_spill]]  ;;  %s1962_s27 = smov %s1605_s28 }
 0x614   : > { %s1961_s20 = sld [smem:[#allocation11_spill]]  ;;  %s1963_s28 = smov %s1788_s5 }
 0x615   : > { %s1964_s29 = smov %s1613_s30  ;;  %s1965_s30 = smov %s1785_s6 }
 0x616   : > { %s1966_s9 = smov %s1629_s12  ;;  %s1967_s11 = smov %s1637_s14 }
 0x617   :  { %17 = sbr.rel (!%p15_p4) target bundleno = 10 (0xa), region = 237 }
 0x618   : > { %s1968_s12 = smov %s1959_s18 }
 0x61a   : > { %s1969_s14 = smov %s1961_s20 }

</bundles_post_ra>
